<compile_context>
chip_gen: v7x
topology: tpu7x:2x2x1
jax: 0.10.0
libtpu: 0.0.40
codegen_flags: <defaults>
</compile_context>

<pallas_src>
import jax
import jax.numpy as jnp
from jax.experimental import pallas as pl
from jax.experimental.pallas import tpu as pltpu

D = 768              # encoder embedding dim (fixed by LayerNorm(768) / Linear(768, ...))
NUM_CLASSES = 1000   # cfg.num_classes default
LN_EPS = 1e-6        # fc_norm eps
LANE = 128
SUBLANE = 8
FEATS_TILE_BYTES = 4 * 1024 * 1024   # per-buffer cap for the feats batch tile


def cls_head_kernel(x_ref, w_ref, b_ref, o_ref):
    """Mean-pool over seq -> LayerNorm (no affine; folded into W) -> matmul + bias."""
    seq_len = x_ref.shape[1]

    # PredictionMode.MEAN_POOLING: accumulate in f32 without materializing an
    # f32 copy of the full [TB, T, D] block.
    pooled = jnp.sum(x_ref[...], axis=1, dtype=jnp.float32) * (1.0 / seq_len)  # [TB, D]

    # fc_norm statistics (affine folded into the head weight/bias host-side).
    mu = jnp.mean(pooled, axis=-1, keepdims=True)          # [TB, 1]
    xc = pooled - mu
    var = jnp.mean(xc * xc, axis=-1, keepdims=True)        # [TB, 1]
    xn = xc * jax.lax.rsqrt(var + LN_EPS)                  # [TB, D] f32

    # head: xn @ W_eff + b_eff  (W_eff bf16, f32 accumulation on the MXU).
    logits = jnp.dot(xn.astype(w_ref.dtype), w_ref[...],
                     preferred_element_type=jnp.float32)   # [TB, C_pad]
    o_ref[...] = logits + b_ref[...]


def image_classification_head(feats, ln_w, ln_b, head_w, head_b,
                              *, weight_dtype=jnp.bfloat16):
    """feats: [B, T, D]; ln_w/ln_b: [D]; head_w: [D, C] (PyTorch weight.T); head_b: [C]."""
    B, T, d = feats.shape
    assert d == D, d
    ln_w = jnp.asarray(ln_w).reshape(D)
    ln_b = jnp.asarray(ln_b).reshape(D)
    head_b = jnp.asarray(head_b).reshape(-1)
    C = head_w.shape[1]

    # Fold LayerNorm affine into the head:  (xn*g + b) @ W + c = xn @ (diag(g)W) + (b@W + c)
    w_eff = (ln_w[:, None].astype(jnp.float32) * head_w.astype(jnp.float32))
    b_eff = (head_b.astype(jnp.float32)
             + ln_b.astype(jnp.float32) @ head_w.astype(jnp.float32))

    # Pad class dim to a multiple of 128 for lane-dense weight loads / output stores.
    C_pad = ((C + LANE - 1) // LANE) * LANE
    if C_pad != C:
        w_eff = jnp.pad(w_eff, ((0, 0), (0, C_pad - C)))
        b_eff = jnp.pad(b_eff, (0, C_pad - C))
    w_eff = w_eff.astype(weight_dtype)                 # [D, C_pad] (bf16 by default)
    b_eff = b_eff.reshape(1, C_pad).astype(jnp.float32)

    # Batch tile: keep one feats buffer <= FEATS_TILE_BYTES, multiple of 8 rows,
    # and no bigger than the (padded) batch.
    bytes_per_row = T * D * feats.dtype.itemsize
    tb = (FEATS_TILE_BYTES // bytes_per_row) // SUBLANE * SUBLANE
    tb = max(SUBLANE, tb)
    tb = min(tb, ((B + SUBLANE - 1) // SUBLANE) * SUBLANE)
    B_pad = ((B + tb - 1) // tb) * tb
    if B_pad != B:
        feats = jnp.pad(feats, ((0, B_pad - B), (0, 0), (0, 0)))

    out = pl.pallas_call(
        cls_head_kernel,
        out_shape=jax.ShapeDtypeStruct((B_pad, C_pad), jnp.float32),
        grid=(B_pad // tb,),
        in_specs=[
            pl.BlockSpec((tb, T, D), lambda b: (b, 0, 0)),   # feats: tiled over batch
            pl.BlockSpec((D, C_pad), lambda b: (0, 0)),      # folded weight: VMEM-resident
            pl.BlockSpec((1, C_pad), lambda b: (0, 0)),      # folded bias:  VMEM-resident
        ],
        out_specs=pl.BlockSpec((tb, C_pad), lambda b: (b, 0)),
        compiler_params=pltpu.CompilerParams(
            dimension_semantics=("parallel",)),              # shards across v7x's 2 TCs
    )(feats, w_eff, b_eff)

    return out[:B, :C]


def reference_head(feats, ln_w, ln_b, head_w, head_b):
    pooled = jnp.mean(feats.astype(jnp.float32), axis=1)
    mu = jnp.mean(pooled, axis=-1, keepdims=True)
    var = jnp.mean((pooled - mu) ** 2, axis=-1, keepdims=True)
    xn = (pooled - mu) / jnp.sqrt(var + LN_EPS)
    y = xn * ln_w[None, :] + ln_b[None, :]
    return y @ head_w + head_b[None, :]


if __name__ == "__main__":
    key = jax.random.PRNGKey(0)
    k_feat, k_w = jax.random.split(key)

    B, T = 2, 8  # small batch / sequence length of backbone tokens
    feats = jax.random.normal(k_feat, (B, T, D), dtype=jnp.float32)

    # Deterministic parameter init mirroring the PyTorch __init__:
    #   fc_norm: weight = 1, bias = 0
    ln_w = jnp.ones((D,), dtype=jnp.float32)
    ln_b = jnp.zeros((D,), dtype=jnp.float32)
    #   head: trunc_normal_(std=0.02) weight, bias = 0  (stored transposed: [D, C])
    head_w = (0.02 * jax.random.truncated_normal(
        k_w, -2.0, 2.0, (D, NUM_CLASSES))).astype(jnp.float32)
    head_b = jnp.zeros((NUM_CLASSES,), dtype=jnp.float32)

    out = image_classification_head(feats, ln_w, ln_b, head_w, head_b)
    out = jax.block_until_ready(out)

    ref = reference_head(feats, ln_w, ln_b, head_w, head_b)
    assert out.shape == (B, NUM_CLASSES), out.shape
    # bf16 head weight -> allow a small tolerance vs. the f32 reference.
    assert jnp.allclose(out, ref, atol=1e-2, rtol=1e-2), "mismatch vs reference"

    print("KERNEL_OK")
</pallas_src>

<mosaic_0001>
module attributes {stable_mosaic.version = 11 : i64} {
  func.func @cls_head_kernel(%arg0: i32, %arg1: memref<8x8x768xf32, #tpu.memory_space<vmem>>, %arg2: memref<768x1024xbf16, #tpu.memory_space<vmem>>, %arg3: memref<1x1024xf32, #tpu.memory_space<vmem>>, %arg4: memref<8x1024xf32, #tpu.memory_space<vmem>>) attributes {dimension_semantics = [#tpu.dimension_semantics<parallel>], iteration_bounds = array<i64: 1>, scalar_prefetch = 0 : i64, scratch_operands = 0 : i64, tpu.core_type = #tpu.core_type<tc>, window_params = [{transform_indices = @transform_0, window_bounds = array<i64: 8, 8, 768>}, {pipeline_mode = #tpu.pipeline_mode<synchronous>, transform_indices = @transform_1, window_bounds = array<i64: 768, 1024>}, {pipeline_mode = #tpu.pipeline_mode<synchronous>, transform_indices = @transform_2, window_bounds = array<i64: 1, 1024>}, {transform_indices = @transform_3, window_bounds = array<i64: 8, 1024>}]} {
    %c0 = arith.constant 0 : index
    %c0_0 = arith.constant 0 : index
    %c0_1 = arith.constant 0 : index
    %0 = vector.load %arg1[%c0, %c0_0, %c0_1] : memref<8x8x768xf32, #tpu.memory_space<vmem>>, vector<8x8x768xf32>
    %cst = arith.constant dense<0.000000e+00> : vector<8x768xf32>
    %1 = vector.multi_reduction <add>, %0, %cst [1] : vector<8x8x768xf32> to vector<8x768xf32>
    %cst_2 = arith.constant 1.250000e-01 : f32
    %2 = vector.broadcast %cst_2 : f32 to vector<8x768xf32>
    %3 = arith.mulf %1, %2 : vector<8x768xf32>
    %cst_3 = arith.constant dense<0.000000e+00> : vector<8xf32>
    %4 = vector.multi_reduction <add>, %3, %cst_3 [1] : vector<8x768xf32> to vector<8xf32>
    %5 = vector.shape_cast %4 : vector<8xf32> to vector<8x1xf32>
    %cst_4 = arith.constant 7.680000e+02 : f32
    %6 = vector.broadcast %cst_4 : f32 to vector<8x1xf32>
    %7 = arith.divf %5, %6 : vector<8x1xf32>
    %8 = vector.broadcast %7 : vector<8x1xf32> to vector<8x768xf32>
    %9 = arith.subf %3, %8 : vector<8x768xf32>
    %10 = arith.mulf %9, %9 : vector<8x768xf32>
    %cst_5 = arith.constant dense<0.000000e+00> : vector<8xf32>
    %11 = vector.multi_reduction <add>, %10, %cst_5 [1] : vector<8x768xf32> to vector<8xf32>
    %12 = vector.shape_cast %11 : vector<8xf32> to vector<8x1xf32>
    %cst_6 = arith.constant 7.680000e+02 : f32
    %13 = vector.broadcast %cst_6 : f32 to vector<8x1xf32>
    %14 = arith.divf %12, %13 : vector<8x1xf32>
    %cst_7 = arith.constant 9.99999997E-7 : f32
    %15 = vector.broadcast %cst_7 : f32 to vector<8x1xf32>
    %16 = arith.addf %14, %15 : vector<8x1xf32>
    %17 = math.rsqrt %16 : vector<8x1xf32>
    %18 = vector.broadcast %17 : vector<8x1xf32> to vector<8x768xf32>
    %19 = arith.mulf %9, %18 : vector<8x768xf32>
    %20 = arith.truncf %19 : vector<8x768xf32> to vector<8x768xbf16>
    %c0_8 = arith.constant 0 : index
    %c0_9 = arith.constant 0 : index
    %21 = vector.load %arg2[%c0_8, %c0_9] : memref<768x1024xbf16, #tpu.memory_space<vmem>>, vector<768x1024xbf16>
    %cst_10 = arith.constant dense<0.000000e+00> : vector<8x1024xf32>
    %22 = tpu.matmul %20, %21, %cst_10 {dimension_numbers = #tpu.dot_dimension_numbers<[1], [0], [0], [1], [0, 0, 1, 1], [], []>} : vector<8x768xbf16>, vector<768x1024xbf16>, vector<8x1024xf32> -> vector<8x1024xf32>
    %c0_11 = arith.constant 0 : index
    %c0_12 = arith.constant 0 : index
    %23 = vector.load %arg3[%c0_11, %c0_12] : memref<1x1024xf32, #tpu.memory_space<vmem>>, vector<1x1024xf32>
    %24 = vector.broadcast %23 : vector<1x1024xf32> to vector<8x1024xf32>
    %25 = arith.addf %22, %24 : vector<8x1024xf32>
    %c0_13 = arith.constant 0 : index
    %c0_14 = arith.constant 0 : index
    %26 = vector.load %arg4[%c0_13, %c0_14] : memref<8x1024xf32, #tpu.memory_space<vmem>>, vector<8x1024xf32>
    tpu.vector_store %arg4[%c0_13, %c0_14], %25 {strides = array<i32>} : memref<8x1024xf32, #tpu.memory_space<vmem>>, vector<8x1024xf32>,
    return
  }
  func.func @transform_0(%arg0: i32) -> (i32, i32, i32) {
    %c0_i32 = arith.constant 0 : i32
    %c0_i32_0 = arith.constant 0 : i32
    %c0_i32_1 = arith.constant 0 : i32
    return %arg0, %c0_i32, %c0_i32_0 : i32, i32, i32
  }
  func.func @transform_1(%arg0: i32) -> (i32, i32) {
    %c0_i32 = arith.constant 0 : i32
    %c0_i32_0 = arith.constant 0 : i32
    %c0_i32_1 = arith.constant 0 : i32
    return %c0_i32, %c0_i32_0 : i32, i32
  }
  func.func @transform_2(%arg0: i32) -> (i32, i32) {
    %c0_i32 = arith.constant 0 : i32
    %c0_i32_0 = arith.constant 0 : i32
    %c0_i32_1 = arith.constant 0 : i32
    return %c0_i32, %c0_i32_0 : i32, i32
  }
  func.func @transform_3(%arg0: i32) -> (i32, i32) {
    %c0_i32 = arith.constant 0 : i32
    %c0_i32_0 = arith.constant 0 : i32
    return %arg0, %c0_i32 : i32, i32
  }
}

</mosaic_0001>

<bundles_post_ra>
// kernel: tpu_custom_call.1
= control target key start
LH: loop header
LB: loop body
LE: loop exit
PB: predicated region body
PF: predicated region fallthrough
CT: control target
= control target key end

     0   :  { %8 = vsyncpa [#allocation3], 0  ;;  %s5648_s0 = inlined_call_operand.hbm [shape: f32[8,8,768], index: 0, kind: input, shape index: {}]   ;;  %s5649_s1 = inlined_call_operand.hbm [shape: bf16[768,1024], index: 1, kind: input, shape index: {}]   ;;  %s5650_s2 = inlined_call_operand.hbm [shape: f32[1,1024], index: 2, kind: input, shape index: {}]   ;;  %s5651_s3 = inlined_call_operand.hbm [shape: f32[8,1024], index: 3, kind: output, shape index: {}]  }
   0x1   :  { %9 = vsyncpa [#allocation6], 0 }
   0x2   :  { %10 = vsyncpa [#allocation4], 0  ;;  %s4504_s12 = smov [#allocation5]   ;;  %s4410_s16 = scalar_lea.hbm %s5649_s1, 49152 }
   0x3   :  { %s28_s13 = sshll.u32 %s4504_s12, 4  ;;  %p4411_p0 = scmp.ne.s32.totalorder %s5649_s1, %s4410_s16  ;;  %s29_s13 = int_to_ptr.vmem [resolvable:$true] %s28_s13 }
   0x4   :  { %p4414_p1 = scmp.lt.u32.totalorder %s4410_s16, %s5649_s1 }
   0x6   :  { %p4416_p2 = pnand %p4414_p1, %p4411_p0 }
   0x8   :  { %4419 = shalt.err (!%p4416_p2)
}
   0x9   :  { %s4420_s21 = scalar_lea.vmem %s29_s13, 49152  ;;  %p4425_p4 = scmp.lt.s32.totalorder %s29_s13, %s29_s13 }
   0xa   :  { %p4421_p3 = scmp.ne.s32.totalorder %s29_s13, %s4420_s21  ;;  %p4426_p5 = scmp.lt.s32.totalorder %s4420_s21, %s4420_s21 }
   0xc   :  { %p4427_p6 = por %p4426_p5, %p4425_p4 }
   0xe   :  { %p4428_p7 = pnand %p4427_p6, %p4421_p3 }
  0x10   :  { %4431 = shalt.err (!%p4428_p7)
}
  0x11   :  { %s4505_s22 = smov 512   ;;  %s4506_s23 = smov 32  }
  0x12   :  { %34 = dma.hbm_to_vmem [thread:$0]  %s5649_s1, 49152, %s29_s13, [#allocation6], %s4505_s22, %s4505_s22, %s4506_s23  }
  0x13   :  { %s4507_s26 = smov [#allocation2]   ;;  %s4432_s30 = scalar_lea.hbm %s5648_s0, 6144 }
  0x14   :  { %s16_s27 = sshll.u32 %s4507_s26, 4  ;;  %p4433_p8 = scmp.ne.s32.totalorder %s5648_s0, %s4432_s30  ;;  %s17_s27 = int_to_ptr.vmem [resolvable:$true] %s16_s27 }
  0x15   :  { %p4436_p9 = scmp.lt.u32.totalorder %s4432_s30, %s5648_s0 }
  0x17   :  { %p4438_p10 = pnand %p4436_p9, %p4433_p8 }
  0x19   :  { %4441 = shalt.err (!%p4438_p10)
}
  0x1a   :  { %s4442_s8 = scalar_lea.vmem %s17_s27, 6144  ;;  %p4447_p12 = scmp.lt.s32.totalorder %s17_s27, %s17_s27 }
  0x1b   :  { %p4443_p11 = scmp.ne.s32.totalorder %s17_s27, %s4442_s8  ;;  %p4448_p13 = scmp.lt.s32.totalorder %s4442_s8, %s4442_s8 }
  0x1d   :  { %p4449_p0 = por %p4448_p13, %p4447_p12 }
  0x1f   :  { %p4450_p1 = pnand %p4449_p0, %p4443_p11 }
  0x21   :  { %4453 = shalt.err (!%p4450_p1)
}
  0x22   :  { %s4508_s1 = smov 768   ;;  %s4509_s9 = smov 48  }
  0x23   :  { %22 = dma.hbm_to_vmem [thread:$0]  %s5648_s0, 6144, %s17_s27, [#allocation3], %s4508_s1, %s4508_s1, %s4509_s9  }
  0x24   :  { %s4510_s12 = smov [#allocation7]   ;;  %s4454_s16 = scalar_lea.hbm %s5650_s2, 128 }
  0x25   :  { %s41_s13 = sshll.u32 %s4510_s12, 4  ;;  %p4455_p2 = scmp.ne.s32.totalorder %s5650_s2, %s4454_s16  ;;  %s42_s13 = int_to_ptr.vmem [resolvable:$true] %s41_s13 }
  0x26   :  { %p4458_p3 = scmp.lt.u32.totalorder %s4454_s16, %s5650_s2 }
  0x28   :  { %p4460_p4 = pnand %p4458_p3, %p4455_p2 }
  0x2a   :  { %4463 = shalt.err (!%p4460_p4)
}
  0x2b   :  { %s4464_s21 = scalar_lea.vmem %s42_s13, 128  ;;  %p4469_p6 = scmp.lt.s32.totalorder %s42_s13, %s42_s13 }
  0x2c   :  { %p4465_p5 = scmp.ne.s32.totalorder %s42_s13, %s4464_s21  ;;  %p4470_p7 = scmp.lt.s32.totalorder %s4464_s21, %s4464_s21 }
  0x2e   :  { %p4471_p8 = por %p4470_p7, %p4469_p6 }
  0x30   :  { %p4472_p9 = pnand %p4471_p8, %p4465_p5 }
  0x32   :  { %4475 = shalt.err (!%p4472_p9)
}
  0x33   :  { %44 = dma.hbm_to_vmem [thread:$0]  %s5650_s2, 128, %s42_s13, [#allocation6]  }
  0x34   :  { %4498 = dma.done.wait [#allocation3], 6144  }
  0x35   :  { %4499 = vsyncadd [#allocation3], 4294961152 }
  0x36   :  { %4500 = dma.done.wait [#allocation6], 49280  }
  0x37   :  { %4501 = vsyncadd [#allocation6], 4294918016  ;;  %v54_v0 = vld [vmem:[#allocation2] sm:$0xff]  ;;  %v55_v1 = vld [vmem:[#allocation2 + $0x8] sm:$0xff]  ;;  %vm486_vm0 = vcmask 1041409   ;;  %vm488_vm1 = vcmask 1042434  }
  0x38   :  { %v56_v2 = vld [vmem:[#allocation2 + $0x10] sm:$0xff]  ;;  %v57_v3 = vld [vmem:[#allocation2 + $0x18] sm:$0xff]  ;;  %v58_v4 = vld [vmem:[#allocation2 + $0x20] sm:$0xff]  ;;  %v102_v6 = vrot.slane %v54_v0, 4  ;;  %v108_v7 = vrot.slane %v55_v1, 4  ;;  %vm490_vm2 = vcmask 1043459  }
  0x39   :  { %v59_v5 = vld [vmem:[#allocation2 + $0x28] sm:$0xff]  ;;  %v114_v8 = vrot.slane %v56_v2, 4  ;;  %v60_v9 = vld [vmem:[#allocation2 + $0x30] sm:$0xff]  ;;  %v61_v10 = vld [vmem:[#allocation2 + $0x38] sm:$0xff]  ;;  %v120_v11 = vrot.slane %v57_v3, 4  ;;  %v126_v12 = vrot.slane %v58_v4, 4 }
  0x3a   :  { %v132_v13 = vrot.slane %v59_v5, 4  ;;  %v103_v14 = vadd.f32 %v102_v6, %v54_v0  ;;  %v109_v15 = vadd.f32 %v108_v7, %v55_v1  ;;  %v138_v17 = vrot.slane %v60_v9, 4  ;;  %v62_v42 = vld [vmem:[#allocation2 + $0x40] sm:$0xff]  ;;  %v63_v43 = vld [vmem:[#allocation2 + $0x48] sm:$0xff]  ;;  %v64_v44 = vld [vmem:[#allocation2 + $0x50] sm:$0xff]  ;;  %s4511_s2 = smov [#allocation8]  }
  0x3b   :  { %v115_v16 = vadd.f32 %v114_v8, %v56_v2  ;;  %v121_v18 = vadd.f32 %v120_v11, %v57_v3  ;;  %v127_v19 = vadd.f32 %v126_v12, %v58_v4  ;;  %v144_v21 = vrot.slane %v61_v10, 4  ;;  %v65_v48 = vld [vmem:[#allocation2 + $0x58] sm:$0xff]  ;;  %v66_v49 = vld [vmem:[#allocation2 + $0x60] sm:$0xff]  ;;  %v67_v50 = vld [vmem:[#allocation2 + $0x68] sm:$0xff]  ;;  %s3966_s23 = sshll.u32 %s4511_s2, 4  ;;  %s3967_s23 = int_to_ptr.vmem [resolvable:$true] %s3966_s23 }
  0x3c   :  { %v133_v20 = vadd.f32 %v132_v13, %v59_v5  ;;  %v104_v22 = vrot.slane %v103_v14, 2  ;;  %v110_v23 = vrot.slane %v109_v15, 2  ;;  %v139_v25 = vadd.f32 %v138_v17, %v60_v9  ;;  %v68_v53 = vld [vmem:[#allocation2 + $0x70] sm:$0xff]  ;;  %v69_v58 = vld [vmem:[#allocation2 + $0x78] sm:$0xff]  ;;  %s4476_s24 = scalar_lea.vmem %s3967_s23, 1024  ;;  %p4481_p11 = scmp.lt.s32.totalorder %s3967_s23, %s3967_s23 }
  0x3d   :  { %v116_v24 = vrot.slane %v115_v16, 2  ;;  %v122_v26 = vrot.slane %v121_v18, 2  ;;  %v128_v27 = vrot.slane %v127_v19, 2  ;;  %v145_v29 = vadd.f32 %v144_v21, %v61_v10  ;;  %p4477_p10 = scmp.ne.s32.totalorder %s3967_s23, %s4476_s24  ;;  %p4482_p12 = scmp.lt.s32.totalorder %s4476_s24, %s4476_s24 }
  0x3e   :  { %v134_v28 = vrot.slane %v133_v20, 2  ;;  %v105_v30 = vadd.f32 %v104_v22, %v103_v14  ;;  %v111_v31 = vadd.f32 %v110_v23, %v109_v15  ;;  %v140_v33 = vrot.slane %v139_v25, 2 }
  0x3f   :  { %v117_v32 = vadd.f32 %v116_v24, %v115_v16  ;;  %v123_v34 = vadd.f32 %v122_v26, %v121_v18  ;;  %v129_v35 = vadd.f32 %v128_v27, %v127_v19  ;;  %v146_v37 = vrot.slane %v145_v29, 2  ;;  %p4483_p13 = por %p4482_p12, %p4481_p11 }
  0x40   :  { %v135_v36 = vadd.f32 %v134_v28, %v133_v20  ;;  %v106_v38 = vrot.slane %v105_v30, 1  ;;  %v112_v39 = vrot.slane %v111_v31, 1  ;;  %v4568_v41 = vadd.f32 %v140_v33, %v139_v25  ;;  %v72_v33 = vld [vmem:[#allocation2 + $0x90] sm:$0xff] }
  0x41   :  { %v118_v40 = vrot.slane %v117_v32, 1  ;;  %v124_v45 = vrot.slane %v123_v34, 1  ;;  %v130_v46 = vrot.slane %v129_v35, 1  ;;  %v147_v47 = vadd.f32 %v146_v37, %v145_v29  ;;  %p4484_p0 = pnand %p4483_p13, %p4477_p10 }
  0x42   :  { %v4570_v51 = vadd.f32 %v106_v38, %v105_v30  ;;  %v136_v52 = vrot.slane %v135_v36, 1  ;;  %v4572_v54 = vadd.f32 %v112_v39, %v111_v31  ;;  %v142_v57 = vrot.slane %v4568_v41, 1  ;;  %v70_v31 = vld [vmem:[#allocation2 + $0x80] sm:$0xff]  ;;  %v73_v39 = vld [vmem:[#allocation2 + $0x98] sm:$0xff] }
  0x43   :  { %v4574_v55 = vadd.f32 %v118_v40, %v117_v32  ;;  %v4576_v56 = vadd.f32 %v124_v45, %v123_v34  ;;  %v4579_v59 = vadd.f32 %v130_v46, %v129_v35  ;;  %v150_v60 = vrot.slane %v62_v42, 4  ;;  %v71_v32 = vld [vmem:[#allocation2 + $0x88] sm:$0xff]  ;;  %v74_v40 = vld [vmem:[#allocation2 + $0xa0] sm:$0xff] }
  0x44   :  { %v156_v61 = vrot.slane %v63_v43, 4  ;;  %v162_v62 = vrot.slane %v64_v44, 4  ;;  %v148_v63 = vrot.slane %v147_v47, 1  ;;  %v168_v0 = vrot.slane %v65_v48, 4 }
  0x45   :  { %v174_v1 = vrot.slane %v66_v49, 4  ;;  %v180_v2 = vrot.slane %v67_v50, 4  ;;  %v151_v3 = vadd.f32 %v150_v60, %v62_v42  ;;  %v186_v6 = vrot.slane %v68_v53, 4  ;;  %v75_v42 = vld [vmem:[#allocation2 + $0xa8] sm:$0xff] }
  0x46   :  { %v157_v4 = vadd.f32 %v156_v61, %v63_v43  ;;  %v163_v5 = vadd.f32 %v162_v62, %v64_v44  ;;  %v169_v7 = vadd.f32 %v168_v0, %v65_v48  ;;  %v192_v10 = vrot.slane %v69_v58, 4  ;;  %v76_v48 = vld [vmem:[#allocation2 + $0xb0] sm:$0xff] }
  0x47   :  { %v175_v8 = vadd.f32 %v174_v1, %v66_v49  ;;  %v181_v9 = vadd.f32 %v180_v2, %v67_v50  ;;  %v152_v11 = vrot.slane %v151_v3, 2  ;;  %v187_v14 = vadd.f32 %v186_v6, %v68_v53  ;;  %v77_v53 = vld [vmem:[#allocation2 + $0xb8] sm:$0xff] }
  0x48   :  { %v158_v12 = vrot.slane %v157_v4, 2  ;;  %v164_v13 = vrot.slane %v163_v5, 2  ;;  %v170_v15 = vrot.slane %v169_v7, 2  ;;  %v193_v18 = vadd.f32 %v192_v10, %v69_v58 }
  0x49   :  { %v176_v16 = vrot.slane %v175_v8, 2  ;;  %v182_v17 = vrot.slane %v181_v9, 2  ;;  %v153_v19 = vadd.f32 %v152_v11, %v151_v3  ;;  %v188_v22 = vrot.slane %v187_v14, 2 }
  0x4a   :  { %v159_v20 = vadd.f32 %v158_v12, %v157_v4  ;;  %v165_v21 = vadd.f32 %v164_v13, %v163_v5  ;;  %v171_v23 = vadd.f32 %v170_v15, %v169_v7  ;;  %v194_v26 = vrot.slane %v193_v18, 2 }
  0x4b   :  { %v177_v24 = vadd.f32 %v176_v16, %v175_v8  ;;  %v4581_v25 = vadd.f32 %v182_v17, %v181_v9  ;;  %v154_v27 = vrot.slane %v153_v19, 1  ;;  %v4583_v30 = vadd.f32 %v188_v22, %v187_v14 }
  0x4c   :  { %v160_v28 = vrot.slane %v159_v20, 1  ;;  %v166_v29 = vrot.slane %v165_v21, 1  ;;  %v4585_v34 = vadd.f32 %v136_v52, %v135_v36  ;;  %v172_v35 = vrot.slane %v171_v23, 1 }
  0x4d   :  { %v178_v37 = vrot.slane %v177_v24, 1  ;;  %v195_v38 = vadd.f32 %v194_v26, %v193_v18  ;;  %v4588_v43 = vadd.f32 %v142_v57, %v4568_v41  ;;  %v4590_v44 = vadd.f32 %v148_v63, %v147_v47 }
  0x4e   :  { %v4592_v45 = vadd.f32 %v154_v27, %v153_v19  ;;  %v184_v46 = vrot.slane %v4581_v25, 1  ;;  %v4595_v49 = vadd.f32 %v160_v28, %v159_v20  ;;  %v4597_v36 = vadd.f32 %v166_v29, %v165_v21  ;;  %v78_v29 = vld [vmem:[#allocation2 + $0xc0] sm:$0xff] }
  0x4f   :  { %v4599_v50 = vadd.f32 %v172_v35, %v171_v23  ;;  %v190_v52 = vrot.slane %v4583_v30, 1  ;;  %v4602_v58 = vadd.f32 %v178_v37, %v177_v24  ;;  %v198_v41 = vrot.slane %v70_v31, 4 }
  0x50   :  { %v204_v57 = vrot.slane %v71_v32, 4  ;;  %v210_v47 = vrot.slane %v72_v33, 4  ;;  %v196_v60 = vrot.slane %v195_v38, 1  ;;  %v216_v61 = vrot.slane %v73_v39, 4 }
  0x51   :  { %v222_v62 = vrot.slane %v74_v40, 4  ;;  %v228_v63 = vrot.slane %v75_v42, 4  ;;  %v199_v0 = vadd.f32 %v198_v41, %v70_v31  ;;  %v234_v3 = vrot.slane %v76_v48, 4  ;;  %v79_v31 = vld [vmem:[#allocation2 + $0xc8] sm:$0xff] }
  0x52   :  { %v205_v1 = vadd.f32 %v204_v57, %v71_v32  ;;  %v211_v2 = vadd.f32 %v210_v47, %v72_v33  ;;  %v217_v4 = vadd.f32 %v216_v61, %v73_v39  ;;  %v240_v7 = vrot.slane %v77_v53, 4  ;;  %v80_v32 = vld [vmem:[#allocation2 + $0xd0] sm:$0xff] }
  0x53   :  { %v223_v5 = vadd.f32 %v222_v62, %v74_v40  ;;  %v229_v6 = vadd.f32 %v228_v63, %v75_v42  ;;  %v200_v8 = vrot.slane %v199_v0, 2  ;;  %v235_v11 = vadd.f32 %v234_v3, %v76_v48  ;;  %v81_v40 = vld [vmem:[#allocation2 + $0xd8] sm:$0xff]  ;;  %v82_v42 = vld [vmem:[#allocation2 + $0xe0] sm:$0xff]  ;;  %v83_v48 = vld [vmem:[#allocation2 + $0xe8] sm:$0xff] }
  0x54   :  { %v206_v9 = vrot.slane %v205_v1, 2  ;;  %v212_v10 = vrot.slane %v211_v2, 2  ;;  %v218_v12 = vrot.slane %v217_v4, 2  ;;  %v241_v15 = vadd.f32 %v240_v7, %v77_v53  ;;  %v84_v61 = vld [vmem:[#allocation2 + $0xf0] sm:$0xff] }
  0x55   :  { %v224_v13 = vrot.slane %v223_v5, 2  ;;  %v230_v14 = vrot.slane %v229_v6, 2  ;;  %v201_v16 = vadd.f32 %v200_v8, %v199_v0  ;;  %v236_v19 = vrot.slane %v235_v11, 2  ;;  %v85_v0 = vld [vmem:[#allocation2 + $0xf8] sm:$0xff] }
  0x56   :  { %v207_v17 = vadd.f32 %v206_v9, %v205_v1  ;;  %v213_v18 = vadd.f32 %v212_v10, %v211_v2  ;;  %v219_v20 = vadd.f32 %v218_v12, %v217_v4  ;;  %v242_v23 = vrot.slane %v241_v15, 2 }
  0x57   :  { %v225_v21 = vadd.f32 %v224_v13, %v223_v5  ;;  %v4604_v22 = vadd.f32 %v230_v14, %v229_v6  ;;  %v202_v24 = vrot.slane %v201_v16, 1  ;;  %v4606_v28 = vadd.f32 %v236_v19, %v235_v11 }
  0x58   :  { %v208_v26 = vrot.slane %v207_v17, 1  ;;  %v214_v27 = vrot.slane %v213_v18, 1  ;;  %v4609_v33 = vadd.f32 %v184_v46, %v4581_v25  ;;  %v220_v35 = vrot.slane %v219_v20, 1 }
  0x59   :  { %v226_v37 = vrot.slane %v225_v21, 1  ;;  %v243_v39 = vadd.f32 %v242_v23, %v241_v15  ;;  %v4612_v53 = vadd.f32 %v190_v52, %v4583_v30  ;;  %v4614_v41 = vadd.f32 %v196_v60, %v195_v38 }
  0x5a   :  { %v4616_v57 = vadd.f32 %v202_v24, %v201_v16  ;;  %v232_v47 = vrot.slane %v4604_v22, 1  ;;  %v4619_v62 = vadd.f32 %v208_v26, %v207_v17  ;;  %v4621_v25 = vadd.f32 %v214_v27, %v213_v18 }
  0x5b   :  { %v4623_v46 = vadd.f32 %v220_v35, %v219_v20  ;;  %v238_v63 = vrot.slane %v4606_v28, 1  ;;  %v4626_v1 = vadd.f32 %v226_v37, %v225_v21  ;;  %v246_v30 = vrot.slane %v78_v29, 4 }
  0x5c   :  { %v252_v52 = vrot.slane %v79_v31, 4  ;;  %v258_v38 = vrot.slane %v80_v32, 4  ;;  %v244_v60 = vrot.slane %v243_v39, 1  ;;  %v264_v2 = vrot.slane %v81_v40, 4 }
  0x5d   :  { %v270_v3 = vrot.slane %v82_v42, 4  ;;  %v276_v4 = vrot.slane %v83_v48, 4  ;;  %v247_v5 = vadd.f32 %v246_v30, %v78_v29  ;;  %v282_v8 = vrot.slane %v84_v61, 4  ;;  %v88_v30 = vld [vmem:[#allocation2 + $0x110] sm:$0xff] }
  0x5e   :  { %v253_v6 = vadd.f32 %v252_v52, %v79_v31  ;;  %v259_v7 = vadd.f32 %v258_v38, %v80_v32  ;;  %v265_v9 = vadd.f32 %v264_v2, %v81_v40  ;;  %v288_v12 = vrot.slane %v85_v0, 4 }
  0x5f   :  { %v271_v10 = vadd.f32 %v270_v3, %v82_v42  ;;  %v277_v11 = vadd.f32 %v276_v4, %v83_v48  ;;  %v248_v13 = vrot.slane %v247_v5, 2  ;;  %v283_v16 = vadd.f32 %v282_v8, %v84_v61  ;;  %v86_v48 = vld [vmem:[#allocation2 + $0x100] sm:$0xff]  ;;  %v87_v61 = vld [vmem:[#allocation2 + $0x108] sm:$0xff]  ;;  %v89_v3 = vld [vmem:[#allocation2 + $0x118] sm:$0xff] }
  0x60   :  { %v254_v14 = vrot.slane %v253_v6, 2  ;;  %v260_v15 = vrot.slane %v259_v7, 2  ;;  %v266_v17 = vrot.slane %v265_v9, 2  ;;  %v289_v20 = vadd.f32 %v288_v12, %v85_v0  ;;  %v90_v4 = vld [vmem:[#allocation2 + $0x120] sm:$0xff] }
  0x61   :  { %v272_v18 = vrot.slane %v271_v10, 2  ;;  %v278_v19 = vrot.slane %v277_v11, 2  ;;  %v249_v21 = vadd.f32 %v248_v13, %v247_v5  ;;  %v284_v26 = vrot.slane %v283_v16, 2  ;;  %v91_v5 = vld [vmem:[#allocation2 + $0x128] sm:$0xff]  ;;  %v93_v13 = vld [vmem:[#allocation2 + $0x138] sm:$0xff] }
  0x62   :  { %v255_v23 = vadd.f32 %v254_v14, %v253_v6  ;;  %v261_v24 = vadd.f32 %v260_v15, %v259_v7  ;;  %v267_v27 = vadd.f32 %v266_v17, %v265_v9  ;;  %v290_v32 = vrot.slane %v289_v20, 2 }
  0x63   :  { %v273_v29 = vadd.f32 %v272_v18, %v271_v10  ;;  %v4628_v31 = vadd.f32 %v278_v19, %v277_v11  ;;  %v250_v35 = vrot.slane %v249_v21, 1  ;;  %v4630_v42 = vadd.f32 %v284_v26, %v283_v16  ;;  %v92_v10 = vld [vmem:[#allocation2 + $0x130] sm:$0xff] }
  0x64   :  { %v256_v37 = vrot.slane %v255_v23, 1  ;;  %v262_v40 = vrot.slane %v261_v24, 1  ;;  %v4633_v52 = vadd.f32 %v232_v47, %v4604_v22  ;;  %v268_v0 = vrot.slane %v267_v27, 1 }
  0x65   :  { %v274_v38 = vrot.slane %v273_v29, 1  ;;  %v291_v2 = vadd.f32 %v290_v32, %v289_v20  ;;  %v4636_v6 = vadd.f32 %v238_v63, %v4606_v28  ;;  %v4638_v7 = vadd.f32 %v244_v60, %v243_v39 }
  0x66   :  { %v4640_v8 = vadd.f32 %v250_v35, %v249_v21  ;;  %v280_v9 = vrot.slane %v4628_v31, 1  ;;  %v4643_v11 = vadd.f32 %v256_v37, %v255_v23  ;;  %v4645_v22 = vadd.f32 %v262_v40, %v261_v24 }
  0x67   :  { %v4647_v47 = vadd.f32 %v268_v0, %v267_v27  ;;  %v286_v12 = vrot.slane %v4630_v42, 1  ;;  %v4650_v14 = vadd.f32 %v274_v38, %v273_v29  ;;  %v294_v28 = vrot.slane %v86_v48, 4 }
  0x68   :  { %5702 = vst [vmem:[#allocation12_spill] sm:$0xff] %v4640_v8  ;;  %5703 = vst [vmem:[#allocation13_spill] sm:$0xff] %v4643_v11  ;;  %v300_v63 = vrot.slane %v87_v61, 4  ;;  %v306_v39 = vrot.slane %v88_v30, 4  ;;  %v292_v60 = vrot.slane %v291_v2, 1  ;;  %v312_v15 = vrot.slane %v89_v3, 4 }
  0x69   :  { %5704 = vst [vmem:[#allocation14_spill] sm:$0xff] %v4645_v22  ;;  %5705 = vst [vmem:[#allocation15_spill] sm:$0xff] %v4647_v47  ;;  %v318_v16 = vrot.slane %v90_v4, 4  ;;  %v324_v17 = vrot.slane %v91_v5, 4  ;;  %v295_v18 = vadd.f32 %v294_v28, %v86_v48  ;;  %v330_v21 = vrot.slane %v92_v10, 4 }
  0x6a   :  { %5706 = vst [vmem:[#allocation16_spill] sm:$0xff] %v4650_v14  ;;  %v301_v19 = vadd.f32 %v300_v63, %v87_v61  ;;  %v307_v20 = vadd.f32 %v306_v39, %v88_v30  ;;  %v313_v23 = vadd.f32 %v312_v15, %v89_v3  ;;  %v336_v27 = vrot.slane %v93_v13, 4  ;;  %v94_v39 = vld [vmem:[#allocation2 + $0x140] sm:$0xff]  ;;  %v95_v15 = vld [vmem:[#allocation2 + $0x148] sm:$0xff] }
  0x6b   :  { %v319_v24 = vadd.f32 %v318_v16, %v90_v4  ;;  %v325_v26 = vadd.f32 %v324_v17, %v91_v5  ;;  %v296_v32 = vrot.slane %v295_v18, 2  ;;  %v331_v29 = vadd.f32 %v330_v21, %v92_v10  ;;  %v96_v10 = vld [vmem:[#allocation2 + $0x150] sm:$0xff]  ;;  %v99_v21 = vld [vmem:[#allocation2 + $0x168] sm:$0xff] }
  0x6c   :  { %v302_v35 = vrot.slane %v301_v19, 2  ;;  %v308_v37 = vrot.slane %v307_v20, 2  ;;  %v314_v40 = vrot.slane %v313_v23, 2  ;;  %v337_v14 = vadd.f32 %v336_v27, %v93_v13  ;;  %v100_v27 = vld [vmem:[#allocation2 + $0x170] sm:$0xff] }
  0x6d   :  { %v320_v0 = vrot.slane %v319_v24, 2  ;;  %v326_v38 = vrot.slane %v325_v26, 2  ;;  %v297_v47 = vadd.f32 %v296_v32, %v295_v18  ;;  %v332_v8 = vrot.slane %v331_v29, 2 }
  0x6e   :  { %v303_v22 = vadd.f32 %v302_v35, %v301_v19  ;;  %v309_v11 = vadd.f32 %v308_v37, %v307_v20  ;;  %v315_v48 = vadd.f32 %v314_v40, %v313_v23  ;;  %v338_v3 = vrot.slane %v337_v14, 2  ;;  %v97_v19 = vld [vmem:[#allocation2 + $0x158] sm:$0xff]  ;;  %v98_v20 = vld [vmem:[#allocation2 + $0x160] sm:$0xff] }
  0x6f   :  { %v321_v61 = vadd.f32 %v320_v0, %v319_v24  ;;  %v4652_v30 = vadd.f32 %v326_v38, %v325_v26  ;;  %v298_v4 = vrot.slane %v297_v47, 1  ;;  %v333_v63 = vadd.f32 %v332_v8, %v331_v29  ;;  %v101_v35 = vld [vmem:[#allocation2 + $0x178] sm:$0xff] }
  0x70   :  { %v304_v5 = vrot.slane %v303_v22, 1  ;;  %v310_v28 = vrot.slane %v309_v11, 1  ;;  %v4655_v16 = vadd.f32 %v280_v9, %v4628_v31  ;;  %v316_v13 = vrot.slane %v315_v48, 1 }
  0x71   :  { %v322_v17 = vrot.slane %v321_v61, 1  ;;  %v339_v18 = vadd.f32 %v338_v3, %v337_v14  ;;  %v4658_v23 = vadd.f32 %v286_v12, %v4630_v42  ;;  %v4660_v24 = vadd.f32 %v292_v60, %v291_v2 }
  0x72   :  { %5707 = vst [vmem:[#allocation17_spill] sm:$0xff] %v4655_v16  ;;  %v4662_v26 = vadd.f32 %v298_v4, %v297_v47  ;;  %v328_v8 = vrot.slane %v4652_v30, 1  ;;  %v4665_v32 = vadd.f32 %v304_v5, %v303_v22  ;;  %v4667_v31 = vadd.f32 %v310_v28, %v309_v11 }
  0x73   :  { %5708 = vst [vmem:[#allocation18_spill] sm:$0xff] %v4658_v23  ;;  %5709 = vst [vmem:[#allocation19_spill] sm:$0xff] %v4660_v24  ;;  %v4669_v9 = vadd.f32 %v316_v13, %v315_v48  ;;  %v334_v14 = vrot.slane %v333_v63, 1  ;;  %v4671_v37 = vadd.f32 %v322_v17, %v321_v61  ;;  %v342_v29 = vrot.slane %v94_v39, 4 }
  0x74   :  { %5710 = vst [vmem:[#allocation20_spill] sm:$0xff] %v4662_v26  ;;  %5711 = vst [vmem:[#allocation21_spill] sm:$0xff] %v4665_v32  ;;  %v348_v42 = vrot.slane %v95_v15, 4  ;;  %v354_v12 = vrot.slane %v96_v10, 4  ;;  %v340_v2 = vrot.slane %v339_v18, 1  ;;  %v360_v60 = vrot.slane %v97_v19, 4 }
  0x75   :  { %5712 = vst [vmem:[#allocation22_spill] sm:$0xff] %v4667_v31  ;;  %5713 = vst [vmem:[#allocation23_spill] sm:$0xff] %v4669_v9  ;;  %v366_v47 = vrot.slane %v98_v20, 4  ;;  %v372_v40 = vrot.slane %v99_v21, 4  ;;  %v343_v0 = vadd.f32 %v342_v29, %v94_v39  ;;  %v378_v22 = vrot.slane %v100_v27, 4 }
  0x76   :  { %5714 = vst [vmem:[#allocation24_spill] sm:$0xff] %v4671_v37  ;;  %v349_v38 = vadd.f32 %v348_v42, %v95_v15  ;;  %v355_v3 = vadd.f32 %v354_v12, %v96_v10  ;;  %v361_v4 = vadd.f32 %v360_v60, %v97_v19  ;;  %v384_v48 = vrot.slane %v101_v35, 4 }
  0x77   :  { %v367_v11 = vadd.f32 %v366_v47, %v98_v20  ;;  %v373_v5 = vadd.f32 %v372_v40, %v99_v21  ;;  %v344_v28 = vrot.slane %v343_v0, 2  ;;  %v379_v61 = vadd.f32 %v378_v22, %v100_v27 }
  0x78   :  { %v350_v13 = vrot.slane %v349_v38, 2  ;;  %v356_v9 = vrot.slane %v355_v3, 2  ;;  %v362_v17 = vrot.slane %v361_v4, 2  ;;  %v385_v32 = vadd.f32 %v384_v48, %v101_v35 }
  0x79   :  { %v368_v37 = vrot.slane %v367_v11, 2  ;;  %v374_v31 = vrot.slane %v373_v5, 2  ;;  %v345_v26 = vadd.f32 %v344_v28, %v343_v0  ;;  %v380_v16 = vrot.slane %v379_v61, 2  ;;  %v5720_v28 = vld [vmem:[#allocation17_spill] sm:$0xff] }
  0x7a   :  { %v351_v24 = vadd.f32 %v350_v13, %v349_v38  ;;  %v357_v23 = vadd.f32 %v356_v9, %v355_v3  ;;  %v363_v39 = vadd.f32 %v362_v17, %v361_v4  ;;  %v386_v29 = vrot.slane %v385_v32, 2  ;;  %v5722_v17 = vld [vmem:[#allocation19_spill] sm:$0xff] }
  0x7b   :  { %v369_v15 = vadd.f32 %v368_v37, %v367_v11  ;;  %v375_v10 = vadd.f32 %v374_v31, %v373_v5  ;;  %v346_v19 = vrot.slane %v345_v26, 1  ;;  %v381_v42 = vadd.f32 %v380_v16, %v379_v61 }
  0x7c   :  { %v352_v20 = vrot.slane %v351_v24, 1  ;;  %v358_v21 = vrot.slane %v357_v23, 1  ;;  %v364_v12 = vrot.slane %v363_v39, 1  ;;  %v387_v27 = vadd.f32 %v386_v29, %v385_v32  ;;  %v5724_v29 = vld [vmem:[#allocation21_spill] sm:$0xff] }
  0x7d   :  { %v370_v60 = vrot.slane %v369_v15, 1  ;;  %v376_v47 = vrot.slane %v375_v10, 1  ;;  %v329_v40 = vadd.f32 %v328_v8, %v4652_v30  ;;  %v335_v22 = vadd.f32 %v334_v14, %v333_v63  ;;  %v5716_v8 = vld [vmem:[#allocation13_spill] sm:$0xff] }
  0x7e   :  { %v341_v35 = vadd.f32 %v340_v2, %v339_v18  ;;  %v382_v0 = vrot.slane %v381_v42, 1  ;;  %v347_v38 = vadd.f32 %v346_v19, %v345_v26  ;;  %v4674_v9 = vadd.f32 %v352_v20, %v351_v24  ;;  %v5719_v2 = vld [vmem:[#allocation16_spill] sm:$0xff]  ;;  %v5725_v20 = vld [vmem:[#allocation22_spill] sm:$0xff] }
  0x7f   :  { %v359_v3 = vadd.f32 %v358_v21, %v357_v23  ;;  %v388_v37 = vrot.slane %v387_v27, 1  ;;  %v365_v31 = vadd.f32 %v364_v12, %v363_v39  ;;  %v371_v4 = vadd.f32 %v370_v60, %v369_v15  ;;  %v5723_v15 = vld [vmem:[#allocation20_spill] sm:$0xff] }
  0x80   :  { %v377_v11 = vadd.f32 %v376_v47, %v375_v10  ;;  %v4676_v5 = vadd.f32 %v382_v0, %v381_v42  ;;  %v4681_v48 = vmul.f32 0.125, %v4570_v51  ;;  %v4684_v30 = vmul.f32 0.125, %v4572_v54  ;;  %v5726_v42 = vld [vmem:[#allocation23_spill] sm:$0xff]  ;;  %v5727_v60 = vld [vmem:[#allocation24_spill] sm:$0xff] }
  0x81   :  { %v4678_v16 = vadd.f32 %v388_v37, %v387_v27  ;;  %v4687_v63 = vmul.f32 0.125, %v4574_v55  ;;  %v4690_v18 = vmul.f32 0.125, %v4576_v56  ;;  %v4693_v23 = vmul.f32 0.125, %v4579_v59 }
  0x82   :  { %v4696_v24 = vmul.f32 0.125, %v4585_v34  ;;  %v4699_v26 = vmul.f32 0.125, %v4588_v43  ;;  %v4702_v51 = vmul.f32 0.125, %v4590_v44  ;;  %v4705_v54 = vmul.f32 0.125, %v4592_v45 }
  0x83   :  { %v4708_v55 = vmul.f32 0.125, %v4595_v49  ;;  %v4711_v56 = vmul.f32 0.125, %v4597_v36  ;;  %v4714_v59 = vmul.f32 0.125, %v4599_v50  ;;  %v4717_v34 = vmul.f32 0.125, %v4602_v58 }
  0x84   :  { %v4720_v43 = vmul.f32 0.125, %v4609_v33  ;;  %v4723_v44 = vmul.f32 0.125, %v4612_v53  ;;  %vm492_vm3 = vcmask 1044484   ;;  %v4726_v45 = vmul.f32 0.125, %v4614_v41 }
  0x85   :  { %v4729_v49 = vmul.f32 0.125, %v4616_v57  ;;  %v4732_v36 = vmul.f32 0.125, %v4619_v62  ;;  %v4735_v50 = vmul.f32 0.125, %v4621_v25  ;;  %vm494_vm4 = vcmask 1045509   ;;  %v5715_v62 = vld [vmem:[#allocation12_spill] sm:$0xff] }
  0x86   :  { %v4738_v58 = vmul.f32 0.125, %v4623_v46  ;;  %v4741_v33 = vmul.f32 0.125, %v4626_v1  ;;  %v4744_v53 = vmul.f32 0.125, %v4633_v52  ;;  %v4747_v41 = vmul.f32 0.125, %v4636_v6  ;;  %v5717_v46 = vld [vmem:[#allocation14_spill] sm:$0xff]  ;;  %v5718_v1 = vld [vmem:[#allocation15_spill] sm:$0xff] }
  0x87   :  { %vm496_vm5 = vcmask 1046534   ;;  %v4750_v57 = vmul.f32 0.125, %v4638_v7  ;;  %v4753_v25 = vmul.f32 0.125, %v5715_v62  ;;  %v4756_v32 = vmul.f32 0.125, %v5716_v8  ;;  %v5721_v7 = vld [vmem:[#allocation18_spill] sm:$0xff] }
  0x88   :  { %v4759_v14 = vmul.f32 0.125, %v5717_v46  ;;  %vm498_vm6 = vcmask 1047559   ;;  %v4762_v52 = vmul.f32 0.125, %v5718_v1  ;;  %v4765_v6 = vmul.f32 0.125, %v5719_v2 }
  0x89   :  { %v4768_v13 = vmul.f32 0.125, %v5720_v28  ;;  %v4771_v61 = vmul.f32 0.125, %v5721_v7  ;;  %v4774_v39 = vmul.f32 0.125, %v5722_v17  ;;  %v4777_v10 = vmul.f32 0.125, %v5723_v15 }
  0x8a   :  { %v4780_v19 = vmul.f32 0.125, %v5724_v29  ;;  %v4783_v21 = vmul.f32 0.125, %v5725_v20  ;;  %v4786_v12 = vmul.f32 0.125, %v5726_v42  ;;  %v4789_v47 = vmul.f32 0.125, %v5727_v60 }
  0x8b   :  { %v4791_v27 = vmul.f32 0.125, %v329_v40  ;;  %v4793_v0 = vmul.f32 0.125, %v335_v22  ;;  %v4795_v37 = vmul.f32 0.125, %v341_v35  ;;  %v4797_v62 = vmul.f32 0.125, %v347_v38 }
  0x8c   :  { %v4799_v8 = vmul.f32 0.125, %v359_v3  ;;  %v4801_v46 = vmul.f32 0.125, %v365_v31  ;;  %v4803_v1 = vmul.f32 0.125, %v371_v4  ;;  %v4805_v2 = vmul.f32 0.125, %v377_v11 }
  0x8d   :  { %5728 = vst [vmem:[#allocation12_spill] sm:$0xff] %v4797_v62  ;;  %v487_v28 = vsel %vm486_vm0, %v4699_v26, %v4681_v48  ;;  %v500_v40 = vsel %vm486_vm0, %v4702_v51, %v4684_v30  ;;  %v507_v38 = vsel %vm486_vm0, %v4705_v54, %v4687_v63  ;;  %v514_v3 = vsel %vm486_vm0, %v4708_v55, %v4690_v18 }
  0x8e   :  { %5729 = vst [vmem:[#allocation13_spill] sm:$0xff] %v4799_v8  ;;  %5730 = vst [vmem:[#allocation14_spill] sm:$0xff] %v4801_v46  ;;  %v489_v22 = vsel %vm488_vm1, %v4717_v34, %v487_v28  ;;  %v501_v35 = vsel %vm488_vm1, %v4720_v43, %v500_v40  ;;  %v508_v11 = vsel %vm488_vm1, %v4723_v44, %v507_v38 }
  0x8f   :  { %5731 = vst [vmem:[#allocation15_spill] sm:$0xff] %v4803_v1  ;;  %5732 = vst [vmem:[#allocation16_spill] sm:$0xff] %v4805_v2  ;;  %v491_v31 = vsel %vm490_vm2, %v4735_v50, %v489_v22  ;;  %v502_v4 = vsel %vm490_vm2, %v4738_v58, %v501_v35  ;;  %v515_v7 = vsel %vm488_vm1, %v4726_v45, %v514_v3 }
  0x90   :  { %v493_v17 = vsel %vm492_vm3, %v4753_v25, %v491_v31  ;;  %v503_v15 = vsel %vm492_vm3, %v4756_v32, %v502_v4  ;;  %v509_v29 = vsel %vm490_vm2, %v4741_v33, %v508_v11  ;;  %v516_v20 = vsel %vm490_vm2, %v4744_v53, %v515_v7 }
  0x91   :  { %v495_v42 = vsel %vm494_vm4, %v4771_v61, %v493_v17  ;;  %v504_v60 = vsel %vm494_vm4, %v4774_v39, %v503_v15  ;;  %v510_v28 = vsel %vm492_vm3, %v4759_v14, %v509_v29  ;;  %v517_v40 = vsel %vm492_vm3, %v4762_v52, %v516_v20 }
  0x92   :  { %v497_v22 = vsel %vm496_vm5, %v4789_v47, %v495_v42  ;;  %v505_v35 = vsel %vm496_vm5, %v4791_v27, %v504_v60  ;;  %v511_v38 = vsel %vm494_vm4, %v4777_v10, %v510_v28  ;;  %v518_v3 = vsel %vm494_vm4, %v4780_v19, %v517_v40 }
  0x93   :  { %v499_v31 = vsel %vm498_vm6, %v4799_v8, %v497_v22  ;;  %v506_v4 = vsel %vm498_vm6, %v4801_v46, %v505_v35  ;;  %v512_v11 = vsel %vm496_vm5, %v4793_v0, %v511_v38  ;;  %v519_v7 = vsel %vm496_vm5, %v4795_v37, %v518_v3  ;;  %v935_v8 = vld [vmem:[#allocation5 + $0x68] sm:$0xff] }
  0x94   :  { %v4864_v17 = vmul.f32 0.125, %v4674_v9  ;;  %v513_v15 = vsel %vm498_vm6, %v4803_v1, %v512_v11  ;;  %v521_v29 = vsel %vm486_vm0, %v4711_v56, %v4693_v23  ;;  %v528_v20 = vsel %vm486_vm0, %v4714_v59, %v4696_v24  ;;  %v934_v1 = vld [vmem:[#allocation5 + $0x60] sm:$0xff] }
  0x95   :  { %v4875_v42 = vmul.f32 0.125, %v4676_v5  ;;  %v522_v60 = vsel %vm488_vm1, %v4729_v49, %v521_v29  ;;  %v529_v9 = vsel %vm488_vm1, %v4732_v36, %v528_v20  ;;  %v541_v28 = vadd.f32 %v506_v4, %v499_v31 }
  0x96   :  { %5733 = vst [vmem:[#allocation17_spill] sm:$0xff] %v4864_v17  ;;  %v4882_v40 = vmul.f32 0.125, %v4678_v16  ;;  %v520_v22 = vsel %vm498_vm6, %v4805_v2, %v519_v7  ;;  %v523_v35 = vsel %vm490_vm2, %v4747_v41, %v522_v60  ;;  %v530_v5 = vsel %vm490_vm2, %v4750_v57, %v529_v9 }
  0x97   :  { %5734 = vst [vmem:[#allocation18_spill] sm:$0xff] %v4875_v42  ;;  %v524_v38 = vsel %vm492_vm3, %v4765_v6, %v523_v35  ;;  %v531_v3 = vsel %vm492_vm3, %v4768_v13, %v530_v5  ;;  %v542_v11 = vadd.f32 %v541_v28, %v513_v15  ;;  %v922_v28 = vld [vmem:[#allocation5] sm:$0xff]  ;;  %v923_v5 = vld [vmem:[#allocation5 + $0x8] sm:$0xff] }
  0x98   :  { %5735 = vst [vmem:[#allocation19_spill] sm:$0xff] %v4882_v40  ;;  %v525_v16 = vsel %vm494_vm4, %v4783_v21, %v524_v38  ;;  %v532_v31 = vsel %vm494_vm4, %v4786_v12, %v531_v3  ;;  %v926_v35 = vld [vmem:[#allocation5 + $0x20] sm:$0xff]  ;;  %v927_v3 = vld [vmem:[#allocation5 + $0x28] sm:$0xff] }
  0x99   :  { %v526_v4 = vsel %vm496_vm5, %v4797_v62, %v525_v16  ;;  %v533_v7 = vsel %vm496_vm5, %v4864_v17, %v532_v31  ;;  %v543_v29 = vadd.f32 %v542_v11, %v520_v22  ;;  %v3977_v38 = vcombine.high %v922_v28, %v926_v35  ;;  %v930_v16 = vld [vmem:[#allocation5 + $0x40] sm:$0xff]  ;;  %v931_v11 = vld [vmem:[#allocation5 + $0x48] sm:$0xff] }
  0x9a   :  { %v527_v20 = vsel %vm498_vm6, %v4875_v42, %v526_v4  ;;  %v534_v60 = vsel %vm498_vm6, %v4882_v40, %v533_v7  ;;  %v3976_v2 = vcombine.low %v922_v28, %v926_v35  ;;  %v3979_v46 = vcombine.high %v923_v5, %v927_v3  ;;  %v938_v4 = vld [vmem:[#allocation5 + $0x80] sm:$0xff]  ;;  %v951_v40 = vld [vmem:[#allocation5 + $0xe8] sm:$0xff] }
  0x9b   :  { %v544_v15 = vadd.f32 %v543_v29, %v527_v20  ;;  %v3978_v31 = vcombine.low %v923_v5, %v927_v3  ;;  %v3985_v22 = vcombine.high %v930_v16, %v934_v1  ;;  %3460 = vmatprep.subr.bf16.mxu0 %v3977_v38  ;;  %v3987_v42 = vcombine.high %v931_v11, %v935_v8  ;;  %v942_v7 = vld [vmem:[#allocation5 + $0xa0] sm:$0xff]  ;;  %v939_v29 = vld [vmem:[#allocation5 + $0x88] sm:$0xff] }
  0x9c   :  { %v943_v20 = vld [vmem:[#allocation5 + $0xa8] sm:$0xff]  ;;  %3583 = vmatprep.subr.bf16.mxu1 %v3979_v46  ;;  %3461 = vmatpush1.bf16.msra.mxu0 %v3976_v2  ;;  %v946_v35 = vld [vmem:[#allocation5 + $0xc0] sm:$0xff]  ;;  %v3992_v17 = vcombine.low %v938_v4, %v942_v7 }
  0x9d   :  { %v545_v9 = vadd.f32 %v544_v15, %v534_v60  ;;  %v3984_v60 = vcombine.low %v930_v16, %v934_v1  ;;  %3584 = vmatpush1.bf16.msra.mxu1 %v3978_v31  ;;  %3462 = vmatprep.subr.bf16.mxu0 %v3985_v22  ;;  %v3986_v15 = vcombine.low %v931_v11, %v935_v8  ;;  %v950_v5 = vld [vmem:[#allocation5 + $0xe0] sm:$0xff]  ;;  %v947_v3 = vld [vmem:[#allocation5 + $0xc8] sm:$0xff] }
  0x9e   :  { %3585 = vmatprep.subr.bf16.mxu1 %v3987_v42  ;;  %v3995_v28 = vcombine.high %v939_v29, %v943_v20  ;;  %v3994_v38 = vcombine.low %v939_v29, %v943_v20  ;;  %v4001_v62 = vcombine.high %v946_v35, %v950_v5  ;;  %v4003_v46 = vcombine.high %v947_v3, %v951_v40  ;;  %v954_v2 = vld [vmem:[#allocation5 + $0x100] sm:$0xff]  ;;  %v955_v16 = vld [vmem:[#allocation5 + $0x108] sm:$0xff] }
  0x9f   :  { %546 = vadd.xlane.f32.xlu0 %v545_v9  ;;  %v3993_v9 = vcombine.high %v938_v4, %v942_v7  ;;  %v958_v1 = vld [vmem:[#allocation5 + $0x120] sm:$0xff]  ;;  %v959_v31 = vld [vmem:[#allocation5 + $0x128] sm:$0xff]  ;;  %v4000_v8 = vcombine.low %v946_v35, %v950_v5  ;;  %v4002_v42 = vcombine.low %v947_v3, %v951_v40 }
  0xa0   :  { %3463 = vmatpush1.bf16.msra.mxu0 %v3984_v60  ;;  %v4009_v22 = vcombine.high %v954_v2, %v958_v1  ;;  %v4011_v11 = vcombine.high %v955_v16, %v959_v31  ;;  %v962_v60 = vld [vmem:[#allocation5 + $0x140] sm:$0xff]  ;;  %v963_v7 = vld [vmem:[#allocation5 + $0x148] sm:$0xff]  ;;  %v4008_v29 = vcombine.low %v954_v2, %v958_v1  ;;  %v4010_v20 = vcombine.low %v955_v16, %v959_v31 }
  0xa1   :  { %3586 = vmatpush1.bf16.msra.mxu1 %v3986_v15  ;;  %3464 = vmatprep.subr.bf16.mxu0 %v3993_v9  ;;  %v966_v4 = vld [vmem:[#allocation5 + $0x160] sm:$0xff]  ;;  %v967_v15 = vld [vmem:[#allocation5 + $0x168] sm:$0xff] }
  0xa2   :  { %3587 = vmatprep.subr.bf16.mxu1 %v3995_v28  ;;  %v4017_v9 = vcombine.high %v962_v60, %v966_v4  ;;  %v4019_v28 = vcombine.high %v963_v7, %v967_v15  ;;  %v974_v35 = vld [vmem:[#allocation5 + $0x1a0] sm:$0xff]  ;;  %v971_v5 = vld [vmem:[#allocation5 + $0x188] sm:$0xff]  ;;  %v4016_v40 = vcombine.low %v962_v60, %v966_v4  ;;  %v4018_v3 = vcombine.low %v963_v7, %v967_v15 }
  0xa3   :  { %v982_v2 = vld [vmem:[#allocation5 + $0x1e0] sm:$0xff]  ;;  %v979_v1 = vld [vmem:[#allocation5 + $0x1c8] sm:$0xff] }
  0xa4   :  { %3465 = vmatpush1.bf16.msra.mxu0 %v3992_v17  ;;  %v970_v17 = vld [vmem:[#allocation5 + $0x180] sm:$0xff] }
  0xa5   :  { %3588 = vmatpush1.bf16.msra.mxu1 %v3994_v38  ;;  %3466 = vmatprep.subr.bf16.mxu0 %v4001_v62  ;;  %v975_v62 = vld [vmem:[#allocation5 + $0x1a8] sm:$0xff]  ;;  %v4025_v38 = vcombine.high %v970_v17, %v974_v35  ;;  %v4024_v16 = vcombine.low %v970_v17, %v974_v35 }
  0xa6   :  { %3589 = vmatprep.subr.bf16.mxu1 %v4003_v46  ;;  %v4027_v46 = vcombine.high %v971_v5, %v975_v62  ;;  %v4026_v31 = vcombine.low %v971_v5, %v975_v62 }
  0xa8   :  { %3467 = vmatpush1.bf16.msra.mxu0 %v4000_v8  ;;  %v978_v8 = vld [vmem:[#allocation5 + $0x1c0] sm:$0xff] }
  0xa9   :  { %3590 = vmatpush1.bf16.msra.mxu1 %v4002_v42  ;;  %3468 = vmatprep.subr.bf16.mxu0 %v4009_v22  ;;  %v983_v42 = vld [vmem:[#allocation5 + $0x1e8] sm:$0xff]  ;;  %v4033_v22 = vcombine.high %v978_v8, %v982_v2  ;;  %v4032_v60 = vcombine.low %v978_v8, %v982_v2 }
  0xaa   :  { %3591 = vmatprep.subr.bf16.mxu1 %v4011_v11  ;;  %v4035_v11 = vcombine.high %v979_v1, %v983_v42  ;;  %v4034_v4 = vcombine.low %v979_v1, %v983_v42 }
  0xac   :  { %3469 = vmatpush1.bf16.msra.mxu0 %v4008_v29 }
  0xad   :  { %3592 = vmatpush1.bf16.msra.mxu1 %v4010_v20  ;;  %3470 = vmatprep.subr.bf16.mxu0 %v4017_v9 }
  0xae   :  { %3593 = vmatprep.subr.bf16.mxu1 %v4019_v28 }
  0xb0   :  { %3471 = vmatpush1.bf16.msra.mxu0 %v4016_v40 }
  0xb1   :  { %3594 = vmatpush1.bf16.msra.mxu1 %v4018_v3  ;;  %3472 = vmatprep.subr.bf16.mxu0 %v4025_v38 }
  0xb2   :  { %3595 = vmatprep.subr.bf16.mxu1 %v4027_v46 }
  0xb4   :  { %3473 = vmatpush1.bf16.msra.mxu0 %v4024_v16 }
  0xb5   :  { %3596 = vmatpush1.bf16.msra.mxu1 %v4026_v31  ;;  %3474 = vmatprep.subr.bf16.mxu0 %v4033_v22 }
  0xb6   :  { %3597 = vmatprep.subr.bf16.mxu1 %v4035_v11 }
  0xb8   :  { %3475 = vmatpush1.bf16.msra.mxu0 %v4032_v60 }
  0xb9   :  { %3598 = vmatpush1.bf16.msra.mxu1 %v4034_v4  ;;  %v5785_v4 = vld [vmem:[#allocation19_spill] sm:$0xff] }
 0x12c   :  { %v547_v7 = vpop.xlane.xlu0 %546 }
 0x12d   :  { %v549_v15 = vmul.f32 0.0013020834, %v547_v7 }
 0x12f   :  { %v551_v29 = vrot.slane %v549_v15, 1  ;;  %v552_v20 = vrot.slane %v549_v15, 2  ;;  %v553_v9 = vrot.slane %v549_v15, 3  ;;  %v554_v28 = vrot.slane %v549_v15, 4 }
 0x130   :  { %v555_v17 = vrot.slane %v549_v15, 5  ;;  %v556_v35 = vrot.slane %v549_v15, 6  ;;  %v557_v5 = vrot.slane %v549_v15, 7  ;;  %v4907_v62 = vsub.f32 %v4681_v48, %v549_v15 }
 0x131   :  { %v4910_v40 = vsub.f32 %v4684_v30, %v549_v15  ;;  %v4913_v3 = vsub.f32 %v4687_v63, %v549_v15  ;;  %v4916_v38 = vsub.f32 %v4690_v18, %v549_v15  ;;  %v4919_v46 = vsub.f32 %v4693_v23, %v549_v15 }
 0x132   :  { %5736 = vst [vmem:[#allocation20_spill] sm:$0xff] %v4907_v62  ;;  %v4922_v8 = vsub.f32 %v4696_v24, %v549_v15  ;;  %v4925_v2 = vsub.f32 %v4699_v26, %v551_v29  ;;  %v4928_v48 = vsub.f32 %v4702_v51, %v551_v29  ;;  %v4931_v30 = vsub.f32 %v4705_v54, %v551_v29 }
 0x133   :  { %5737 = vst [vmem:[#allocation21_spill] sm:$0xff] %v4913_v3  ;;  %5738 = vst [vmem:[#allocation22_spill] sm:$0xff] %v4916_v38  ;;  %v4934_v63 = vsub.f32 %v4708_v55, %v551_v29  ;;  %v4937_v18 = vsub.f32 %v4711_v56, %v551_v29  ;;  %v4940_v23 = vsub.f32 %v4714_v59, %v551_v29 }
 0x134   :  { %5739 = vst [vmem:[#allocation23_spill] sm:$0xff] %v4919_v46  ;;  %5740 = vst [vmem:[#allocation24_spill] sm:$0xff] %v4922_v8  ;;  %v4943_v24 = vsub.f32 %v4717_v34, %v552_v20  ;;  %v4946_v26 = vsub.f32 %v4720_v43, %v552_v20  ;;  %v4949_v51 = vsub.f32 %v4723_v44, %v552_v20 }
 0x135   :  { %5741 = vst [vmem:[#allocation25_spill] sm:$0xff] %v4925_v2  ;;  %5742 = vst [vmem:[#allocation26_spill] sm:$0xff] %v4928_v48  ;;  %v4952_v54 = vsub.f32 %v4726_v45, %v552_v20  ;;  %v4955_v55 = vsub.f32 %v4729_v49, %v552_v20  ;;  %v4958_v56 = vsub.f32 %v4732_v36, %v552_v20 }
 0x136   :  { %5743 = vst [vmem:[#allocation27_spill] sm:$0xff] %v4931_v30  ;;  %5744 = vst [vmem:[#allocation28_spill] sm:$0xff] %v4934_v63  ;;  %v4961_v59 = vsub.f32 %v4735_v50, %v553_v9  ;;  %v4964_v34 = vsub.f32 %v4738_v58, %v553_v9  ;;  %v4967_v43 = vsub.f32 %v4741_v33, %v553_v9 }
 0x137   :  { %5745 = vst [vmem:[#allocation29_spill] sm:$0xff] %v4937_v18  ;;  %5746 = vst [vmem:[#allocation30_spill] sm:$0xff] %v4940_v23  ;;  %v4970_v44 = vsub.f32 %v4744_v53, %v553_v9  ;;  %v4973_v45 = vsub.f32 %v4747_v41, %v553_v9  ;;  %v4976_v49 = vsub.f32 %v4750_v57, %v553_v9 }
 0x138   :  { %5747 = vst [vmem:[#allocation31_spill] sm:$0xff] %v4943_v24  ;;  %5748 = vst [vmem:[#allocation32_spill] sm:$0xff] %v4946_v26  ;;  %v4979_v36 = vsub.f32 %v4753_v25, %v554_v28  ;;  %v4982_v50 = vsub.f32 %v4756_v32, %v554_v28  ;;  %v4985_v58 = vsub.f32 %v4759_v14, %v554_v28 }
 0x139   :  { %5749 = vst [vmem:[#allocation33_spill] sm:$0xff] %v4949_v51  ;;  %5750 = vst [vmem:[#allocation34_spill] sm:$0xff] %v4952_v54  ;;  %v4988_v33 = vsub.f32 %v4762_v52, %v554_v28  ;;  %v4991_v53 = vsub.f32 %v4765_v6, %v554_v28  ;;  %v4994_v41 = vsub.f32 %v4768_v13, %v554_v28 }
 0x13a   :  { %5751 = vst [vmem:[#allocation35_spill] sm:$0xff] %v4955_v55  ;;  %5752 = vst [vmem:[#allocation36_spill] sm:$0xff] %v4958_v56  ;;  %v4997_v57 = vsub.f32 %v4771_v61, %v555_v17  ;;  %v5000_v25 = vsub.f32 %v4774_v39, %v555_v17  ;;  %v5003_v32 = vsub.f32 %v4777_v10, %v555_v17 }
 0x13b   :  { %5753 = vst [vmem:[#allocation37_spill] sm:$0xff] %v4961_v59  ;;  %5754 = vst [vmem:[#allocation38_spill] sm:$0xff] %v4964_v34  ;;  %v5006_v14 = vsub.f32 %v4780_v19, %v555_v17  ;;  %v5009_v52 = vsub.f32 %v4783_v21, %v555_v17  ;;  %v5012_v6 = vsub.f32 %v4786_v12, %v555_v17  ;;  %v5775_v19 = vld [vmem:[#allocation12_spill] sm:$0xff]  ;;  %v5777_v21 = vld [vmem:[#allocation17_spill] sm:$0xff] }
 0x13c   :  { %5755 = vst [vmem:[#allocation39_spill] sm:$0xff] %v4967_v43  ;;  %5756 = vst [vmem:[#allocation40_spill] sm:$0xff] %v4970_v44  ;;  %v5015_v13 = vsub.f32 %v4789_v47, %v556_v35  ;;  %v5018_v61 = vsub.f32 %v4791_v27, %v556_v35  ;;  %v5021_v39 = vsub.f32 %v4793_v0, %v556_v35  ;;  %v5779_v12 = vld [vmem:[#allocation13_spill] sm:$0xff]  ;;  %v5781_v47 = vld [vmem:[#allocation14_spill] sm:$0xff] }
 0x13d   :  { %5757 = vst [vmem:[#allocation41_spill] sm:$0xff] %v4973_v45  ;;  %5758 = vst [vmem:[#allocation42_spill] sm:$0xff] %v4976_v49  ;;  %v5024_v10 = vsub.f32 %v4795_v37, %v556_v35  ;;  %v5027_v1 = vsub.f32 %v5775_v19, %v556_v35  ;;  %v5030_v42 = vsub.f32 %v5777_v21, %v556_v35  ;;  %v5782_v27 = vld [vmem:[#allocation15_spill] sm:$0xff]  ;;  %v5783_v0 = vld [vmem:[#allocation16_spill] sm:$0xff] }
 0x13e   :  { %5759 = vst [vmem:[#allocation43_spill] sm:$0xff] %v4979_v36  ;;  %5760 = vst [vmem:[#allocation44_spill] sm:$0xff] %v4982_v50  ;;  %v5033_v16 = vsub.f32 %v5779_v12, %v557_v5  ;;  %v5036_v31 = vsub.f32 %v5781_v47, %v557_v5  ;;  %v5039_v22 = vsub.f32 %v5782_v27, %v557_v5  ;;  %v5784_v37 = vld [vmem:[#allocation18_spill] sm:$0xff] }
 0x13f   :  { %5761 = vst [vmem:[#allocation45_spill] sm:$0xff] %v4985_v58  ;;  %5762 = vst [vmem:[#allocation46_spill] sm:$0xff] %v4988_v33  ;;  %v5042_v11 = vsub.f32 %v5783_v0, %v557_v5  ;;  %v5045_v60 = vsub.f32 %v5784_v37, %v557_v5  ;;  %v5048_v7 = vsub.f32 %v5785_v4, %v557_v5 }
 0x140   :  { %5763 = vst [vmem:[#allocation47_spill] sm:$0xff] %v4991_v53  ;;  %5764 = vst [vmem:[#allocation48_spill] sm:$0xff] %v4994_v41  ;;  %v614_v15 = vmul.f32 %v4907_v62, %v4907_v62  ;;  %v615_v29 = vmul.f32 %v4910_v40, %v4910_v40  ;;  %v5056_v20 = vmul.f32 %v4913_v3, %v4913_v3 }
 0x141   :  { %5765 = vst [vmem:[#allocation49_spill] sm:$0xff] %v4997_v57  ;;  %5766 = vst [vmem:[#allocation50_spill] sm:$0xff] %v5000_v25  ;;  %v5060_v9 = vmul.f32 %v4916_v38, %v4916_v38  ;;  %v5064_v28 = vmul.f32 %v4919_v46, %v4919_v46  ;;  %v5068_v17 = vmul.f32 %v4922_v8, %v4922_v8 }
 0x142   :  { %5767 = vst [vmem:[#allocation51_spill] sm:$0xff] %v5003_v32  ;;  %5768 = vst [vmem:[#allocation52_spill] sm:$0xff] %v5006_v14  ;;  %v620_v35 = vmul.f32 %v4925_v2, %v4925_v2  ;;  %v621_v5 = vmul.f32 %v4928_v48, %v4928_v48  ;;  %v622_v19 = vmul.f32 %v4931_v30, %v4931_v30 }
 0x143   :  { %5769 = vst [vmem:[#allocation53_spill] sm:$0xff] %v5009_v52  ;;  %5770 = vst [vmem:[#allocation54_spill] sm:$0xff] %v5012_v6  ;;  %v5078_v21 = vmul.f32 %v4934_v63, %v4934_v63  ;;  %v5082_v12 = vmul.f32 %v4937_v18, %v4937_v18  ;;  %v5086_v47 = vmul.f32 %v4940_v23, %v4940_v23 }
 0x144   :  { %5771 = vst [vmem:[#allocation55_spill] sm:$0xff] %v5015_v13  ;;  %5772 = vst [vmem:[#allocation56_spill] sm:$0xff] %v5018_v61  ;;  %v626_v27 = vmul.f32 %v4943_v24, %v4943_v24  ;;  %v627_v0 = vmul.f32 %v4946_v26, %v4946_v26  ;;  %v628_v37 = vmul.f32 %v4949_v51, %v4949_v51  ;;  %v738_v48 = vrot.slane %v622_v19, 7 }
 0x145   :  { %5773 = vst [vmem:[#allocation57_spill] sm:$0xff] %v5021_v39  ;;  %5774 = vst [vmem:[#allocation58_spill] sm:$0xff] %v5024_v10  ;;  %v5096_v4 = vmul.f32 %v4952_v54, %v4952_v54  ;;  %v5100_v18 = vmul.f32 %v4955_v55, %v4955_v55  ;;  %v5104_v46 = vmul.f32 %v4958_v56, %v4958_v56  ;;  %v766_v19 = vrot.slane %v5082_v12, 7 }
 0x146   :  { %5776 = vst [vmem:[#allocation12_spill] sm:$0xff] %v5027_v1  ;;  %5778 = vst [vmem:[#allocation17_spill] sm:$0xff] %v5030_v42  ;;  %v632_v23 = vmul.f32 %v4961_v59, %v4961_v59  ;;  %v633_v8 = vmul.f32 %v4964_v34, %v4964_v34  ;;  %v634_v51 = vmul.f32 %v4967_v43, %v4967_v43 }
 0x147   :  { %5780 = vst [vmem:[#allocation13_spill] sm:$0xff] %v5033_v16  ;;  %v5114_v30 = vmul.f32 %v4970_v44, %v4970_v44  ;;  %v5118_v55 = vmul.f32 %v4973_v45, %v4973_v45  ;;  %v5122_v56 = vmul.f32 %v4976_v49, %v4976_v49  ;;  %v638_v3 = vmul.f32 %v4979_v36, %v4979_v36 }
 0x148   :  { %v639_v54 = vmul.f32 %v4982_v50, %v4982_v50  ;;  %v640_v43 = vmul.f32 %v4985_v58, %v4985_v58  ;;  %v5132_v44 = vmul.f32 %v4988_v33, %v4988_v33  ;;  %v5136_v45 = vmul.f32 %v4991_v53, %v4991_v53 }
 0x149   :  { %v5140_v49 = vmul.f32 %v4994_v41, %v4994_v41  ;;  %v644_v63 = vmul.f32 %v4997_v57, %v4997_v57  ;;  %v645_v38 = vmul.f32 %v5000_v25, %v5000_v25  ;;  %v5148_v58 = vmul.f32 %v5003_v32, %v5003_v32 }
 0x14a   :  { %v5152_v33 = vmul.f32 %v5006_v14, %v5006_v14  ;;  %v5156_v53 = vmul.f32 %v5009_v52, %v5009_v52  ;;  %v5160_v41 = vmul.f32 %v5012_v6, %v5012_v6  ;;  %v650_v57 = vmul.f32 %v5015_v13, %v5015_v13 }
 0x14b   :  { %v651_v36 = vmul.f32 %v5018_v61, %v5018_v61  ;;  %v5168_v32 = vmul.f32 %v5021_v39, %v5021_v39  ;;  %v710_v14 = vrot.slane %v620_v35, 7  ;;  %v5172_v59 = vmul.f32 %v5024_v10, %v5024_v10 }
 0x14c   :  { %v5176_v52 = vmul.f32 %v5027_v1, %v5027_v1  ;;  %v5180_v6 = vmul.f32 %v5030_v42, %v5030_v42  ;;  %v712_v13 = vrot.slane %v626_v27, 6  ;;  %v656_v24 = vmul.f32 %v5033_v16, %v5033_v16 }
 0x14d   :  { %v711_v39 = vsel %vm486_vm0, %v710_v14, %v614_v15  ;;  %v714_v2 = vrot.slane %v632_v23, 5  ;;  %v724_v35 = vrot.slane %v621_v5, 7  ;;  %v716_v10 = vrot.slane %v638_v3, 4 }
 0x14e   :  { %v713_v62 = vsel %vm488_vm1, %v712_v13, %v711_v39  ;;  %v718_v61 = vrot.slane %v644_v63, 3  ;;  %v726_v25 = vrot.slane %v627_v0, 6  ;;  %v720_v50 = vrot.slane %v650_v57, 2 }
 0x14f   :  { %v715_v1 = vsel %vm490_vm2, %v714_v2, %v713_v62  ;;  %v725_v34 = vsel %vm486_vm0, %v724_v35, %v615_v29  ;;  %v728_v42 = vrot.slane %v633_v8, 5  ;;  %v730_v16 = vrot.slane %v639_v54, 4 }
 0x150   :  { %v717_v27 = vsel %vm492_vm3, %v716_v10, %v715_v1  ;;  %v727_v26 = vsel %vm488_vm1, %v726_v25, %v725_v34  ;;  %v732_v13 = vrot.slane %v645_v38, 3  ;;  %v740_v3 = vrot.slane %v628_v37, 6 }
 0x151   :  { %v719_v23 = vsel %vm494_vm4, %v718_v61, %v717_v27  ;;  %v729_v14 = vsel %vm490_vm2, %v728_v42, %v727_v26  ;;  %v657_v63 = vmul.f32 %v5036_v31, %v5036_v31  ;;  %v739_v8 = vsel %vm486_vm0, %v738_v48, %v5056_v20 }
 0x152   :  { %v731_v62 = vsel %vm492_vm3, %v730_v16, %v729_v14  ;;  %v742_v2 = vrot.slane %v634_v51, 5  ;;  %v658_v34 = vmul.f32 %v5039_v22, %v5039_v22  ;;  %v721_v54 = vsel %vm496_vm5, %v720_v50, %v719_v23 }
 0x153   :  { %v733_v57 = vsel %vm494_vm4, %v732_v13, %v731_v62  ;;  %v741_v26 = vsel %vm488_vm1, %v740_v3, %v739_v8  ;;  %v722_v38 = vrot.slane %v656_v24, 1  ;;  %v734_v25 = vrot.slane %v651_v36, 2 }
 0x154   :  { %v743_v61 = vsel %vm490_vm2, %v742_v2, %v741_v26  ;;  %v744_v39 = vrot.slane %v640_v43, 4  ;;  %v659_v10 = vmul.f32 %v5042_v11, %v5042_v11  ;;  %v660_v48 = vmul.f32 %v5045_v60, %v5045_v60 }
 0x155   :  { %v752_v51 = vrot.slane %v5078_v21, 7  ;;  %v754_v1 = vrot.slane %v5096_v4, 6  ;;  %v723_v50 = vsel %vm498_vm6, %v722_v38, %v721_v54  ;;  %v735_v42 = vsel %vm496_vm5, %v734_v25, %v733_v57 }
 0x156   :  { %v736_v16 = vrot.slane %v657_v63, 1  ;;  %v745_v24 = vsel %vm492_vm3, %v744_v39, %v743_v61  ;;  %v746_v36 = vrot.slane %v5148_v58, 3  ;;  %v748_v43 = vrot.slane %v5168_v32, 2 }
 0x157   :  { %v753_v15 = vsel %vm486_vm0, %v752_v51, %v5060_v9  ;;  %v756_v29 = vrot.slane %v5114_v30, 5  ;;  %v758_v5 = vrot.slane %v5132_v44, 4  ;;  %v768_v21 = vrot.slane %v5100_v18, 6 }
 0x158   :  { %v755_v20 = vsel %vm488_vm1, %v754_v1, %v753_v15  ;;  %v737_v0 = vsel %vm498_vm6, %v736_v16, %v735_v42  ;;  %v747_v37 = vsel %vm494_vm4, %v746_v36, %v745_v24  ;;  %v750_v58 = vrot.slane %v658_v34, 1  ;;  %v986_v42 = vld [vmem:[#allocation5 + $0x200] sm:$0xff]  ;;  %v987_v24 = vld [vmem:[#allocation5 + $0x208] sm:$0xff] }
 0x159   :  { %v757_v32 = vsel %vm490_vm2, %v756_v29, %v755_v20  ;;  %v760_v9 = vrot.slane %v5152_v33, 3  ;;  %v767_v30 = vsel %vm486_vm0, %v766_v19, %v5064_v28  ;;  %v770_v44 = vrot.slane %v5118_v55, 5  ;;  %v990_v16 = vld [vmem:[#allocation5 + $0x220] sm:$0xff]  ;;  %v995_v19 = vld [vmem:[#allocation5 + $0x248] sm:$0xff] }
 0x15a   :  { %v759_v4 = vsel %vm492_vm3, %v758_v5, %v757_v32  ;;  %v769_v12 = vsel %vm488_vm1, %v768_v21, %v767_v30  ;;  %v772_v18 = vrot.slane %v5136_v45, 4  ;;  %v780_v35 = vrot.slane %v5086_v47, 7  ;;  %v994_v15 = vld [vmem:[#allocation5 + $0x240] sm:$0xff]  ;;  %v999_v21 = vld [vmem:[#allocation5 + $0x268] sm:$0xff] }
 0x15b   :  { %v782_v27 = vrot.slane %v5104_v46, 6  ;;  %v749_v23 = vsel %vm496_vm5, %v748_v43, %v747_v37  ;;  %v761_v14 = vsel %vm494_vm4, %v760_v9, %v759_v4  ;;  %v771_v13 = vsel %vm490_vm2, %v770_v44, %v769_v12  ;;  %v998_v29 = vld [vmem:[#allocation5 + $0x260] sm:$0xff]  ;;  %v1003_v32 = vld [vmem:[#allocation5 + $0x288] sm:$0xff] }
 0x15c   :  { %v774_v33 = vrot.slane %v5156_v53, 3  ;;  %v762_v28 = vrot.slane %v5172_v59, 2  ;;  %v773_v55 = vsel %vm492_vm3, %v772_v18, %v771_v13  ;;  %v781_v3 = vsel %vm486_vm0, %v780_v35, %v5068_v17  ;;  %v1007_v4 = vld [vmem:[#allocation5 + $0x2a8] sm:$0xff]  ;;  %v1010_v18 = vld [vmem:[#allocation5 + $0x2c0] sm:$0xff] }
 0x15d   :  { %v784_v45 = vrot.slane %v5122_v56, 5  ;;  %v776_v46 = vrot.slane %v5176_v52, 2  ;;  %v783_v63 = vsel %vm488_vm1, %v782_v27, %v781_v3  ;;  %v786_v62 = vrot.slane %v5140_v49, 4  ;;  %v1014_v35 = vld [vmem:[#allocation5 + $0x2e0] sm:$0xff]  ;;  %v1011_v27 = vld [vmem:[#allocation5 + $0x2c8] sm:$0xff] }
 0x15e   :  { %v775_v47 = vsel %vm494_vm4, %v774_v33, %v773_v55  ;;  %v763_v8 = vsel %vm496_vm5, %v762_v28, %v761_v14  ;;  %v788_v59 = vrot.slane %v5160_v41, 3  ;;  %v800_v2 = vadd.f32 %v737_v0, %v723_v50  ;;  %v1002_v0 = vld [vmem:[#allocation5 + $0x280] sm:$0xff] }
 0x15f   :  { %v785_v53 = vsel %vm490_vm2, %v784_v45, %v783_v63  ;;  %v661_v17 = vmul.f32 %v5048_v7, %v5048_v7  ;;  %v751_v56 = vsel %vm498_vm6, %v750_v58, %v749_v23  ;;  %v764_v34 = vrot.slane %v659_v10, 1  ;;  %v1006_v58 = vld [vmem:[#allocation5 + $0x2a0] sm:$0xff]  ;;  %v1015_v23 = vld [vmem:[#allocation5 + $0x2e8] sm:$0xff] }
 0x160   :  { %v787_v54 = vsel %vm492_vm3, %v786_v62, %v785_v53  ;;  %v777_v52 = vsel %vm496_vm5, %v776_v46, %v775_v47  ;;  %v790_v49 = vrot.slane %v5180_v6, 2  ;;  %v801_v26 = vadd.f32 %v800_v2, %v751_v56  ;;  %v991_v6 = vld [vmem:[#allocation5 + $0x228] sm:$0xff]  ;;  %v1018_v55 = vld [vmem:[#allocation5 + $0x300] sm:$0xff] }
 0x161   :  { %v789_v57 = vsel %vm494_vm4, %v788_v59, %v787_v54  ;;  %v765_v38 = vsel %vm498_vm6, %v764_v34, %v763_v8  ;;  %v778_v25 = vrot.slane %v660_v48, 1  ;;  %v792_v51 = vrot.slane %v661_v17, 1  ;;  %v1022_v3 = vld [vmem:[#allocation5 + $0x320] sm:$0xff]  ;;  %v1019_v45 = vld [vmem:[#allocation5 + $0x308] sm:$0xff] }
 0x162   :  { %v791_v41 = vsel %vm496_vm5, %v790_v49, %v789_v57  ;;  %v802_v61 = vadd.f32 %v801_v26, %v765_v38  ;;  %v4041_v36 = vcombine.high %v986_v42, %v990_v16  ;;  %v4040_v43 = vcombine.low %v986_v42, %v990_v16  ;;  %v1023_v47 = vld [vmem:[#allocation5 + $0x328] sm:$0xff]  ;;  %v1026_v53 = vld [vmem:[#allocation5 + $0x340] sm:$0xff] }
 0x163   :  { %v779_v39 = vsel %vm498_vm6, %v778_v25, %v777_v52  ;;  %v793_v10 = vsel %vm498_vm6, %v792_v51, %v791_v41  ;;  %v4043_v48 = vcombine.high %v987_v24, %v991_v6  ;;  %v4042_v20 = vcombine.low %v987_v24, %v991_v6  ;;  %v1030_v59 = vld [vmem:[#allocation5 + $0x360] sm:$0xff]  ;;  %v1027_v2 = vld [vmem:[#allocation5 + $0x348] sm:$0xff] }
 0x164   :  { %v803_v1 = vadd.f32 %v802_v61, %v779_v39  ;;  %v4049_v5 = vcombine.high %v994_v15, %v998_v29  ;;  %3476 = vmatprep.subr.bf16.mxu0 %v4041_v36  ;;  %v4051_v37 = vcombine.high %v995_v19, %v999_v21  ;;  %v4048_v9 = vcombine.low %v994_v15, %v998_v29  ;;  %v1031_v17 = vld [vmem:[#allocation5 + $0x368] sm:$0xff]  ;;  %v1034_v57 = vld [vmem:[#allocation5 + $0x380] sm:$0xff] }
 0x165   :  { %3599 = vmatprep.subr.bf16.mxu1 %v4043_v48  ;;  %3477 = vmatpush1.bf16.msra.mxu0 %v4040_v43  ;;  %v4050_v30 = vcombine.low %v995_v19, %v999_v21  ;;  %v4057_v44 = vcombine.high %v1002_v0, %v1006_v58  ;;  %v4059_v12 = vcombine.high %v1003_v32, %v1007_v4  ;;  %v1038_v49 = vld [vmem:[#allocation5 + $0x3a0] sm:$0xff]  ;;  %v1035_v26 = vld [vmem:[#allocation5 + $0x388] sm:$0xff] }
 0x166   :  { %v804_v50 = vadd.f32 %v803_v1, %v793_v10  ;;  %3600 = vmatpush1.bf16.msra.mxu1 %v4042_v20  ;;  %3478 = vmatprep.subr.bf16.mxu0 %v4049_v5  ;;  %v4056_v14 = vcombine.low %v1002_v0, %v1006_v58  ;;  %v4058_v13 = vcombine.low %v1003_v32, %v1007_v4  ;;  %v1039_v38 = vld [vmem:[#allocation5 + $0x3a8] sm:$0xff]  ;;  %v1042_v51 = vld [vmem:[#allocation5 + $0x3c0] sm:$0xff] }
 0x167   :  { %3601 = vmatprep.subr.bf16.mxu1 %v4051_v37  ;;  %v4065_v33 = vcombine.high %v1010_v18, %v1014_v35  ;;  %v4067_v28 = vcombine.high %v1011_v27, %v1015_v23  ;;  %v4064_v46 = vcombine.low %v1010_v18, %v1014_v35  ;;  %v4066_v63 = vcombine.low %v1011_v27, %v1015_v23  ;;  %v1046_v1 = vld [vmem:[#allocation5 + $0x3e0] sm:$0xff]  ;;  %v1043_v10 = vld [vmem:[#allocation5 + $0x3c8] sm:$0xff] }
 0x168   :  { %805 = vadd.xlane.f32.xlu0 %v804_v50  ;;  %v4073_v62 = vcombine.high %v1018_v55, %v1022_v3  ;;  %v4075_v8 = vcombine.high %v1019_v45, %v1023_v47  ;;  %v4072_v56 = vcombine.low %v1018_v55, %v1022_v3  ;;  %v4074_v34 = vcombine.low %v1019_v45, %v1023_v47  ;;  %v1047_v50 = vld [vmem:[#allocation5 + $0x3e8] sm:$0xff]  ;;  %v5260_v15 = vld [vmem:[#allocation5 + $0x400] sm:$0xff] }
 0x169   :  { %3479 = vmatpush1.bf16.msra.mxu0 %v4048_v9  ;;  %v4081_v54 = vcombine.high %v1026_v53, %v1030_v59  ;;  %v4083_v52 = vcombine.high %v1027_v2, %v1031_v17  ;;  %v4080_v25 = vcombine.low %v1026_v53, %v1030_v59  ;;  %v4082_v41 = vcombine.low %v1027_v2, %v1031_v17  ;;  %v5262_v29 = vld [vmem:[#allocation5 + $0x420] sm:$0xff]  ;;  %v5264_v48 = vld [vmem:[#allocation5 + $0x408] sm:$0xff] }
 0x16a   :  { %3602 = vmatpush1.bf16.msra.mxu1 %v4050_v30  ;;  %3480 = vmatprep.subr.bf16.mxu0 %v4057_v44  ;;  %v4089_v61 = vcombine.high %v1034_v57, %v1038_v49  ;;  %v4091_v39 = vcombine.high %v1035_v26, %v1039_v38  ;;  %v4088_v42 = vcombine.low %v1034_v57, %v1038_v49  ;;  %v5270_v19 = vld [vmem:[#allocation5 + $0x428] sm:$0xff]  ;;  %v5276_v4 = vld [vmem:[#allocation5 + $0x440] sm:$0xff] }
 0x16b   :  { %3603 = vmatprep.subr.bf16.mxu1 %v4059_v12  ;;  %v4090_v16 = vcombine.low %v1035_v26, %v1039_v38  ;;  %v4097_v24 = vcombine.high %v1042_v51, %v1046_v1  ;;  %v4099_v36 = vcombine.high %v1043_v10, %v1047_v50  ;;  %v4096_v6 = vcombine.low %v1042_v51, %v1046_v1  ;;  %v5278_v9 = vld [vmem:[#allocation5 + $0x460] sm:$0xff]  ;;  %v5280_v30 = vld [vmem:[#allocation5 + $0x448] sm:$0xff] }
 0x16c   :  { %v4098_v43 = vcombine.low %v1043_v10, %v1047_v50  ;;  %v4105_v5 = vcombine.high %v5260_v15, %v5262_v29  ;;  %v4107_v0 = vcombine.high %v5264_v48, %v5270_v19  ;;  %v5282_v44 = vld [vmem:[#allocation5 + $0x468] sm:$0xff]  ;;  %v5284_v12 = vld [vmem:[#allocation5 + $0x480] sm:$0xff] }
 0x16d   :  { %3481 = vmatpush1.bf16.msra.mxu0 %v4056_v14  ;;  %v5286_v18 = vld [vmem:[#allocation5 + $0x4a0] sm:$0xff]  ;;  %v5288_v35 = vld [vmem:[#allocation5 + $0x488] sm:$0xff] }
 0x16e   :  { %3604 = vmatpush1.bf16.msra.mxu1 %v4058_v13  ;;  %3482 = vmatprep.subr.bf16.mxu0 %v4065_v33  ;;  %v5290_v27 = vld [vmem:[#allocation5 + $0x4a8] sm:$0xff]  ;;  %v5292_v23 = vld [vmem:[#allocation5 + $0x4c0] sm:$0xff] }
 0x16f   :  { %3605 = vmatprep.subr.bf16.mxu1 %v4067_v28  ;;  %v5294_v14 = vld [vmem:[#allocation5 + $0x4e0] sm:$0xff]  ;;  %v5296_v13 = vld [vmem:[#allocation5 + $0x4c8] sm:$0xff] }
 0x170   :  { %v5298_v33 = vld [vmem:[#allocation5 + $0x4e8] sm:$0xff]  ;;  %v5302_v55 = vld [vmem:[#allocation5 + $0x500] sm:$0xff] }
 0x171   :  { %3483 = vmatpush1.bf16.msra.mxu0 %v4064_v46  ;;  %v5304_v3 = vld [vmem:[#allocation5 + $0x520] sm:$0xff]  ;;  %v5306_v45 = vld [vmem:[#allocation5 + $0x508] sm:$0xff] }
 0x172   :  { %3606 = vmatpush1.bf16.msra.mxu1 %v4066_v63  ;;  %3484 = vmatprep.subr.bf16.mxu0 %v4073_v62  ;;  %v5318_v53 = vld [vmem:[#allocation5 + $0x540] sm:$0xff]  ;;  %v5791_v49 = vld [vmem:[#allocation56_spill] sm:$0xff] }
 0x173   :  { %3607 = vmatprep.subr.bf16.mxu1 %v4075_v8  ;;  %v5316_v8 = vld [vmem:[#allocation5 + $0x528] sm:$0xff]  ;;  %v5320_v59 = vld [vmem:[#allocation5 + $0x560] sm:$0xff] }
 0x175   :  { %3485 = vmatpush1.bf16.msra.mxu0 %v4072_v56 }
 0x176   :  { %3608 = vmatpush1.bf16.msra.mxu1 %v4074_v34  ;;  %3486 = vmatprep.subr.bf16.mxu0 %v4081_v54 }
 0x177   :  { %3609 = vmatprep.subr.bf16.mxu1 %v4083_v52 }
 0x179   :  { %3487 = vmatpush1.bf16.msra.mxu0 %v4080_v25 }
 0x17a   :  { %3610 = vmatpush1.bf16.msra.mxu1 %v4082_v41  ;;  %3488 = vmatprep.subr.bf16.mxu0 %v4089_v61  ;;  %v5790_v61 = vld [vmem:[#allocation50_spill] sm:$0xff] }
 0x17b   :  { %3611 = vmatprep.subr.bf16.mxu1 %v4091_v39 }
 0x17d   :  { %3489 = vmatpush1.bf16.msra.mxu0 %v4088_v42 }
 0x17e   :  { %3612 = vmatpush1.bf16.msra.mxu1 %v4090_v16  ;;  %3490 = vmatprep.subr.bf16.mxu0 %v4097_v24 }
 0x17f   :  { %3613 = vmatprep.subr.bf16.mxu1 %v4099_v36  ;;  %v5786_v36 = vld [vmem:[#allocation26_spill] sm:$0xff] }
 0x181   :  { %3491 = vmatpush1.bf16.msra.mxu0 %v4096_v6 }
 0x182   :  { %3614 = vmatpush1.bf16.msra.mxu1 %v4098_v43  ;;  %3501 = vmatprep.subr.bf16.mxu0 %v4105_v5  ;;  %v5787_v43 = vld [vmem:[#allocation32_spill] sm:$0xff] }
 0x183   :  { %3624 = vmatprep.subr.bf16.mxu1 %v4107_v0  ;;  %v5788_v0 = vld [vmem:[#allocation38_spill] sm:$0xff] }
 0x1f5   :  { %v806_v37 = vpop.xlane.xlu0 %805 }
 0x1f6   :  { %v807_v58 = vmul.f32 0.0013020834, %v806_v37 }
 0x1f8   :  { %v808_v32 = vadd.f32 1e-06, %v807_v58  ;;  %v5789_v58 = vld [vmem:[#allocation44_spill] sm:$0xff] }
 0x1fa   :  { %4408 = vrsqrt.f32 %v808_v32 }
 0x204   :  { %v5338_v26 = vpop.eup %4408 }
 0x205   :  { %v5349_v39 = vrot.slane %v5338_v26, 1  ;;  %v5352_v51 = vrot.slane %v5338_v26, 2  ;;  %v5355_v1 = vrot.slane %v5338_v26, 3  ;;  %v5358_v10 = vrot.slane %v5338_v26, 4 }
 0x206   :  { %v5361_v50 = vrot.slane %v5338_v26, 5  ;;  %v5364_v42 = vrot.slane %v5338_v26, 6  ;;  %v5367_v16 = vrot.slane %v5338_v26, 7  ;;  %v827_v24 = vmul.f32 %v5338_v26, %v4910_v40 }
 0x207   :  { %v833_v6 = vmul.f32 %v5349_v39, %v5786_v36  ;;  %v839_v5 = vmul.f32 %v5352_v51, %v5787_v43  ;;  %v845_v37 = vmul.f32 %v5355_v1, %v5788_v0  ;;  %v851_v32 = vmul.f32 %v5358_v10, %v5789_v58 }
 0x208   :  { %v857_v25 = vmul.f32 %v5361_v50, %v5790_v61  ;;  %v863_v41 = vmul.f32 %v5364_v42, %v5791_v49  ;;  %v869_v40 = vmul.f32 %v5367_v16, %v5036_v31  ;;  %v875_v38 = vpack.c.bf16 %v827_v24, %v827_v24  ;;  %v5792_v49 = vld [vmem:[#allocation20_spill] sm:$0xff] }
 0x209   :  { %v881_v36 = vpack.c.bf16 %v833_v6, %v833_v6  ;;  %v887_v52 = vpack.c.bf16 %v839_v5, %v839_v5  ;;  %v893_v34 = vpack.c.bf16 %v845_v37, %v845_v37  ;;  %v899_v43 = vpack.c.bf16 %v851_v32, %v851_v32 }
 0x20a   :  { %v905_v57 = vpack.c.bf16 %v857_v25, %v857_v25  ;;  %v911_v54 = vpack.c.bf16 %v863_v41, %v863_v41  ;;  %v917_v0 = vpack.c.bf16 %v869_v40, %v869_v40  ;;  %v1397_v17 = vunpack.c.l.b16 %v875_v38  ;;  %v5793_v41 = vld [vmem:[#allocation25_spill] sm:$0xff] }
 0x20b   :  { %v1403_v62 = vunpack.c.l.b16 %v881_v36  ;;  %v1409_v58 = vunpack.c.l.b16 %v887_v52  ;;  %v1415_v56 = vunpack.c.l.b16 %v893_v34  ;;  %v1421_v2 = vunpack.c.l.b16 %v899_v43  ;;  %v5794_v34 = vld [vmem:[#allocation31_spill] sm:$0xff] }
 0x20c   :  { %v1427_v61 = vunpack.c.l.b16 %v905_v57  ;;  %v1433_v46 = vunpack.c.l.b16 %v911_v54  ;;  %v1439_v28 = vunpack.c.l.b16 %v917_v0  ;;  %v826_v63 = vmul.f32 %v5338_v26, %v5792_v49  ;;  %v5795_v54 = vld [vmem:[#allocation37_spill] sm:$0xff]  ;;  %v5796_v36 = vld [vmem:[#allocation43_spill] sm:$0xff] }
 0x20d   :  { %v1458_v31 = vrot.slane %v1403_v62, 7  ;;  %v1460_v24 = vrot.slane %v1409_v58, 6  ;;  %v1462_v6 = vrot.slane %v1415_v56, 5  ;;  %v1464_v5 = vrot.slane %v1421_v2, 4  ;;  %v5797_v2 = vld [vmem:[#allocation49_spill] sm:$0xff] }
 0x20e   :  { %v1466_v37 = vrot.slane %v1427_v61, 3  ;;  %v1468_v32 = vrot.slane %v1433_v46, 2  ;;  %v1470_v25 = vrot.slane %v1439_v28, 1  ;;  %v832_v38 = vmul.f32 %v5349_v39, %v5793_v41  ;;  %v5798_v28 = vld [vmem:[#allocation55_spill] sm:$0xff]  ;;  %v5799_v0 = vld [vmem:[#allocation13_spill] sm:$0xff] }
 0x20f   :  { %v1459_v52 = vsel %vm486_vm0, %v1458_v31, %v1397_v17  ;;  %v838_v57 = vmul.f32 %v5352_v51, %v5794_v34  ;;  %v844_v40 = vmul.f32 %v5355_v1, %v5795_v54  ;;  %v850_v62 = vmul.f32 %v5358_v10, %v5796_v36 }
 0x210   :  { %v1461_v56 = vsel %vm488_vm1, %v1460_v24, %v1459_v52  ;;  %v856_v46 = vmul.f32 %v5361_v50, %v5797_v2  ;;  %v862_v43 = vmul.f32 %v5364_v42, %v5798_v28  ;;  %v868_v17 = vmul.f32 %v5367_v16, %v5799_v0 }
 0x211   :  { %v1463_v58 = vsel %vm490_vm2, %v1462_v6, %v1461_v56  ;;  %v874_v61 = vpack.c.bf16 %v826_v63, %v826_v63  ;;  %v880_v49 = vpack.c.bf16 %v832_v38, %v832_v38  ;;  %v886_v31 = vpack.c.bf16 %v838_v57, %v838_v57 }
 0x212   :  { %v1465_v41 = vsel %vm492_vm3, %v1464_v5, %v1463_v58  ;;  %v892_v34 = vpack.c.bf16 %v844_v40, %v844_v40  ;;  %v898_v54 = vpack.c.bf16 %v850_v62, %v850_v62  ;;  %v904_v36 = vpack.c.bf16 %v856_v46, %v856_v46 }
 0x213   :  { %v1467_v24 = vsel %vm494_vm4, %v1466_v37, %v1465_v41  ;;  %v910_v52 = vpack.c.bf16 %v862_v43, %v862_v43  ;;  %v916_v2 = vpack.c.bf16 %v868_v17, %v868_v17  ;;  %v1396_v47 = vunpack.c.l.b16 %v874_v61 }
 0x214   :  { %v1469_v28 = vsel %vm496_vm5, %v1468_v32, %v1467_v24  ;;  %v1402_v21 = vunpack.c.l.b16 %v880_v49  ;;  %v1408_v20 = vunpack.c.l.b16 %v886_v31  ;;  %v1414_v0 = vunpack.c.l.b16 %v892_v34  ;;  %v5801_v49 = vld [vmem:[#allocation28_spill] sm:$0xff] }
 0x215   :  { %v1471_v6 = vsel %vm498_vm6, %v1470_v25, %v1469_v28  ;;  %v1420_v63 = vunpack.c.l.b16 %v898_v54  ;;  %v1426_v38 = vunpack.c.l.b16 %v904_v36  ;;  %v1432_v57 = vunpack.c.l.b16 %v910_v52  ;;  %v5800_v25 = vld [vmem:[#allocation22_spill] sm:$0xff]  ;;  %v5803_v34 = vld [vmem:[#allocation40_spill] sm:$0xff] }
 0x216   :  { %v5408_v56 = vpack.c.b16 %v1471_v6, %v1471_v6  ;;  %v1438_v5 = vunpack.c.l.b16 %v916_v2  ;;  %v1444_v40 = vrot.slane %v1402_v21, 7  ;;  %v1446_v62 = vrot.slane %v1408_v20, 6  ;;  %v5802_v20 = vld [vmem:[#allocation34_spill] sm:$0xff]  ;;  %v5805_v52 = vld [vmem:[#allocation52_spill] sm:$0xff] }
 0x217   :  { %v1448_v46 = vrot.slane %v1414_v0, 5  ;;  %v1450_v37 = vrot.slane %v1420_v63, 4  ;;  %v1452_v43 = vrot.slane %v1426_v38, 3  ;;  %v1454_v17 = vrot.slane %v1432_v57, 2  ;;  %v5804_v36 = vld [vmem:[#allocation46_spill] sm:$0xff] }
 0x218   :  { %3492 = vmatprep.mubr.bf16.mxu0 %v5408_v56  ;;  %3615 = vmatprep.mubr.bf16.mxu1 %v5408_v56  ;;  %v1445_v32 = vsel %vm486_vm0, %v1444_v40, %v1396_v47  ;;  %v1456_v58 = vrot.slane %v1438_v5, 1  ;;  %v829_v61 = vmul.f32 %v5338_v26, %v5800_v25  ;;  %v835_v31 = vmul.f32 %v5349_v39, %v5801_v49  ;;  %v5806_v28 = vld [vmem:[#allocation58_spill] sm:$0xff] }
 0x219   :  { %v1447_v21 = vsel %vm488_vm1, %v1446_v62, %v1445_v32  ;;  %v841_v41 = vmul.f32 %v5352_v51, %v5802_v20  ;;  %v847_v54 = vmul.f32 %v5355_v1, %v5803_v34  ;;  %v853_v24 = vmul.f32 %v5358_v10, %v5804_v36  ;;  %v5436_v34 = vld [vmem:[#allocation5 + $0x548] sm:$0xff] }
 0x21a   :  { %v1449_v47 = vsel %vm490_vm2, %v1448_v46, %v1447_v21  ;;  %v859_v2 = vmul.f32 %v5361_v50, %v5805_v52  ;;  %v865_v0 = vmul.f32 %v5364_v42, %v5806_v28  ;;  %v871_v6 = vmul.f32 %v5367_v16, %v5042_v11  ;;  %v5438_v11 = vld [vmem:[#allocation5 + $0x568] sm:$0xff] }
 0x21b   :  { %v1451_v63 = vsel %vm492_vm3, %v1450_v37, %v1449_v47  ;;  %v877_v38 = vpack.c.bf16 %v829_v61, %v829_v61  ;;  %v883_v57 = vpack.c.bf16 %v835_v31, %v835_v31  ;;  %v889_v5 = vpack.c.bf16 %v841_v41, %v841_v41 }
 0x21c   :  { %v1453_v40 = vsel %vm494_vm4, %v1452_v43, %v1451_v63  ;;  %v895_v62 = vpack.c.bf16 %v847_v54, %v847_v54  ;;  %v901_v32 = vpack.c.bf16 %v853_v24, %v853_v24  ;;  %v907_v25 = vpack.c.bf16 %v859_v2, %v859_v2 }
 0x21d   :  { %v1455_v46 = vsel %vm496_vm5, %v1454_v17, %v1453_v40  ;;  %v913_v49 = vpack.c.bf16 %v865_v0, %v865_v0  ;;  %v919_v21 = vpack.c.bf16 %v871_v6, %v871_v6  ;;  %v4145_v20 = vcombine.high %v5318_v53, %v5320_v59  ;;  %v5807_v6 = vld [vmem:[#allocation21_spill] sm:$0xff] }
 0x21e   :  { %v1457_v37 = vsel %vm498_vm6, %v1456_v58, %v1455_v46  ;;  %v1405_v61 = vunpack.c.l.b16 %v883_v57  ;;  %v1411_v31 = vunpack.c.l.b16 %v889_v5  ;;  %v1417_v41 = vunpack.c.l.b16 %v895_v62  ;;  %v5810_v62 = vld [vmem:[#allocation27_spill] sm:$0xff] }
 0x21f   :  { %v5441_v43 = vpack.c.b16 %v1457_v37, %v1457_v37  ;;  %v1423_v54 = vunpack.c.l.b16 %v901_v32  ;;  %v1429_v36 = vunpack.c.l.b16 %v907_v25  ;;  %v1435_v24 = vunpack.c.l.b16 %v913_v49  ;;  %v5811_v25 = vld [vmem:[#allocation33_spill] sm:$0xff] }
 0x220   :  { %v1399_v17 = vunpack.c.l.b16 %v877_v38  ;;  %v1486_v47 = vrot.slane %v1405_v61, 7  ;;  %v1488_v52 = vrot.slane %v1411_v31, 6  ;;  %v4146_v2 = vcombine.low %v5436_v34, %v5438_v11  ;;  %v5815_v37 = vld [vmem:[#allocation45_spill] sm:$0xff] }
 0x221   :  { %3493 = vmatmul.mubr.bf16.vlgmr.msra.gmra.mrb[0].mxu0 %v5441_v43  ;;  %3616 = vmatmul.mubr.bf16.vlgmr.msra.gmra.mrb[0].mxu1 %v5441_v43  ;;  %v1441_v28 = vunpack.c.l.b16 %v919_v21  ;;  %v1490_v58 = vrot.slane %v1417_v41, 5  ;;  %v1492_v0 = vrot.slane %v1423_v54, 4  ;;  %v828_v63 = vmul.f32 %v5338_v26, %v5807_v6  ;;  %v5816_v41 = vld [vmem:[#allocation51_spill] sm:$0xff] }
 0x222   :  { %v5808_v57 = vcombine.low %v5260_v15, %v5262_v29  ;;  %v5809_v38 = vcombine.low %v5264_v48, %v5270_v19  ;;  %v1487_v5 = vsel %vm486_vm0, %v1486_v47, %v1399_v17  ;;  %v1494_v40 = vrot.slane %v1429_v36, 3  ;;  %v5814_v48 = vld [vmem:[#allocation39_spill] sm:$0xff]  ;;  %v5817_v36 = vld [vmem:[#allocation57_spill] sm:$0xff] }
 0x223   :  { %v834_v32 = vmul.f32 %v5349_v39, %v5810_v62  ;;  %v840_v46 = vmul.f32 %v5352_v51, %v5811_v25  ;;  %v1489_v49 = vsel %vm488_vm1, %v1488_v52, %v1487_v5  ;;  %v1496_v21 = vrot.slane %v1435_v24, 2 }
 0x224   :  { %3502 = vmatpush1.bf16.msra.mxu0 %v5808_v57  ;;  %3625 = vmatpush1.bf16.msra.mxu1 %v5809_v38  ;;  %v5812_v15 = vcombine.high %v5276_v4, %v5278_v9  ;;  %v5813_v29 = vcombine.high %v5280_v30, %v5282_v44  ;;  %v846_v19 = vmul.f32 %v5355_v1, %v5814_v48  ;;  %v1498_v5 = vrot.slane %v1441_v28, 1 }
 0x225   :  { %v852_v61 = vmul.f32 %v5358_v10, %v5815_v37  ;;  %v1491_v31 = vsel %vm490_vm2, %v1490_v58, %v1489_v49  ;;  %v858_v54 = vmul.f32 %v5361_v50, %v5816_v41  ;;  %v864_v24 = vmul.f32 %v5364_v42, %v5817_v36 }
 0x226   :  { %3503 = vmatprep.subr.bf16.mxu0 %v5812_v15  ;;  %3626 = vmatprep.subr.bf16.mxu1 %v5813_v29  ;;  %v870_v17 = vmul.f32 %v5367_v16, %v5039_v22  ;;  %v1493_v47 = vsel %vm492_vm3, %v1492_v0, %v1491_v31  ;;  %v876_v52 = vpack.c.bf16 %v828_v63, %v828_v63 }
 0x227   :  { %v882_v6 = vpack.c.bf16 %v834_v32, %v834_v32  ;;  %v888_v57 = vpack.c.bf16 %v840_v46, %v840_v46  ;;  %v1495_v38 = vsel %vm494_vm4, %v1494_v40, %v1493_v47  ;;  %v5818_v58 = vcombine.low %v5276_v4, %v5278_v9 }
 0x228   :  { %v5819_v62 = vcombine.low %v5280_v30, %v5282_v44  ;;  %v894_v25 = vpack.c.bf16 %v846_v19, %v846_v19  ;;  %v900_v49 = vpack.c.bf16 %v852_v61, %v852_v61  ;;  %v1497_v22 = vsel %vm496_vm5, %v1496_v21, %v1495_v38  ;;  %v5828_v38 = vld [vmem:[#allocation36_spill] sm:$0xff] }
 0x229   :  { %3504 = vmatpush1.bf16.msra.mxu0 %v5818_v58  ;;  %v5820_v0 = vcombine.high %v5284_v12, %v5286_v18  ;;  %v5821_v63 = vcombine.high %v5288_v35, %v5290_v27  ;;  %v906_v28 = vpack.c.bf16 %v858_v54, %v858_v54  ;;  %v912_v40 = vpack.c.bf16 %v864_v24, %v864_v24  ;;  %v5824_v24 = vld [vmem:[#allocation24_spill] sm:$0xff]  ;;  %v5829_v58 = vld [vmem:[#allocation42_spill] sm:$0xff] }
 0x22a   :  { %3627 = vmatpush1.bf16.msra.mxu1 %v5819_v62  ;;  %v1499_v4 = vsel %vm498_vm6, %v1498_v5, %v1497_v22  ;;  %v918_v9 = vpack.c.bf16 %v870_v17, %v870_v17  ;;  %v1404_v32 = vunpack.c.l.b16 %v882_v6  ;;  %v1410_v30 = vunpack.c.l.b16 %v888_v57 }
 0x22b   :  { %3505 = vmatprep.subr.bf16.mxu0 %v5820_v0  ;;  %3628 = vmatprep.subr.bf16.mxu1 %v5821_v63  ;;  %v5494_v44 = vpack.c.b16 %v1499_v4, %v1499_v4  ;;  %v1416_v46 = vunpack.c.l.b16 %v894_v25  ;;  %v1422_v15 = vunpack.c.l.b16 %v900_v49  ;;  %v1428_v21 = vunpack.c.l.b16 %v906_v28  ;;  %v5830_v25 = vld [vmem:[#allocation48_spill] sm:$0xff] }
 0x22c   :  { %v5822_v29 = vcombine.low %v5284_v12, %v5286_v18  ;;  %v5823_v48 = vcombine.low %v5288_v35, %v5290_v27  ;;  %v1398_v19 = vunpack.c.l.b16 %v876_v52  ;;  %v1434_v37 = vunpack.c.l.b16 %v912_v40  ;;  %v5827_v52 = vld [vmem:[#allocation30_spill] sm:$0xff] }
 0x22d   :  { %v1472_v61 = vrot.slane %v1404_v32, 7  ;;  %v1474_v31 = vrot.slane %v1410_v30, 6  ;;  %3533 = vmatprep.mubr.bf16.mxu0 %v5494_v44  ;;  %3656 = vmatprep.mubr.bf16.mxu1 %v5494_v44  ;;  %v4147_v41 = vcombine.high %v5436_v34, %v5438_v11  ;;  %v1440_v54 = vunpack.c.l.b16 %v918_v9  ;;  %v5833_v40 = vld [vmem:[#allocation54_spill] sm:$0xff]  ;;  %v5834_v9 = vld [vmem:[#allocation17_spill] sm:$0xff] }
 0x22e   :  { %3506 = vmatpush1.bf16.msra.mxu0 %v5822_v29  ;;  %3629 = vmatpush1.bf16.msra.mxu1 %v5823_v48  ;;  %v1476_v36 = vrot.slane %v1416_v46, 5  ;;  %v831_v12 = vmul.f32 %v5338_v26, %v5824_v24  ;;  %v5825_v18 = vcombine.high %v5292_v23, %v5294_v14  ;;  %v5826_v35 = vcombine.high %v5296_v13, %v5298_v33  ;;  %v1099_v29 = vld [vmem:[#allocation5 + $0x588] sm:$0xff] }
 0x22f   :  { %v1473_v27 = vsel %vm486_vm0, %v1472_v61, %v1398_v19  ;;  %v1478_v17 = vrot.slane %v1422_v15, 4  ;;  %v1480_v47 = vrot.slane %v1428_v21, 3  ;;  %v837_v6 = vmul.f32 %v5349_v39, %v5827_v52  ;;  %v1103_v48 = vld [vmem:[#allocation5 + $0x5a8] sm:$0xff] }
 0x230   :  { %3507 = vmatprep.subr.bf16.mxu0 %v5825_v18  ;;  %3630 = vmatprep.subr.bf16.mxu1 %v5826_v35  ;;  %v1475_v57 = vsel %vm488_vm1, %v1474_v31, %v1473_v27  ;;  %v843_v5 = vmul.f32 %v5352_v51, %v5828_v38  ;;  %v849_v62 = vmul.f32 %v5355_v1, %v5829_v58  ;;  %v1482_v28 = vrot.slane %v1434_v37, 2  ;;  %v1110_v38 = vld [vmem:[#allocation5 + $0x5e0] sm:$0xff] }
 0x231   :  { %v855_v49 = vmul.f32 %v5358_v10, %v5830_v25  ;;  %v5831_v22 = vcombine.low %v5292_v23, %v5294_v14  ;;  %v5832_v0 = vcombine.low %v5296_v13, %v5298_v33  ;;  %v1477_v63 = vsel %vm490_vm2, %v1476_v36, %v1475_v57  ;;  %v1098_v14 = vld [vmem:[#allocation5 + $0x580] sm:$0xff] }
 0x232   :  { %v861_v4 = vmul.f32 %v5361_v50, %v5833_v40  ;;  %v867_v32 = vmul.f32 %v5364_v42, %v5834_v9  ;;  %v5835_v30 = vcombine.high %v5302_v55, %v5304_v3  ;;  %v5836_v23 = vcombine.high %v5306_v45, %v5316_v8  ;;  %v1102_v13 = vld [vmem:[#allocation5 + $0x5a0] sm:$0xff] }
 0x233   :  { %3508 = vmatpush1.bf16.msra.mxu0 %v5831_v22  ;;  %3631 = vmatpush1.bf16.msra.mxu1 %v5832_v0  ;;  %v1479_v33 = vsel %vm492_vm3, %v1478_v17, %v1477_v63  ;;  %v1484_v46 = vrot.slane %v1440_v54, 1  ;;  %v873_v15 = vmul.f32 %v5367_v16, %v5048_v7  ;;  %v879_v21 = vpack.c.bf16 %v831_v12, %v831_v12  ;;  %v1114_v9 = vld [vmem:[#allocation5 + $0x600] sm:$0xff] }
 0x234   :  { %3509 = vmatprep.subr.bf16.mxu0 %v5835_v30  ;;  %3632 = vmatprep.subr.bf16.mxu1 %v5836_v23  ;;  %v1481_v19 = vsel %vm494_vm4, %v1480_v47, %v1479_v33  ;;  %v885_v37 = vpack.c.bf16 %v837_v6, %v837_v6  ;;  %v891_v61 = vpack.c.bf16 %v843_v5, %v843_v5  ;;  %v1106_v6 = vld [vmem:[#allocation5 + $0x5c0] sm:$0xff]  ;;  %v1107_v5 = vld [vmem:[#allocation5 + $0x5c8] sm:$0xff] }
 0x235   :  { %v897_v31 = vpack.c.bf16 %v849_v62, %v849_v62  ;;  %v1483_v36 = vsel %vm496_vm5, %v1482_v28, %v1481_v19  ;;  %v903_v24 = vpack.c.bf16 %v855_v49, %v855_v49  ;;  %v909_v18 = vpack.c.bf16 %v861_v4, %v861_v4  ;;  %v1118_v23 = vld [vmem:[#allocation5 + $0x620] sm:$0xff] }
 0x236   :  { %v915_v35 = vpack.c.bf16 %v867_v32, %v867_v32  ;;  %v5837_v27 = vcombine.low %v5302_v55, %v5304_v3  ;;  %v5838_v7 = vcombine.low %v5306_v45, %v5316_v8  ;;  %v4153_v54 = vcombine.high %v1098_v14, %v1102_v13  ;;  %v1111_v45 = vld [vmem:[#allocation5 + $0x5e8] sm:$0xff]  ;;  %v1126_v19 = vld [vmem:[#allocation5 + $0x660] sm:$0xff] }
 0x237   :  { %v5553_v12 = vsel %vm498_vm6, %v1484_v46, %v1483_v36  ;;  %v921_v17 = vpack.c.bf16 %v873_v15, %v873_v15  ;;  %v1407_v47 = vunpack.c.l.b16 %v885_v37  ;;  %v4155_v52 = vcombine.high %v1099_v29, %v1103_v48  ;;  %v1123_v37 = vld [vmem:[#allocation5 + $0x648] sm:$0xff]  ;;  %v5570_v36 = vld [vmem:[#allocation5 + $0x680] sm:$0xff] }
 0x238   :  { %3510 = vmatpush1.bf16.msra.mxu0 %v5837_v27  ;;  %3633 = vmatpush1.bf16.msra.mxu1 %v5838_v7  ;;  %v1413_v57 = vunpack.c.l.b16 %v891_v61  ;;  %v1419_v55 = vunpack.c.l.b16 %v897_v31  ;;  %v1425_v3 = vunpack.c.l.b16 %v903_v24  ;;  %v1401_v8 = vunpack.c.l.b16 %v879_v21  ;;  %v1127_v31 = vld [vmem:[#allocation5 + $0x668] sm:$0xff]  ;;  %v5572_v24 = vld [vmem:[#allocation5 + $0x6a0] sm:$0xff] }
 0x239   :  { %3511 = vmatprep.subr.bf16.mxu0 %v4145_v20  ;;  %3634 = vmatprep.subr.bf16.mxu1 %v4147_v41  ;;  %v1431_v58 = vunpack.c.l.b16 %v909_v18  ;;  %v1514_v62 = vrot.slane %v1407_v47, 7  ;;  %v4152_v25 = vcombine.low %v1098_v14, %v1102_v13  ;;  %v1437_v49 = vunpack.c.l.b16 %v915_v35  ;;  %v1131_v27 = vld [vmem:[#allocation5 + $0x688] sm:$0xff] }
 0x23a   :  { %v1516_v22 = vrot.slane %v1413_v57, 6  ;;  %v5839_v0 = vcombine.low %v5318_v53, %v5320_v59  ;;  %v4154_v20 = vcombine.low %v1099_v29, %v1103_v48  ;;  %v1443_v41 = vunpack.c.l.b16 %v921_v17  ;;  %v1115_v53 = vld [vmem:[#allocation5 + $0x608] sm:$0xff]  ;;  %v1122_v48 = vld [vmem:[#allocation5 + $0x640] sm:$0xff] }
 0x23b   :  { %v1515_v63 = vsel %vm486_vm0, %v1514_v62, %v1401_v8  ;;  %v1518_v28 = vrot.slane %v1419_v55, 5  ;;  %v4161_v40 = vcombine.high %v1106_v6, %v1110_v38  ;;  %v4163_v4 = vcombine.high %v1107_v5, %v1111_v45  ;;  %v1119_v59 = vld [vmem:[#allocation5 + $0x628] sm:$0xff]  ;;  %v5842_v8 = vld [vmem:[#allocation35_spill] sm:$0xff]  ;;  %v5843_v62 = vld [vmem:[#allocation41_spill] sm:$0xff] }
 0x23c   :  { %3512 = vmatpush1.bf16.msra.mxu0 %v5839_v0  ;;  %3635 = vmatpush1.bf16.msra.mxu1 %v4146_v2  ;;  %v1517_v32 = vsel %vm488_vm1, %v1516_v22, %v1515_v63  ;;  %v1520_v30 = vrot.slane %v1425_v3, 4  ;;  %v1522_v34 = vrot.slane %v1431_v58, 3  ;;  %v1524_v2 = vrot.slane %v1437_v49, 2  ;;  %v1135_v7 = vld [vmem:[#allocation5 + $0x6a8] sm:$0xff]  ;;  %v5840_v3 = vld [vmem:[#allocation23_spill] sm:$0xff]  ;;  %v5845_v0 = vld [vmem:[#allocation53_spill] sm:$0xff] }
 0x23d   :  { %3513 = vmatprep.subr.bf16.mxu0 %v4153_v54  ;;  %3636 = vmatprep.subr.bf16.mxu1 %v4155_v52  ;;  %v1519_v14 = vsel %vm490_vm2, %v1518_v28, %v1517_v32  ;;  %v4160_v13 = vcombine.low %v1106_v6, %v1110_v38  ;;  %v4162_v33 = vcombine.low %v1107_v5, %v1111_v45  ;;  %v1526_v15 = vrot.slane %v1443_v41, 1  ;;  %v5841_v5 = vld [vmem:[#allocation29_spill] sm:$0xff]  ;;  %v5844_v49 = vld [vmem:[#allocation47_spill] sm:$0xff]  ;;  %v5846_v41 = vld [vmem:[#allocation12_spill] sm:$0xff] }
 0x23e   :  { %v1521_v11 = vsel %vm492_vm3, %v1520_v30, %v1519_v14  ;;  %v4169_v21 = vcombine.high %v1114_v9, %v1118_v23  ;;  %v4171_v29 = vcombine.high %v1115_v53, %v1119_v59  ;;  %v4168_v35 = vcombine.low %v1114_v9, %v1118_v23 }
 0x23f   :  { %v1523_v46 = vsel %vm494_vm4, %v1522_v34, %v1521_v11  ;;  %v4170_v54 = vcombine.low %v1115_v53, %v1119_v59  ;;  %v4176_v17 = vcombine.low %v1122_v48, %v1126_v19  ;;  %v4177_v47 = vcombine.high %v1122_v48, %v1126_v19  ;;  %v1151_v48 = vld [vmem:[#allocation5 + $0x728] sm:$0xff] }
 0x240   :  { %3514 = vmatpush1.bf16.msra.mxu0 %v4152_v25  ;;  %3637 = vmatpush1.bf16.msra.mxu1 %v4154_v20  ;;  %v1525_v61 = vsel %vm496_vm5, %v1524_v2, %v1523_v46  ;;  %v4178_v52 = vcombine.low %v1123_v37, %v1127_v31  ;;  %v4179_v6 = vcombine.high %v1123_v37, %v1127_v31  ;;  %v1146_v2 = vld [vmem:[#allocation5 + $0x700] sm:$0xff] }
 0x241   :  { %3515 = vmatprep.subr.bf16.mxu0 %v4161_v40  ;;  %3638 = vmatprep.subr.bf16.mxu1 %v4163_v4  ;;  %v5575_v18 = vsel %vm498_vm6, %v1526_v15, %v1525_v61  ;;  %v4185_v57 = vcombine.high %v5570_v36, %v5572_v24  ;;  %v4187_v55 = vcombine.high %v1131_v27, %v1135_v7  ;;  %v1139_v40 = vld [vmem:[#allocation5 + $0x6c8] sm:$0xff] }
 0x242   :  { %v830_v38 = vmul.f32 %v5338_v26, %v5840_v3  ;;  %v836_v45 = vmul.f32 %v5349_v39, %v5841_v5  ;;  %v842_v58 = vmul.f32 %v5352_v51, %v5842_v8  ;;  %v848_v25 = vmul.f32 %v5355_v1, %v5843_v62  ;;  %v1138_v26 = vld [vmem:[#allocation5 + $0x6c0] sm:$0xff]  ;;  %v1143_v4 = vld [vmem:[#allocation5 + $0x6e8] sm:$0xff] }
 0x243   :  { %v854_v22 = vmul.f32 %v5358_v10, %v5844_v49  ;;  %v860_v20 = vmul.f32 %v5361_v50, %v5845_v0  ;;  %v866_v63 = vmul.f32 %v5364_v42, %v5846_v41  ;;  %v872_v39 = vmul.f32 %v5367_v16, %v5045_v60  ;;  %v1142_v1 = vld [vmem:[#allocation5 + $0x6e0] sm:$0xff]  ;;  %v1163_v41 = vld [vmem:[#allocation5 + $0x788] sm:$0xff] }
 0x244   :  { %3516 = vmatpush1.bf16.msra.mxu0 %v4160_v13  ;;  %3639 = vmatpush1.bf16.msra.mxu1 %v4162_v33  ;;  %v878_v28 = vpack.c.bf16 %v830_v38, %v830_v38  ;;  %v884_v51 = vpack.c.bf16 %v836_v45, %v836_v45  ;;  %v890_v10 = vpack.c.bf16 %v842_v58, %v842_v58 }
 0x245   :  { %3517 = vmatprep.subr.bf16.mxu0 %v4169_v21  ;;  %3640 = vmatprep.subr.bf16.mxu1 %v4171_v29  ;;  %v896_v9 = vpack.c.bf16 %v848_v25, %v848_v25  ;;  %v902_v32 = vpack.c.bf16 %v854_v22, %v854_v22  ;;  %v4184_v50 = vcombine.low %v5570_v36, %v5572_v24  ;;  %v1150_v21 = vld [vmem:[#allocation5 + $0x720] sm:$0xff]  ;;  %v1147_v29 = vld [vmem:[#allocation5 + $0x708] sm:$0xff] }
 0x246   :  { %v908_v42 = vpack.c.bf16 %v860_v20, %v860_v20  ;;  %v914_v30 = vpack.c.bf16 %v866_v63, %v866_v63  ;;  %v920_v23 = vpack.c.bf16 %v872_v39, %v872_v39  ;;  %v1406_v53 = vunpack.c.l.b16 %v884_v51  ;;  %v1162_v22 = vld [vmem:[#allocation5 + $0x780] sm:$0xff]  ;;  %v1167_v63 = vld [vmem:[#allocation5 + $0x7a8] sm:$0xff] }
 0x247   :  { %v1412_v59 = vunpack.c.l.b16 %v890_v10  ;;  %v1418_v14 = vunpack.c.l.b16 %v896_v9  ;;  %v4186_v60 = vcombine.low %v1131_v27, %v1135_v7  ;;  %v4193_v16 = vcombine.high %v1138_v26, %v1142_v1  ;;  %v1166_v20 = vld [vmem:[#allocation5 + $0x7a0] sm:$0xff]  ;;  %v1175_v10 = vld [vmem:[#allocation5 + $0x7e8] sm:$0xff] }
 0x248   :  { %3518 = vmatpush1.bf16.msra.mxu0 %v4168_v35  ;;  %3641 = vmatpush1.bf16.msra.mxu1 %v4170_v54  ;;  %v4195_v34 = vcombine.high %v1139_v40, %v1143_v4  ;;  %v1424_v11 = vunpack.c.l.b16 %v902_v32  ;;  %v1400_v13 = vunpack.c.l.b16 %v878_v28  ;;  %v1430_v33 = vunpack.c.l.b16 %v908_v42 }
 0x249   :  { %3519 = vmatprep.subr.bf16.mxu0 %v4177_v47  ;;  %3642 = vmatprep.subr.bf16.mxu1 %v4179_v6  ;;  %v1500_v46 = vrot.slane %v1406_v53, 7  ;;  %v1502_v15 = vrot.slane %v1412_v59, 6  ;;  %v1436_v19 = vunpack.c.l.b16 %v914_v30  ;;  %v1442_v37 = vunpack.c.l.b16 %v920_v23  ;;  %v1158_v6 = vld [vmem:[#allocation5 + $0x760] sm:$0xff]  ;;  %v1179_v53 = vld [vmem:[#allocation5 + $0x808] sm:$0xff] }
 0x24a   :  { %v1504_v31 = vrot.slane %v1418_v14, 5  ;;  %v4192_v36 = vcombine.low %v1138_v26, %v1142_v1  ;;  %v4194_v24 = vcombine.low %v1139_v40, %v1143_v4  ;;  %v1506_v27 = vrot.slane %v1424_v11, 4  ;;  %v1170_v1 = vld [vmem:[#allocation5 + $0x7c0] sm:$0xff]  ;;  %v1171_v4 = vld [vmem:[#allocation5 + $0x7c8] sm:$0xff] }
 0x24b   :  { %v1501_v61 = vsel %vm486_vm0, %v1500_v46, %v1400_v13  ;;  %v4201_v7 = vcombine.high %v1146_v2, %v1150_v21  ;;  %v4203_v54 = vcombine.high %v1147_v29, %v1151_v48  ;;  %v1510_v38 = vrot.slane %v1436_v19, 2  ;;  %v1174_v40 = vld [vmem:[#allocation5 + $0x7e0] sm:$0xff]  ;;  %v1183_v59 = vld [vmem:[#allocation5 + $0x828] sm:$0xff] }
 0x24c   :  { %3520 = vmatpush1.bf16.msra.mxu0 %v4176_v17  ;;  %3643 = vmatpush1.bf16.msra.mxu1 %v4178_v52  ;;  %v1503_v35 = vsel %vm488_vm1, %v1502_v15, %v1501_v61  ;;  %v1154_v17 = vld [vmem:[#allocation5 + $0x740] sm:$0xff]  ;;  %v1508_v52 = vrot.slane %v1430_v33, 3  ;;  %v1512_v45 = vrot.slane %v1442_v37, 1  ;;  %v4200_v8 = vcombine.low %v1146_v2, %v1150_v21  ;;  %v1187_v13 = vld [vmem:[#allocation5 + $0x848] sm:$0xff] }
 0x24d   :  { %3521 = vmatprep.subr.bf16.mxu0 %v4185_v57  ;;  %3644 = vmatprep.subr.bf16.mxu1 %v4187_v55  ;;  %v1505_v47 = vsel %vm490_vm2, %v1504_v31, %v1503_v35  ;;  %v1155_v57 = vld [vmem:[#allocation5 + $0x748] sm:$0xff]  ;;  %v4202_v58 = vcombine.low %v1147_v29, %v1151_v48  ;;  %v4209_v25 = vcombine.high %v1154_v17, %v1158_v6  ;;  %v1178_v30 = vld [vmem:[#allocation5 + $0x800] sm:$0xff] }
 0x24e   :  { %v1159_v55 = vld [vmem:[#allocation5 + $0x768] sm:$0xff]  ;;  %v1507_v3 = vsel %vm492_vm3, %v1506_v27, %v1505_v47  ;;  %v4208_v26 = vcombine.low %v1154_v17, %v1158_v6  ;;  %v4217_v28 = vcombine.high %v1162_v22, %v1166_v20  ;;  %v4219_v51 = vcombine.high %v1163_v41, %v1167_v63  ;;  %v1182_v23 = vld [vmem:[#allocation5 + $0x820] sm:$0xff] }
 0x24f   :  { %v1509_v5 = vsel %vm494_vm4, %v1508_v52, %v1507_v3  ;;  %v4211_v49 = vcombine.high %v1155_v57, %v1159_v55  ;;  %v4210_v39 = vcombine.low %v1155_v57, %v1159_v55  ;;  %v4216_v9 = vcombine.low %v1162_v22, %v1166_v20  ;;  %v1186_v11 = vld [vmem:[#allocation5 + $0x840] sm:$0xff]  ;;  %v1191_v33 = vld [vmem:[#allocation5 + $0x868] sm:$0xff] }
 0x250   :  { %3522 = vmatpush1.bf16.msra.mxu0 %v4184_v50  ;;  %3645 = vmatpush1.bf16.msra.mxu1 %v4186_v60  ;;  %v1511_v62 = vsel %vm496_vm5, %v1510_v38, %v1509_v5  ;;  %v4218_v32 = vcombine.low %v1163_v41, %v1167_v63  ;;  %v4225_v50 = vcombine.high %v1170_v1, %v1174_v40  ;;  %v1190_v2 = vld [vmem:[#allocation5 + $0x860] sm:$0xff]  ;;  %v1195_v31 = vld [vmem:[#allocation5 + $0x888] sm:$0xff] }
 0x251   :  { %3523 = vmatprep.subr.bf16.mxu0 %v4193_v16  ;;  %3646 = vmatprep.subr.bf16.mxu1 %v4195_v34  ;;  %v5604_v0 = vsel %vm498_vm6, %v1512_v45, %v1511_v62  ;;  %v4227_v42 = vcombine.high %v1171_v4, %v1175_v10  ;;  %v4224_v14 = vcombine.low %v1170_v1, %v1174_v40  ;;  %v1194_v37 = vld [vmem:[#allocation5 + $0x880] sm:$0xff]  ;;  %v1207_v17 = vld [vmem:[#allocation5 + $0x8e8] sm:$0xff] }
 0x252   :  { %v4226_v60 = vcombine.low %v1171_v4, %v1175_v10  ;;  %v4233_v16 = vcombine.high %v1178_v30, %v1182_v23  ;;  %v4235_v34 = vcombine.high %v1179_v53, %v1183_v59  ;;  %v4232_v46 = vcombine.low %v1178_v30, %v1182_v23  ;;  %v1198_v61 = vld [vmem:[#allocation5 + $0x8a0] sm:$0xff]  ;;  %v1211_v38 = vld [vmem:[#allocation5 + $0x908] sm:$0xff] }
 0x253   :  { %v5608_v15 = vpack.c.b16 %v5553_v12, %v5553_v12  ;;  %v4234_v21 = vcombine.low %v1179_v53, %v1183_v59  ;;  %v5612_v29 = vpack.c.b16 %v5575_v18, %v5575_v18  ;;  %v4241_v48 = vcombine.high %v1186_v11, %v1190_v2  ;;  %v1202_v27 = vld [vmem:[#allocation5 + $0x8c0] sm:$0xff]  ;;  %v1215_v5 = vld [vmem:[#allocation5 + $0x928] sm:$0xff] }
 0x254   :  { %3524 = vmatpush1.bf16.msra.mxu0 %v4192_v36  ;;  %3647 = vmatpush1.bf16.msra.mxu1 %v4194_v24  ;;  %v4243_v19 = vcombine.high %v1187_v13, %v1191_v33  ;;  %v1199_v36 = vld [vmem:[#allocation5 + $0x8a8] sm:$0xff]  ;;  %v4240_v12 = vcombine.low %v1186_v11, %v1190_v2  ;;  %v4242_v24 = vcombine.low %v1187_v13, %v1191_v33  ;;  %v1210_v55 = vld [vmem:[#allocation5 + $0x900] sm:$0xff] }
 0x255   :  { %3525 = vmatprep.subr.bf16.mxu0 %v4201_v7  ;;  %3648 = vmatprep.subr.bf16.mxu1 %v4203_v54  ;;  %v4249_v18 = vcombine.high %v1194_v37, %v1198_v61  ;;  %v4251_v35 = vcombine.high %v1195_v31, %v1199_v36  ;;  %v1206_v7 = vld [vmem:[#allocation5 + $0x8e0] sm:$0xff]  ;;  %v1203_v54 = vld [vmem:[#allocation5 + $0x8c8] sm:$0xff]  ;;  %v4248_v47 = vcombine.low %v1194_v37, %v1198_v61 }
 0x256   :  { %v4250_v52 = vcombine.low %v1195_v31, %v1199_v36  ;;  %v4257_v6 = vcombine.high %v1202_v27, %v1206_v7  ;;  %v4259_v57 = vcombine.high %v1203_v54, %v1207_v17  ;;  %v1214_v3 = vld [vmem:[#allocation5 + $0x920] sm:$0xff]  ;;  %v4256_v45 = vcombine.low %v1202_v27, %v1206_v7  ;;  %v1219_v22 = vld [vmem:[#allocation5 + $0x948] sm:$0xff] }
 0x257   :  { %v4267_v62 = vcombine.high %v1211_v38, %v1215_v5  ;;  %v1223_v20 = vld [vmem:[#allocation5 + $0x968] sm:$0xff]  ;;  %v4264_v41 = vcombine.low %v1210_v55, %v1214_v3  ;;  %v4266_v63 = vcombine.low %v1211_v38, %v1215_v5 }
 0x258   :  { %3526 = vmatpush1.bf16.msra.mxu0 %v4200_v8  ;;  %3649 = vmatpush1.bf16.msra.mxu1 %v4202_v58  ;;  %v4258_v8 = vcombine.low %v1203_v54, %v1207_v17  ;;  %v4265_v58 = vcombine.high %v1210_v55, %v1214_v3  ;;  %v1227_v1 = vld [vmem:[#allocation5 + $0x988] sm:$0xff]  ;;  %v4274_v10 = vcombine.low %v1219_v22, %v1223_v20 }
 0x259   :  { %3527 = vmatprep.subr.bf16.mxu0 %v4209_v25  ;;  %3650 = vmatprep.subr.bf16.mxu1 %v4211_v49  ;;  %v1218_v25 = vld [vmem:[#allocation5 + $0x940] sm:$0xff]  ;;  %v1231_v40 = vld [vmem:[#allocation5 + $0x9a8] sm:$0xff] }
 0x25a   :  { %v1222_v49 = vld [vmem:[#allocation5 + $0x960] sm:$0xff]  ;;  %v1235_v30 = vld [vmem:[#allocation5 + $0x9c8] sm:$0xff]  ;;  %v4282_v59 = vcombine.low %v1227_v1, %v1231_v40 }
 0x25b   :  { %v4272_v4 = vcombine.low %v1218_v25, %v1222_v49  ;;  %v1239_v23 = vld [vmem:[#allocation5 + $0x9e8] sm:$0xff] }
 0x25c   :  { %3528 = vmatpush1.bf16.msra.mxu0 %v4208_v26  ;;  %3651 = vmatpush1.bf16.msra.mxu1 %v4210_v39  ;;  %v4273_v26 = vcombine.high %v1218_v25, %v1222_v49  ;;  %v4275_v39 = vcombine.high %v1219_v22, %v1223_v20  ;;  %v1243_v11 = vld [vmem:[#allocation5 + $0xa08] sm:$0xff]  ;;  %v4290_v33 = vcombine.low %v1235_v30, %v1239_v23 }
 0x25d   :  { %3529 = vmatprep.subr.bf16.mxu0 %v4217_v28  ;;  %3652 = vmatprep.subr.bf16.mxu1 %v4219_v51  ;;  %v1226_v28 = vld [vmem:[#allocation5 + $0x980] sm:$0xff]  ;;  %v1247_v2 = vld [vmem:[#allocation5 + $0xa28] sm:$0xff] }
 0x25e   :  { %v1230_v51 = vld [vmem:[#allocation5 + $0x9a0] sm:$0xff]  ;;  %v1251_v37 = vld [vmem:[#allocation5 + $0xa48] sm:$0xff]  ;;  %v4298_v36 = vcombine.low %v1243_v11, %v1247_v2 }
 0x25f   :  { %v4280_v53 = vcombine.low %v1226_v28, %v1230_v51  ;;  %v1255_v61 = vld [vmem:[#allocation5 + $0xa68] sm:$0xff] }
 0x260   :  { %3530 = vmatpush1.bf16.msra.mxu0 %v4216_v9  ;;  %3653 = vmatpush1.bf16.msra.mxu1 %v4218_v32  ;;  %v4281_v9 = vcombine.high %v1226_v28, %v1230_v51  ;;  %v4283_v32 = vcombine.high %v1227_v1, %v1231_v40  ;;  %v1259_v27 = vld [vmem:[#allocation5 + $0xa88] sm:$0xff]  ;;  %v4306_v17 = vcombine.low %v1251_v37, %v1255_v61 }
 0x261   :  { %3531 = vmatprep.subr.bf16.mxu0 %v4225_v50  ;;  %3654 = vmatprep.subr.bf16.mxu1 %v4227_v42  ;;  %v1234_v50 = vld [vmem:[#allocation5 + $0x9c0] sm:$0xff]  ;;  %v1263_v7 = vld [vmem:[#allocation5 + $0xaa8] sm:$0xff] }
 0x262   :  { %v1238_v42 = vld [vmem:[#allocation5 + $0x9e0] sm:$0xff]  ;;  %v1267_v55 = vld [vmem:[#allocation5 + $0xac8] sm:$0xff]  ;;  %v4314_v5 = vcombine.low %v1259_v27, %v1263_v7 }
 0x263   :  { %v4288_v13 = vcombine.low %v1234_v50, %v1238_v42  ;;  %v1271_v3 = vld [vmem:[#allocation5 + $0xae8] sm:$0xff] }
 0x264   :  { %3532 = vmatpush1.bf16.msra.mxu0 %v4224_v14  ;;  %3655 = vmatpush1.bf16.msra.mxu1 %v4226_v60  ;;  %v4289_v14 = vcombine.high %v1234_v50, %v1238_v42  ;;  %v4291_v60 = vcombine.high %v1235_v30, %v1239_v23  ;;  %v1275_v25 = vld [vmem:[#allocation5 + $0xb08] sm:$0xff]  ;;  %v4322_v20 = vcombine.low %v1267_v55, %v1271_v3 }
 0x265   :  { %3542 = vmatprep.subr.bf16.mxu0 %v4233_v16  ;;  %3665 = vmatprep.subr.bf16.mxu1 %v4235_v34  ;;  %v1242_v16 = vld [vmem:[#allocation5 + $0xa00] sm:$0xff]  ;;  %v1279_v49 = vld [vmem:[#allocation5 + $0xb28] sm:$0xff] }
 0x266   :  { %v1246_v34 = vld [vmem:[#allocation5 + $0xa20] sm:$0xff]  ;;  %v1283_v28 = vld [vmem:[#allocation5 + $0xb48] sm:$0xff]  ;;  %v4330_v40 = vcombine.low %v1275_v25, %v1279_v49 }
 0x267   :  { %3534 = vmatmul.mubr.bf16.vlgmr.msra.gmra.mrb[0].mxu0 %v5608_v15  ;;  %3657 = vmatmul.mubr.bf16.vlgmr.msra.gmra.mrb[0].mxu1 %v5608_v15  ;;  %v4296_v31 = vcombine.low %v1242_v16, %v1246_v34  ;;  %v1287_v51 = vld [vmem:[#allocation5 + $0xb68] sm:$0xff] }
 0x268   :  { %3543 = vmatpush1.bf16.msra.mxu0 %v4232_v46  ;;  %3574 = vmatprep.mubr.bf16.mxu0 %v5612_v29  ;;  %v4297_v46 = vcombine.high %v1242_v16, %v1246_v34  ;;  %v1291_v50 = vld [vmem:[#allocation5 + $0xb88] sm:$0xff]  ;;  %v4338_v23 = vcombine.low %v1283_v28, %v1287_v51 }
 0x269   :  { %3666 = vmatpush1.bf16.msra.mxu1 %v4234_v21  ;;  %3697 = vmatprep.mubr.bf16.mxu1 %v5612_v29  ;;  %v4299_v21 = vcombine.high %v1243_v11, %v1247_v2  ;;  %v1295_v42 = vld [vmem:[#allocation5 + $0xba8] sm:$0xff] }
 0x26a   :  { %3544 = vmatprep.subr.bf16.mxu0 %v4241_v48  ;;  %3667 = vmatprep.subr.bf16.mxu1 %v4243_v19  ;;  %v1250_v48 = vld [vmem:[#allocation5 + $0xa40] sm:$0xff]  ;;  %v1299_v16 = vld [vmem:[#allocation5 + $0xbc8] sm:$0xff]  ;;  %v4346_v2 = vcombine.low %v1291_v50, %v1295_v42 }
 0x26b   :  { %v1254_v19 = vld [vmem:[#allocation5 + $0xa60] sm:$0xff]  ;;  %v1303_v34 = vld [vmem:[#allocation5 + $0xbe8] sm:$0xff] }
 0x26c   :  { %3545 = vmatpush1.bf16.msra.mxu0 %v4240_v12  ;;  %v4305_v12 = vcombine.high %v1250_v48, %v1254_v19  ;;  %v4304_v54 = vcombine.low %v1250_v48, %v1254_v19  ;;  %v925_v48 = vld [vmem:[#allocation5 + $0x18] sm:$0xff] }
 0x26d   :  { %3668 = vmatpush1.bf16.msra.mxu1 %v4242_v24  ;;  %3546 = vmatprep.subr.bf16.mxu0 %v4249_v18  ;;  %v4307_v24 = vcombine.high %v1251_v37, %v1255_v61  ;;  %v1258_v18 = vld [vmem:[#allocation5 + $0xa80] sm:$0xff]  ;;  %v929_v19 = vld [vmem:[#allocation5 + $0x38] sm:$0xff]  ;;  %v4354_v61 = vcombine.low %v1299_v16, %v1303_v34 }
 0x26e   :  { %3669 = vmatprep.subr.bf16.mxu1 %v4251_v35  ;;  %v1262_v35 = vld [vmem:[#allocation5 + $0xaa0] sm:$0xff] }
 0x26f   :  { %v4312_v38 = vcombine.low %v1258_v18, %v1262_v35 }
 0x270   :  { %3547 = vmatpush1.bf16.msra.mxu0 %v4248_v47  ;;  %v4313_v47 = vcombine.high %v1258_v18, %v1262_v35  ;;  %v933_v35 = vld [vmem:[#allocation5 + $0x58] sm:$0xff] }
 0x271   :  { %3670 = vmatpush1.bf16.msra.mxu1 %v4250_v52  ;;  %3548 = vmatprep.subr.bf16.mxu0 %v4257_v6  ;;  %v4315_v52 = vcombine.high %v1259_v27, %v1263_v7  ;;  %v1266_v6 = vld [vmem:[#allocation5 + $0xac0] sm:$0xff]  ;;  %v937_v27 = vld [vmem:[#allocation5 + $0x78] sm:$0xff]  ;;  %v5620_v7 = vpack.c.b16 %v5604_v0, %v5604_v0 }
 0x272   :  { %3671 = vmatprep.subr.bf16.mxu1 %v4259_v57  ;;  %v1270_v57 = vld [vmem:[#allocation5 + $0xae0] sm:$0xff]  ;;  %v3990_v0 = vcombine.low %v933_v35, %v937_v27 }
 0x273   :  { %v4320_v22 = vcombine.low %v1266_v6, %v1270_v57 }
 0x274   :  { %3549 = vmatpush1.bf16.msra.mxu0 %v4256_v45  ;;  %v4321_v45 = vcombine.high %v1266_v6, %v1270_v57  ;;  %v3991_v6 = vcombine.high %v933_v35, %v937_v27  ;;  %v941_v57 = vld [vmem:[#allocation5 + $0x98] sm:$0xff] }
 0x275   :  { %3672 = vmatpush1.bf16.msra.mxu1 %v4258_v8  ;;  %3550 = vmatprep.subr.bf16.mxu0 %v4265_v58  ;;  %v4323_v8 = vcombine.high %v1267_v55, %v1271_v3  ;;  %v1274_v58 = vld [vmem:[#allocation5 + $0xb00] sm:$0xff]  ;;  %v945_v55 = vld [vmem:[#allocation5 + $0xb8] sm:$0xff] }
 0x276   :  { %3673 = vmatprep.subr.bf16.mxu1 %v4267_v62  ;;  %v1278_v62 = vld [vmem:[#allocation5 + $0xb20] sm:$0xff] }
 0x277   :  { %v4328_v1 = vcombine.low %v1274_v58, %v1278_v62 }
 0x278   :  { %3551 = vmatpush1.bf16.msra.mxu0 %v4264_v41  ;;  %v4329_v41 = vcombine.high %v1274_v58, %v1278_v62  ;;  %v949_v58 = vld [vmem:[#allocation5 + $0xd8] sm:$0xff] }
 0x279   :  { %3674 = vmatpush1.bf16.msra.mxu1 %v4266_v63  ;;  %3552 = vmatprep.subr.bf16.mxu0 %v4273_v26  ;;  %v4331_v63 = vcombine.high %v1275_v25, %v1279_v49  ;;  %v1282_v26 = vld [vmem:[#allocation5 + $0xb40] sm:$0xff]  ;;  %v953_v62 = vld [vmem:[#allocation5 + $0xf8] sm:$0xff]  ;;  %v3998_v49 = vcombine.low %v941_v57, %v945_v55 }
 0x27a   :  { %3675 = vmatprep.subr.bf16.mxu1 %v4275_v39  ;;  %v1286_v39 = vld [vmem:[#allocation5 + $0xb60] sm:$0xff] }
 0x27b   :  { %v4336_v30 = vcombine.low %v1282_v26, %v1286_v39 }
 0x27c   :  { %3553 = vmatpush1.bf16.msra.mxu0 %v4272_v4  ;;  %v4337_v4 = vcombine.high %v1282_v26, %v1286_v39  ;;  %v957_v26 = vld [vmem:[#allocation5 + $0x118] sm:$0xff] }
 0x27d   :  { %3676 = vmatpush1.bf16.msra.mxu1 %v4274_v10  ;;  %3554 = vmatprep.subr.bf16.mxu0 %v4281_v9  ;;  %v4339_v10 = vcombine.high %v1283_v28, %v1287_v51  ;;  %v1290_v9 = vld [vmem:[#allocation5 + $0xb80] sm:$0xff]  ;;  %v961_v39 = vld [vmem:[#allocation5 + $0x138] sm:$0xff]  ;;  %v4006_v28 = vcombine.low %v949_v58, %v953_v62 }
 0x27e   :  { %3677 = vmatprep.subr.bf16.mxu1 %v4283_v32  ;;  %v1294_v32 = vld [vmem:[#allocation5 + $0xba0] sm:$0xff] }
 0x27f   :  { %v4344_v11 = vcombine.low %v1290_v9, %v1294_v32 }
 0x280   :  { %3555 = vmatpush1.bf16.msra.mxu0 %v4280_v53  ;;  %v4345_v53 = vcombine.high %v1290_v9, %v1294_v32  ;;  %v969_v9 = vld [vmem:[#allocation5 + $0x178] sm:$0xff] }
 0x281   :  { %3678 = vmatpush1.bf16.msra.mxu1 %v4282_v59  ;;  %3556 = vmatprep.subr.bf16.mxu0 %v4289_v14  ;;  %v4347_v59 = vcombine.high %v1291_v50, %v1295_v42  ;;  %v1298_v14 = vld [vmem:[#allocation5 + $0xbc0] sm:$0xff]  ;;  %v4014_v50 = vcombine.low %v957_v26, %v961_v39 }
 0x282   :  { %3679 = vmatprep.subr.bf16.mxu1 %v4291_v60  ;;  %v1302_v60 = vld [vmem:[#allocation5 + $0xbe0] sm:$0xff] }
 0x283   :  { %v4352_v37 = vcombine.low %v1298_v14, %v1302_v60 }
 0x284   :  { %3557 = vmatpush1.bf16.msra.mxu0 %v4288_v13  ;;  %v4353_v13 = vcombine.high %v1298_v14, %v1302_v60  ;;  %v977_v14 = vld [vmem:[#allocation5 + $0x1b8] sm:$0xff] }
 0x285   :  { %3680 = vmatpush1.bf16.msra.mxu1 %v4290_v33  ;;  %3558 = vmatprep.subr.bf16.mxu0 %v4297_v46  ;;  %v4355_v33 = vcombine.high %v1299_v16, %v1303_v34  ;;  %v924_v46 = vld [vmem:[#allocation5 + $0x10] sm:$0xff] }
 0x286   :  { %3681 = vmatprep.subr.bf16.mxu1 %v4299_v21  ;;  %v928_v21 = vld [vmem:[#allocation5 + $0x30] sm:$0xff] }
 0x287   :  { %v3980_v18 = vcombine.low %v924_v46, %v928_v21 }
 0x288   :  { %3559 = vmatpush1.bf16.msra.mxu0 %v4296_v31  ;;  %v3981_v31 = vcombine.high %v924_v46, %v928_v21  ;;  %v985_v46 = vld [vmem:[#allocation5 + $0x1f8] sm:$0xff] }
 0x289   :  { %3682 = vmatpush1.bf16.msra.mxu1 %v4298_v36  ;;  %3560 = vmatprep.subr.bf16.mxu0 %v4305_v12  ;;  %v3983_v36 = vcombine.high %v925_v48, %v929_v19  ;;  %v932_v12 = vld [vmem:[#allocation5 + $0x50] sm:$0xff] }
 0x28a   :  { %3683 = vmatprep.subr.bf16.mxu1 %v4307_v24  ;;  %v936_v24 = vld [vmem:[#allocation5 + $0x70] sm:$0xff] }
 0x28b   :  { %v3988_v3 = vcombine.low %v932_v12, %v936_v24 }
 0x28c   :  { %3561 = vmatpush1.bf16.msra.mxu0 %v4304_v54  ;;  %v3982_v54 = vcombine.low %v925_v48, %v929_v19 }
 0x28d   :  { %3684 = vmatpush1.bf16.msra.mxu1 %v4306_v17  ;;  %3562 = vmatprep.subr.bf16.mxu0 %v4313_v47  ;;  %v3989_v17 = vcombine.high %v932_v12, %v936_v24  ;;  %v940_v47 = vld [vmem:[#allocation5 + $0x90] sm:$0xff]  ;;  %v993_v12 = vld [vmem:[#allocation5 + $0x238] sm:$0xff] }
 0x28e   :  { %3685 = vmatprep.subr.bf16.mxu1 %v4315_v52  ;;  %v944_v52 = vld [vmem:[#allocation5 + $0xb0] sm:$0xff] }
 0x28f   :  { %v3996_v25 = vcombine.low %v940_v47, %v944_v52 }
 0x290   :  { %3563 = vmatpush1.bf16.msra.mxu0 %v4312_v38  ;;  %v3997_v38 = vcombine.high %v940_v47, %v944_v52  ;;  %v997_v47 = vld [vmem:[#allocation5 + $0x258] sm:$0xff] }
 0x291   :  { %3686 = vmatpush1.bf16.msra.mxu1 %v4314_v5  ;;  %3564 = vmatprep.subr.bf16.mxu0 %v4321_v45  ;;  %v3999_v5 = vcombine.high %v941_v57, %v945_v55  ;;  %v948_v45 = vld [vmem:[#allocation5 + $0xd0] sm:$0xff]  ;;  %v1001_v52 = vld [vmem:[#allocation5 + $0x278] sm:$0xff] }
 0x292   :  { %3687 = vmatprep.subr.bf16.mxu1 %v4323_v8  ;;  %v952_v8 = vld [vmem:[#allocation5 + $0xf0] sm:$0xff] }
 0x294   :  { %3565 = vmatpush1.bf16.msra.mxu0 %v4320_v22  ;;  %v4005_v22 = vcombine.high %v948_v45, %v952_v8 }
 0x295   :  { %3688 = vmatpush1.bf16.msra.mxu1 %v4322_v20  ;;  %3566 = vmatprep.subr.bf16.mxu0 %v4329_v41  ;;  %v4007_v20 = vcombine.high %v949_v58, %v953_v62  ;;  %v956_v41 = vld [vmem:[#allocation5 + $0x110] sm:$0xff]  ;;  %v4054_v58 = vcombine.low %v997_v47, %v1001_v52 }
 0x296   :  { %3689 = vmatprep.subr.bf16.mxu1 %v4331_v63  ;;  %v960_v63 = vld [vmem:[#allocation5 + $0x130] sm:$0xff] }
 0x297   :  { %v4013_v51 = vcombine.high %v956_v41, %v960_v63  ;;  %v4012_v32 = vcombine.low %v956_v41, %v960_v63  ;;  %v1017_v41 = vld [vmem:[#allocation5 + $0x2f8] sm:$0xff] }
 0x298   :  { %3567 = vmatpush1.bf16.msra.mxu0 %v4328_v1  ;;  %v4015_v1 = vcombine.high %v957_v26, %v961_v39 }
 0x299   :  { %3690 = vmatpush1.bf16.msra.mxu1 %v4330_v40  ;;  %3568 = vmatprep.subr.bf16.mxu0 %v4337_v4  ;;  %v964_v40 = vld [vmem:[#allocation5 + $0x150] sm:$0xff] }
 0x29a   :  { %3691 = vmatprep.subr.bf16.mxu1 %v4339_v10  ;;  %v968_v4 = vld [vmem:[#allocation5 + $0x170] sm:$0xff]  ;;  %v965_v10 = vld [vmem:[#allocation5 + $0x158] sm:$0xff] }
 0x29b   :  { %v4021_v42 = vcombine.high %v964_v40, %v968_v4  ;;  %v4020_v60 = vcombine.low %v964_v40, %v968_v4  ;;  %v4022_v16 = vcombine.low %v965_v10, %v969_v9  ;;  %v1025_v40 = vld [vmem:[#allocation5 + $0x338] sm:$0xff] }
 0x29c   :  { %3569 = vmatpush1.bf16.msra.mxu0 %v4336_v30  ;;  %v4023_v30 = vcombine.high %v965_v10, %v969_v9 }
 0x29d   :  { %3692 = vmatpush1.bf16.msra.mxu1 %v4338_v23  ;;  %3570 = vmatprep.subr.bf16.mxu0 %v4345_v53  ;;  %v972_v23 = vld [vmem:[#allocation5 + $0x190] sm:$0xff] }
 0x29e   :  { %3693 = vmatprep.subr.bf16.mxu1 %v4347_v59  ;;  %v976_v53 = vld [vmem:[#allocation5 + $0x1b0] sm:$0xff]  ;;  %v973_v59 = vld [vmem:[#allocation5 + $0x198] sm:$0xff] }
 0x29f   :  { %v4029_v34 = vcombine.high %v972_v23, %v976_v53  ;;  %v4028_v21 = vcombine.low %v972_v23, %v976_v53  ;;  %v4030_v48 = vcombine.low %v973_v59, %v977_v14  ;;  %v1033_v23 = vld [vmem:[#allocation5 + $0x378] sm:$0xff] }
 0x2a0   :  { %3571 = vmatpush1.bf16.msra.mxu0 %v4344_v11  ;;  %v4031_v11 = vcombine.high %v973_v59, %v977_v14 }
 0x2a1   :  { %3694 = vmatpush1.bf16.msra.mxu1 %v4346_v2  ;;  %3572 = vmatprep.subr.bf16.mxu0 %v4353_v13  ;;  %v980_v2 = vld [vmem:[#allocation5 + $0x1d0] sm:$0xff] }
 0x2a2   :  { %3695 = vmatprep.subr.bf16.mxu1 %v4355_v33  ;;  %v984_v13 = vld [vmem:[#allocation5 + $0x1f0] sm:$0xff]  ;;  %v981_v33 = vld [vmem:[#allocation5 + $0x1d8] sm:$0xff] }
 0x2a3   :  { %v4037_v19 = vcombine.high %v980_v2, %v984_v13  ;;  %v4036_v24 = vcombine.low %v980_v2, %v984_v13  ;;  %v1041_v2 = vld [vmem:[#allocation5 + $0x3b8] sm:$0xff] }
 0x2a4   :  { %3573 = vmatpush1.bf16.msra.mxu0 %v4352_v37  ;;  %v4039_v37 = vcombine.high %v981_v33, %v985_v46 }
 0x2a5   :  { %3696 = vmatpush1.bf16.msra.mxu1 %v4354_v61  ;;  %3706 = vmatprep.subr.bf16.mxu0 %v3981_v31  ;;  %v988_v61 = vld [vmem:[#allocation5 + $0x210] sm:$0xff] }
 0x2a6   :  { %3829 = vmatprep.subr.bf16.mxu1 %v3983_v36  ;;  %v992_v31 = vld [vmem:[#allocation5 + $0x230] sm:$0xff]  ;;  %v989_v36 = vld [vmem:[#allocation5 + $0x218] sm:$0xff] }
 0x2a7   :  { %3575 = vmatmul.mubr.bf16.vlgmr.msra.gmra.mrb[0].mxu0 %v5620_v7  ;;  %v4045_v35 = vcombine.high %v988_v61, %v992_v31  ;;  %v4047_v27 = vcombine.high %v989_v36, %v993_v12  ;;  %v4046_v57 = vcombine.low %v989_v36, %v993_v12 }
 0x2a8   :  { %3698 = vmatmul.mubr.bf16.vlgmr.msra.gmra.mrb[0].mxu1 %v5620_v7  ;;  %3707 = vmatpush1.bf16.msra.mxu0 %v3980_v18  ;;  %v4038_v18 = vcombine.low %v981_v33, %v985_v46 }
 0x2a9   :  { %3738 = vmatprep.mubr.bf16.mxu0 %v5408_v56  ;;  %3830 = vmatpush1.bf16.msra.mxu1 %v3982_v54  ;;  %v996_v54 = vld [vmem:[#allocation5 + $0x250] sm:$0xff] }
 0x2aa   :  { %3861 = vmatprep.mubr.bf16.mxu1 %v5408_v56  ;;  %3708 = vmatprep.subr.bf16.mxu0 %v3989_v17  ;;  %v4004_v56 = vcombine.low %v948_v45, %v952_v8  ;;  %v1000_v17 = vld [vmem:[#allocation5 + $0x270] sm:$0xff]  ;;  %v1009_v45 = vld [vmem:[#allocation5 + $0x2b8] sm:$0xff] }
 0x2ab   :  { %3831 = vmatprep.subr.bf16.mxu1 %v3991_v6  ;;  %v4044_v6 = vcombine.low %v988_v61, %v992_v31  ;;  %v4053_v55 = vcombine.high %v996_v54, %v1000_v17  ;;  %v4052_v8 = vcombine.low %v996_v54, %v1000_v17  ;;  %v1049_v61 = vld [vmem:[#allocation5 + $0x3f8] sm:$0xff] }
 0x2ac   :  { %3709 = vmatpush1.bf16.msra.mxu0 %v3988_v3  ;;  %v4055_v3 = vcombine.high %v997_v47, %v1001_v52  ;;  %v1057_v54 = vld [vmem:[#allocation5 + $0x438] sm:$0xff] }
 0x2ad   :  { %3832 = vmatpush1.bf16.msra.mxu1 %v3990_v0  ;;  %3710 = vmatprep.subr.bf16.mxu0 %v3997_v38  ;;  %v1004_v0 = vld [vmem:[#allocation5 + $0x290] sm:$0xff] }
 0x2ae   :  { %3833 = vmatprep.subr.bf16.mxu1 %v3999_v5  ;;  %v1008_v38 = vld [vmem:[#allocation5 + $0x2b0] sm:$0xff]  ;;  %v1005_v5 = vld [vmem:[#allocation5 + $0x298] sm:$0xff] }
 0x2af   :  { %v4061_v62 = vcombine.high %v1004_v0, %v1008_v38  ;;  %v4060_v63 = vcombine.low %v1004_v0, %v1008_v38  ;;  %v4062_v26 = vcombine.low %v1005_v5, %v1009_v45  ;;  %v1061_v0 = vld [vmem:[#allocation5 + $0x458] sm:$0xff] }
 0x2b0   :  { %3711 = vmatpush1.bf16.msra.mxu0 %v3996_v25  ;;  %v4063_v25 = vcombine.high %v1005_v5, %v1009_v45  ;;  %v1065_v38 = vld [vmem:[#allocation5 + $0x478] sm:$0xff] }
 0x2b1   :  { %3834 = vmatpush1.bf16.msra.mxu1 %v3998_v49  ;;  %3712 = vmatprep.subr.bf16.mxu0 %v4005_v22  ;;  %v1012_v49 = vld [vmem:[#allocation5 + $0x2d0] sm:$0xff] }
 0x2b2   :  { %3835 = vmatprep.subr.bf16.mxu1 %v4007_v20  ;;  %v1016_v22 = vld [vmem:[#allocation5 + $0x2f0] sm:$0xff]  ;;  %v1013_v20 = vld [vmem:[#allocation5 + $0x2d8] sm:$0xff] }
 0x2b3   :  { %v4069_v39 = vcombine.high %v1012_v49, %v1016_v22  ;;  %v4068_v4 = vcombine.low %v1012_v49, %v1016_v22  ;;  %v4070_v10 = vcombine.low %v1013_v20, %v1017_v41  ;;  %v1073_v49 = vld [vmem:[#allocation5 + $0x4b8] sm:$0xff] }
 0x2b4   :  { %3713 = vmatpush1.bf16.msra.mxu0 %v4004_v56  ;;  %v4071_v56 = vcombine.high %v1013_v20, %v1017_v41  ;;  %v4118_v20 = vcombine.low %v1061_v0, %v1065_v38 }
 0x2b5   :  { %3836 = vmatpush1.bf16.msra.mxu1 %v4006_v28  ;;  %3714 = vmatprep.subr.bf16.mxu0 %v4013_v51  ;;  %v1020_v28 = vld [vmem:[#allocation5 + $0x310] sm:$0xff] }
 0x2b6   :  { %3837 = vmatprep.subr.bf16.mxu1 %v4015_v1  ;;  %v1024_v51 = vld [vmem:[#allocation5 + $0x330] sm:$0xff]  ;;  %v1021_v1 = vld [vmem:[#allocation5 + $0x318] sm:$0xff] }
 0x2b7   :  { %v4077_v9 = vcombine.high %v1020_v28, %v1024_v51  ;;  %v4076_v53 = vcombine.low %v1020_v28, %v1024_v51  ;;  %v4078_v59 = vcombine.low %v1021_v1, %v1025_v40  ;;  %v1081_v28 = vld [vmem:[#allocation5 + $0x4f8] sm:$0xff] }
 0x2b8   :  { %3715 = vmatpush1.bf16.msra.mxu0 %v4012_v32  ;;  %v4079_v32 = vcombine.high %v1021_v1, %v1025_v40 }
 0x2b9   :  { %3838 = vmatpush1.bf16.msra.mxu1 %v4014_v50  ;;  %3716 = vmatprep.subr.bf16.mxu0 %v4021_v42  ;;  %v1028_v50 = vld [vmem:[#allocation5 + $0x350] sm:$0xff] }
 0x2ba   :  { %3839 = vmatprep.subr.bf16.mxu1 %v4023_v30  ;;  %v1032_v42 = vld [vmem:[#allocation5 + $0x370] sm:$0xff]  ;;  %v1029_v30 = vld [vmem:[#allocation5 + $0x358] sm:$0xff] }
 0x2bb   :  { %v4085_v14 = vcombine.high %v1028_v50, %v1032_v42  ;;  %v4084_v13 = vcombine.low %v1028_v50, %v1032_v42  ;;  %v4086_v33 = vcombine.low %v1029_v30, %v1033_v23 }
 0x2bc   :  { %3717 = vmatpush1.bf16.msra.mxu0 %v4020_v60  ;;  %v4087_v60 = vcombine.high %v1029_v30, %v1033_v23  ;;  %v1092_v23 = vld [vmem:[#allocation5 + $0x550] sm:$0xff] }
 0x2bd   :  { %3840 = vmatpush1.bf16.msra.mxu1 %v4022_v16  ;;  %3718 = vmatprep.subr.bf16.mxu0 %v4029_v34  ;;  %v1036_v16 = vld [vmem:[#allocation5 + $0x390] sm:$0xff] }
 0x2be   :  { %3841 = vmatprep.subr.bf16.mxu1 %v4031_v11  ;;  %v1040_v34 = vld [vmem:[#allocation5 + $0x3b0] sm:$0xff]  ;;  %v1037_v11 = vld [vmem:[#allocation5 + $0x398] sm:$0xff] }
 0x2bf   :  { %v4093_v46 = vcombine.high %v1036_v16, %v1040_v34  ;;  %v4092_v31 = vcombine.low %v1036_v16, %v1040_v34  ;;  %v4094_v36 = vcombine.low %v1037_v11, %v1041_v2 }
 0x2c0   :  { %3719 = vmatpush1.bf16.msra.mxu0 %v4028_v21  ;;  %v4095_v21 = vcombine.high %v1037_v11, %v1041_v2  ;;  %v1100_v2 = vld [vmem:[#allocation5 + $0x590] sm:$0xff] }
 0x2c1   :  { %3842 = vmatpush1.bf16.msra.mxu1 %v4030_v48  ;;  %3720 = vmatprep.subr.bf16.mxu0 %v4037_v19  ;;  %v1044_v48 = vld [vmem:[#allocation5 + $0x3d0] sm:$0xff] }
 0x2c2   :  { %3843 = vmatprep.subr.bf16.mxu1 %v4039_v37  ;;  %v1048_v19 = vld [vmem:[#allocation5 + $0x3f0] sm:$0xff]  ;;  %v1045_v37 = vld [vmem:[#allocation5 + $0x3d8] sm:$0xff] }
 0x2c3   :  { %v4101_v12 = vcombine.high %v1044_v48, %v1048_v19  ;;  %v4100_v17 = vcombine.low %v1044_v48, %v1048_v19  ;;  %v4102_v47 = vcombine.low %v1045_v37, %v1049_v61 }
 0x2c4   :  { %3721 = vmatpush1.bf16.msra.mxu0 %v4036_v24  ;;  %v4103_v24 = vcombine.high %v1045_v37, %v1049_v61  ;;  %v1108_v61 = vld [vmem:[#allocation5 + $0x5d0] sm:$0xff] }
 0x2c5   :  { %3844 = vmatpush1.bf16.msra.mxu1 %v4038_v18  ;;  %3722 = vmatprep.subr.bf16.mxu0 %v4045_v35  ;;  %v1052_v18 = vld [vmem:[#allocation5 + $0x410] sm:$0xff] }
 0x2c6   :  { %3845 = vmatprep.subr.bf16.mxu1 %v4047_v27  ;;  %v1056_v35 = vld [vmem:[#allocation5 + $0x430] sm:$0xff]  ;;  %v1053_v27 = vld [vmem:[#allocation5 + $0x418] sm:$0xff] }
 0x2c7   :  { %v4109_v52 = vcombine.high %v1052_v18, %v1056_v35  ;;  %v4110_v5 = vcombine.low %v1053_v27, %v1057_v54 }
 0x2c8   :  { %3723 = vmatpush1.bf16.msra.mxu0 %v4044_v6  ;;  %v4111_v6 = vcombine.high %v1053_v27, %v1057_v54  ;;  %v1116_v54 = vld [vmem:[#allocation5 + $0x610] sm:$0xff] }
 0x2c9   :  { %3846 = vmatpush1.bf16.msra.mxu1 %v4046_v57  ;;  %3724 = vmatprep.subr.bf16.mxu0 %v4053_v55  ;;  %v1060_v57 = vld [vmem:[#allocation5 + $0x450] sm:$0xff] }
 0x2ca   :  { %3847 = vmatprep.subr.bf16.mxu1 %v4055_v3  ;;  %v1064_v55 = vld [vmem:[#allocation5 + $0x470] sm:$0xff]  ;;  %v4108_v3 = vcombine.low %v1052_v18, %v1056_v35 }
 0x2cb   :  { %v4117_v45 = vcombine.high %v1060_v57, %v1064_v55  ;;  %v4116_v22 = vcombine.low %v1060_v57, %v1064_v55 }
 0x2cc   :  { %3725 = vmatpush1.bf16.msra.mxu0 %v4052_v8  ;;  %v1068_v8 = vld [vmem:[#allocation5 + $0x490] sm:$0xff] }
 0x2cd   :  { %3848 = vmatpush1.bf16.msra.mxu1 %v4054_v58  ;;  %3726 = vmatprep.subr.bf16.mxu0 %v4061_v62  ;;  %v1072_v58 = vld [vmem:[#allocation5 + $0x4b0] sm:$0xff]  ;;  %v4119_v62 = vcombine.high %v1061_v0, %v1065_v38 }
 0x2ce   :  { %3849 = vmatprep.subr.bf16.mxu1 %v4063_v25  ;;  %v1069_v25 = vld [vmem:[#allocation5 + $0x498] sm:$0xff]  ;;  %v4125_v41 = vcombine.high %v1068_v8, %v1072_v58  ;;  %v4124_v51 = vcombine.low %v1068_v8, %v1072_v58  ;;  %v1124_v0 = vld [vmem:[#allocation5 + $0x650] sm:$0xff] }
 0x2cf   :  { %v1128_v38 = vld [vmem:[#allocation5 + $0x670] sm:$0xff] }
 0x2d0   :  { %3727 = vmatpush1.bf16.msra.mxu0 %v4060_v63  ;;  %v4127_v63 = vcombine.high %v1069_v25, %v1073_v49 }
 0x2d1   :  { %3850 = vmatpush1.bf16.msra.mxu1 %v4062_v26  ;;  %3728 = vmatprep.subr.bf16.mxu0 %v4069_v39  ;;  %v1076_v26 = vld [vmem:[#allocation5 + $0x4d0] sm:$0xff] }
 0x2d2   :  { %3851 = vmatprep.subr.bf16.mxu1 %v4071_v56  ;;  %v1080_v39 = vld [vmem:[#allocation5 + $0x4f0] sm:$0xff]  ;;  %v1077_v56 = vld [vmem:[#allocation5 + $0x4d8] sm:$0xff] }
 0x2d3   :  { %v4133_v1 = vcombine.high %v1076_v26, %v1080_v39  ;;  %v4135_v40 = vcombine.high %v1077_v56, %v1081_v28  ;;  %v4134_v50 = vcombine.low %v1077_v56, %v1081_v28  ;;  %v1140_v28 = vld [vmem:[#allocation5 + $0x6d0] sm:$0xff] }
 0x2d4   :  { %3729 = vmatpush1.bf16.msra.mxu0 %v4068_v4  ;;  %v1084_v4 = vld [vmem:[#allocation5 + $0x510] sm:$0xff] }
 0x2d5   :  { %3852 = vmatpush1.bf16.msra.mxu1 %v4070_v10  ;;  %3730 = vmatprep.subr.bf16.mxu0 %v4077_v9  ;;  %v1088_v10 = vld [vmem:[#allocation5 + $0x530] sm:$0xff]  ;;  %v1085_v9 = vld [vmem:[#allocation5 + $0x518] sm:$0xff] }
 0x2d6   :  { %3853 = vmatprep.subr.bf16.mxu1 %v4079_v32  ;;  %v1089_v32 = vld [vmem:[#allocation5 + $0x538] sm:$0xff]  ;;  %v4141_v42 = vcombine.high %v1084_v4, %v1088_v10 }
 0x2d7   :  { %v4143_v30 = vcombine.high %v1085_v9, %v1089_v32  ;;  %v4142_v16 = vcombine.low %v1085_v9, %v1089_v32  ;;  %v1148_v32 = vld [vmem:[#allocation5 + $0x710] sm:$0xff] }
 0x2d8   :  { %3731 = vmatpush1.bf16.msra.mxu0 %v4076_v53  ;;  %v1096_v53 = vld [vmem:[#allocation5 + $0x570] sm:$0xff] }
 0x2d9   :  { %3854 = vmatpush1.bf16.msra.mxu1 %v4078_v59  ;;  %3732 = vmatprep.subr.bf16.mxu0 %v4085_v14  ;;  %v1093_v59 = vld [vmem:[#allocation5 + $0x558] sm:$0xff]  ;;  %v4149_v34 = vcombine.high %v1092_v23, %v1096_v53 }
 0x2da   :  { %3855 = vmatprep.subr.bf16.mxu1 %v4087_v60  ;;  %v1097_v14 = vld [vmem:[#allocation5 + $0x578] sm:$0xff]  ;;  %v4140_v60 = vcombine.low %v1084_v4, %v1088_v10 }
 0x2db   :  { %v4151_v11 = vcombine.high %v1093_v59, %v1097_v14  ;;  %v4150_v48 = vcombine.low %v1093_v59, %v1097_v14  ;;  %v1156_v14 = vld [vmem:[#allocation5 + $0x750] sm:$0xff] }
 0x2dc   :  { %3733 = vmatpush1.bf16.msra.mxu0 %v4084_v13  ;;  %v1104_v13 = vld [vmem:[#allocation5 + $0x5b0] sm:$0xff] }
 0x2dd   :  { %3856 = vmatpush1.bf16.msra.mxu1 %v4086_v33  ;;  %3734 = vmatprep.subr.bf16.mxu0 %v4093_v46  ;;  %v1101_v33 = vld [vmem:[#allocation5 + $0x598] sm:$0xff]  ;;  %v4157_v19 = vcombine.high %v1100_v2, %v1104_v13 }
 0x2de   :  { %3857 = vmatprep.subr.bf16.mxu1 %v4095_v21  ;;  %v1105_v46 = vld [vmem:[#allocation5 + $0x5b8] sm:$0xff]  ;;  %v4148_v21 = vcombine.low %v1092_v23, %v1096_v53 }
 0x2df   :  { %v4159_v37 = vcombine.high %v1101_v33, %v1105_v46  ;;  %v4158_v18 = vcombine.low %v1101_v33, %v1105_v46  ;;  %v1164_v46 = vld [vmem:[#allocation5 + $0x790] sm:$0xff] }
 0x2e0   :  { %3735 = vmatpush1.bf16.msra.mxu0 %v4092_v31  ;;  %v1112_v31 = vld [vmem:[#allocation5 + $0x5f0] sm:$0xff] }
 0x2e1   :  { %3858 = vmatpush1.bf16.msra.mxu1 %v4094_v36  ;;  %3736 = vmatprep.subr.bf16.mxu0 %v4101_v12  ;;  %v1109_v36 = vld [vmem:[#allocation5 + $0x5d8] sm:$0xff]  ;;  %v4165_v35 = vcombine.high %v1108_v61, %v1112_v31 }
 0x2e2   :  { %3859 = vmatprep.subr.bf16.mxu1 %v4103_v24  ;;  %v1113_v12 = vld [vmem:[#allocation5 + $0x5f8] sm:$0xff]  ;;  %v4156_v24 = vcombine.low %v1100_v2, %v1104_v13 }
 0x2e3   :  { %v4167_v27 = vcombine.high %v1109_v36, %v1113_v12  ;;  %v4166_v57 = vcombine.low %v1109_v36, %v1113_v12  ;;  %v1172_v12 = vld [vmem:[#allocation5 + $0x7d0] sm:$0xff] }
 0x2e4   :  { %3737 = vmatpush1.bf16.msra.mxu0 %v4100_v17  ;;  %v1120_v17 = vld [vmem:[#allocation5 + $0x630] sm:$0xff] }
 0x2e5   :  { %3860 = vmatpush1.bf16.msra.mxu1 %v4102_v47  ;;  %3747 = vmatprep.subr.bf16.mxu0 %v4109_v52  ;;  %v1117_v47 = vld [vmem:[#allocation5 + $0x618] sm:$0xff]  ;;  %v4173_v55 = vcombine.high %v1116_v54, %v1120_v17  ;;  %v4172_v8 = vcombine.low %v1116_v54, %v1120_v17 }
 0x2e6   :  { %3870 = vmatprep.subr.bf16.mxu1 %v4111_v6  ;;  %v1121_v52 = vld [vmem:[#allocation5 + $0x638] sm:$0xff]  ;;  %v4164_v6 = vcombine.low %v1108_v61, %v1112_v31 }
 0x2e7   :  { %3739 = vmatmul.mubr.bf16.vlgmr.msra.gmra.mrb[4].mxu0 %v5441_v43  ;;  %v4174_v58 = vcombine.low %v1117_v47, %v1121_v52 }
 0x2e8   :  { %3862 = vmatmul.mubr.bf16.vlgmr.msra.gmra.mrb[4].mxu1 %v5441_v43  ;;  %3748 = vmatpush1.bf16.msra.mxu0 %v4108_v3  ;;  %v4126_v43 = vcombine.low %v1069_v25, %v1073_v49  ;;  %v4175_v3 = vcombine.high %v1117_v47, %v1121_v52  ;;  %v1132_v49 = vld [vmem:[#allocation5 + $0x690] sm:$0xff] }
 0x2e9   :  { %3779 = vmatprep.mubr.bf16.mxu0 %v5494_v44  ;;  %3871 = vmatpush1.bf16.msra.mxu1 %v4110_v5  ;;  %v1125_v5 = vld [vmem:[#allocation5 + $0x658] sm:$0xff]  ;;  %v1180_v52 = vld [vmem:[#allocation5 + $0x810] sm:$0xff] }
 0x2ea   :  { %3902 = vmatprep.mubr.bf16.mxu1 %v5494_v44  ;;  %3749 = vmatprep.subr.bf16.mxu0 %v4117_v45  ;;  %v4132_v44 = vcombine.low %v1076_v26, %v1080_v39  ;;  %v1129_v45 = vld [vmem:[#allocation5 + $0x678] sm:$0xff] }
 0x2eb   :  { %3872 = vmatprep.subr.bf16.mxu1 %v4119_v62  ;;  %v4181_v62 = vcombine.high %v1124_v0, %v1128_v38  ;;  %v4183_v25 = vcombine.high %v1125_v5, %v1129_v45  ;;  %v4182_v26 = vcombine.low %v1125_v5, %v1129_v45  ;;  %v1188_v45 = vld [vmem:[#allocation5 + $0x850] sm:$0xff] }
 0x2ec   :  { %3750 = vmatpush1.bf16.msra.mxu0 %v4116_v22  ;;  %v1136_v22 = vld [vmem:[#allocation5 + $0x6b0] sm:$0xff] }
 0x2ed   :  { %3873 = vmatpush1.bf16.msra.mxu1 %v4118_v20  ;;  %3751 = vmatprep.subr.bf16.mxu0 %v4125_v41  ;;  %v1133_v20 = vld [vmem:[#allocation5 + $0x698] sm:$0xff]  ;;  %v4189_v39 = vcombine.high %v1132_v49, %v1136_v22 }
 0x2ee   :  { %3874 = vmatprep.subr.bf16.mxu1 %v4127_v63  ;;  %v1137_v41 = vld [vmem:[#allocation5 + $0x6b8] sm:$0xff]  ;;  %v4180_v63 = vcombine.low %v1124_v0, %v1128_v38 }
 0x2ef   :  { %v4191_v56 = vcombine.high %v1133_v20, %v1137_v41  ;;  %v4190_v4 = vcombine.low %v1133_v20, %v1137_v41  ;;  %v1196_v20 = vld [vmem:[#allocation5 + $0x890] sm:$0xff] }
 0x2f0   :  { %3752 = vmatpush1.bf16.msra.mxu0 %v4124_v51  ;;  %v1144_v51 = vld [vmem:[#allocation5 + $0x6f0] sm:$0xff] }
 0x2f1   :  { %3875 = vmatpush1.bf16.msra.mxu1 %v4126_v43  ;;  %3753 = vmatprep.subr.bf16.mxu0 %v4133_v1  ;;  %v1141_v43 = vld [vmem:[#allocation5 + $0x6d8] sm:$0xff]  ;;  %v4197_v10 = vcombine.high %v1140_v28, %v1144_v51  ;;  %v1200_v41 = vld [vmem:[#allocation5 + $0x8b0] sm:$0xff] }
 0x2f2   :  { %3876 = vmatprep.subr.bf16.mxu1 %v4135_v40  ;;  %v1145_v1 = vld [vmem:[#allocation5 + $0x6f8] sm:$0xff]  ;;  %v4188_v40 = vcombine.low %v1132_v49, %v1136_v22 }
 0x2f3   :  { %v4199_v9 = vcombine.high %v1141_v43, %v1145_v1  ;;  %v4198_v23 = vcombine.low %v1141_v43, %v1145_v1  ;;  %v1204_v1 = vld [vmem:[#allocation5 + $0x8d0] sm:$0xff] }
 0x2f4   :  { %3754 = vmatpush1.bf16.msra.mxu0 %v4132_v44  ;;  %v1152_v44 = vld [vmem:[#allocation5 + $0x730] sm:$0xff] }
 0x2f5   :  { %3877 = vmatpush1.bf16.msra.mxu1 %v4134_v50  ;;  %3755 = vmatprep.subr.bf16.mxu0 %v4141_v42  ;;  %v1149_v50 = vld [vmem:[#allocation5 + $0x718] sm:$0xff]  ;;  %v4205_v53 = vcombine.high %v1148_v32, %v1152_v44 }
 0x2f6   :  { %3878 = vmatprep.subr.bf16.mxu1 %v4143_v30  ;;  %v1153_v42 = vld [vmem:[#allocation5 + $0x738] sm:$0xff]  ;;  %v4196_v30 = vcombine.low %v1140_v28, %v1144_v51  ;;  %v4253_v51 = vcombine.high %v1196_v20, %v1200_v41 }
 0x2f7   :  { %v4207_v59 = vcombine.high %v1149_v50, %v1153_v42  ;;  %v4206_v2 = vcombine.low %v1149_v50, %v1153_v42  ;;  %v1212_v50 = vld [vmem:[#allocation5 + $0x910] sm:$0xff] }
 0x2f8   :  { %3756 = vmatpush1.bf16.msra.mxu0 %v4140_v60  ;;  %v1160_v60 = vld [vmem:[#allocation5 + $0x770] sm:$0xff] }
 0x2f9   :  { %3879 = vmatpush1.bf16.msra.mxu1 %v4142_v16  ;;  %3757 = vmatprep.subr.bf16.mxu0 %v4149_v34  ;;  %v1157_v16 = vld [vmem:[#allocation5 + $0x758] sm:$0xff]  ;;  %v4213_v13 = vcombine.high %v1156_v14, %v1160_v60  ;;  %v1216_v42 = vld [vmem:[#allocation5 + $0x930] sm:$0xff] }
 0x2fa   :  { %3880 = vmatprep.subr.bf16.mxu1 %v4151_v11  ;;  %v1161_v34 = vld [vmem:[#allocation5 + $0x778] sm:$0xff]  ;;  %v4204_v11 = vcombine.low %v1148_v32, %v1152_v44 }
 0x2fb   :  { %v4215_v33 = vcombine.high %v1157_v16, %v1161_v34  ;;  %v4214_v61 = vcombine.low %v1157_v16, %v1161_v34  ;;  %v1224_v16 = vld [vmem:[#allocation5 + $0x970] sm:$0xff]  ;;  %v1221_v34 = vld [vmem:[#allocation5 + $0x958] sm:$0xff] }
 0x2fc   :  { %3758 = vmatpush1.bf16.msra.mxu0 %v4148_v21  ;;  %v1168_v21 = vld [vmem:[#allocation5 + $0x7b0] sm:$0xff] }
 0x2fd   :  { %3881 = vmatpush1.bf16.msra.mxu1 %v4150_v48  ;;  %3759 = vmatprep.subr.bf16.mxu0 %v4157_v19  ;;  %v1165_v48 = vld [vmem:[#allocation5 + $0x798] sm:$0xff]  ;;  %v4221_v31 = vcombine.high %v1164_v46, %v1168_v21 }
 0x2fe   :  { %3882 = vmatprep.subr.bf16.mxu1 %v4159_v37  ;;  %v1169_v19 = vld [vmem:[#allocation5 + $0x7b8] sm:$0xff]  ;;  %v4212_v37 = vcombine.low %v1156_v14, %v1160_v60  ;;  %v1220_v60 = vld [vmem:[#allocation5 + $0x950] sm:$0xff] }
 0x2ff   :  { %v4223_v36 = vcombine.high %v1165_v48, %v1169_v19  ;;  %v4222_v54 = vcombine.low %v1165_v48, %v1169_v19  ;;  %v1232_v48 = vld [vmem:[#allocation5 + $0x9b0] sm:$0xff]  ;;  %v1229_v19 = vld [vmem:[#allocation5 + $0x998] sm:$0xff] }
 0x300   :  { %3760 = vmatpush1.bf16.msra.mxu0 %v4156_v24  ;;  %v1176_v24 = vld [vmem:[#allocation5 + $0x7f0] sm:$0xff] }
 0x301   :  { %3883 = vmatpush1.bf16.msra.mxu1 %v4158_v18  ;;  %3761 = vmatprep.subr.bf16.mxu0 %v4165_v35  ;;  %v1173_v18 = vld [vmem:[#allocation5 + $0x7d8] sm:$0xff]  ;;  %v4229_v17 = vcombine.high %v1172_v12, %v1176_v24 }
 0x302   :  { %3884 = vmatprep.subr.bf16.mxu1 %v4167_v27  ;;  %v1177_v35 = vld [vmem:[#allocation5 + $0x7f8] sm:$0xff]  ;;  %v4220_v27 = vcombine.low %v1164_v46, %v1168_v21  ;;  %v1228_v21 = vld [vmem:[#allocation5 + $0x990] sm:$0xff] }
 0x303   :  { %v4231_v47 = vcombine.high %v1173_v18, %v1177_v35  ;;  %v4230_v0 = vcombine.low %v1173_v18, %v1177_v35  ;;  %v1240_v18 = vld [vmem:[#allocation5 + $0x9f0] sm:$0xff]  ;;  %v1237_v35 = vld [vmem:[#allocation5 + $0x9d8] sm:$0xff] }
 0x304   :  { %3762 = vmatpush1.bf16.msra.mxu0 %v4164_v6  ;;  %v1184_v6 = vld [vmem:[#allocation5 + $0x830] sm:$0xff] }
 0x305   :  { %3885 = vmatpush1.bf16.msra.mxu1 %v4166_v57  ;;  %3763 = vmatprep.subr.bf16.mxu0 %v4173_v55  ;;  %v1181_v57 = vld [vmem:[#allocation5 + $0x818] sm:$0xff]  ;;  %v4237_v38 = vcombine.high %v1180_v52, %v1184_v6 }
 0x306   :  { %3886 = vmatprep.subr.bf16.mxu1 %v4175_v3  ;;  %v1185_v55 = vld [vmem:[#allocation5 + $0x838] sm:$0xff]  ;;  %v4228_v3 = vcombine.low %v1172_v12, %v1176_v24  ;;  %v1236_v24 = vld [vmem:[#allocation5 + $0x9d0] sm:$0xff] }
 0x307   :  { %v4239_v5 = vcombine.high %v1181_v57, %v1185_v55  ;;  %v4238_v49 = vcombine.low %v1181_v57, %v1185_v55  ;;  %v1248_v57 = vld [vmem:[#allocation5 + $0xa30] sm:$0xff]  ;;  %v1245_v55 = vld [vmem:[#allocation5 + $0xa18] sm:$0xff] }
 0x308   :  { %3764 = vmatpush1.bf16.msra.mxu0 %v4172_v8  ;;  %v1192_v8 = vld [vmem:[#allocation5 + $0x870] sm:$0xff] }
 0x309   :  { %3887 = vmatpush1.bf16.msra.mxu1 %v4174_v58  ;;  %3765 = vmatprep.subr.bf16.mxu0 %v4181_v62  ;;  %v4236_v58 = vcombine.low %v1180_v52, %v1184_v6  ;;  %v1189_v62 = vld [vmem:[#allocation5 + $0x858] sm:$0xff]  ;;  %v4245_v22 = vcombine.high %v1188_v45, %v1192_v8  ;;  %v1244_v6 = vld [vmem:[#allocation5 + $0xa10] sm:$0xff] }
 0x30a   :  { %3888 = vmatprep.subr.bf16.mxu1 %v4183_v25  ;;  %v1193_v25 = vld [vmem:[#allocation5 + $0x878] sm:$0xff] }
 0x30b   :  { %v4246_v28 = vcombine.low %v1189_v62, %v1193_v25 }
 0x30c   :  { %3766 = vmatpush1.bf16.msra.mxu0 %v4180_v63  ;;  %v4247_v63 = vcombine.high %v1189_v62, %v1193_v25  ;;  %v1253_v62 = vld [vmem:[#allocation5 + $0xa58] sm:$0xff] }
 0x30d   :  { %3889 = vmatpush1.bf16.msra.mxu1 %v4182_v26  ;;  %3767 = vmatprep.subr.bf16.mxu0 %v4189_v39  ;;  %v1197_v26 = vld [vmem:[#allocation5 + $0x898] sm:$0xff] }
 0x30e   :  { %3890 = vmatprep.subr.bf16.mxu1 %v4191_v56  ;;  %v1201_v39 = vld [vmem:[#allocation5 + $0x8b8] sm:$0xff]  ;;  %v4244_v56 = vcombine.low %v1188_v45, %v1192_v8  ;;  %v1252_v8 = vld [vmem:[#allocation5 + $0xa50] sm:$0xff] }
 0x30f   :  { %v4255_v43 = vcombine.high %v1197_v26, %v1201_v39  ;;  %v1257_v25 = vld [vmem:[#allocation5 + $0xa78] sm:$0xff] }
 0x310   :  { %3768 = vmatpush1.bf16.msra.mxu0 %v4188_v40  ;;  %v1208_v40 = vld [vmem:[#allocation5 + $0x8f0] sm:$0xff] }
 0x311   :  { %3891 = vmatpush1.bf16.msra.mxu1 %v4190_v4  ;;  %3769 = vmatprep.subr.bf16.mxu0 %v4197_v10  ;;  %v1205_v4 = vld [vmem:[#allocation5 + $0x8d8] sm:$0xff]  ;;  %v4261_v32 = vcombine.high %v1204_v1, %v1208_v40 }
 0x312   :  { %3892 = vmatprep.subr.bf16.mxu1 %v4199_v9  ;;  %v1209_v10 = vld [vmem:[#allocation5 + $0x8f8] sm:$0xff]  ;;  %v4252_v9 = vcombine.low %v1196_v20, %v1200_v41  ;;  %v4311_v41 = vcombine.high %v1253_v62, %v1257_v25 }
 0x313   :  { %v4263_v44 = vcombine.high %v1205_v4, %v1209_v10 }
 0x314   :  { %3770 = vmatpush1.bf16.msra.mxu0 %v4196_v30  ;;  %v1213_v30 = vld [vmem:[#allocation5 + $0x918] sm:$0xff] }
 0x315   :  { %3893 = vmatpush1.bf16.msra.mxu1 %v4198_v23  ;;  %3771 = vmatprep.subr.bf16.mxu0 %v4205_v53  ;;  %v1217_v23 = vld [vmem:[#allocation5 + $0x938] sm:$0xff]  ;;  %v4262_v53 = vcombine.low %v1205_v4, %v1209_v10  ;;  %v1272_v4 = vld [vmem:[#allocation5 + $0xaf0] sm:$0xff] }
 0x316   :  { %3894 = vmatprep.subr.bf16.mxu1 %v4207_v59  ;;  %v4269_v59 = vcombine.high %v1212_v50, %v1216_v42  ;;  %v4271_v14 = vcombine.high %v1213_v30, %v1217_v23  ;;  %v1269_v10 = vld [vmem:[#allocation5 + $0xad8] sm:$0xff] }
 0x318   :  { %3772 = vmatpush1.bf16.msra.mxu0 %v4204_v11  ;;  %v1225_v11 = vld [vmem:[#allocation5 + $0x978] sm:$0xff] }
 0x319   :  { %3895 = vmatpush1.bf16.msra.mxu1 %v4206_v2  ;;  %3773 = vmatprep.subr.bf16.mxu0 %v4213_v13  ;;  %v4268_v2 = vcombine.low %v1212_v50, %v1216_v42  ;;  %v4270_v13 = vcombine.low %v1213_v30, %v1217_v23  ;;  %v4279_v46 = vcombine.high %v1221_v34, %v1225_v11  ;;  %v1276_v42 = vld [vmem:[#allocation5 + $0xb10] sm:$0xff]  ;;  %v1277_v23 = vld [vmem:[#allocation5 + $0xb18] sm:$0xff] }
 0x31a   :  { %3896 = vmatprep.subr.bf16.mxu1 %v4215_v33  ;;  %v4277_v33 = vcombine.high %v1220_v60, %v1224_v16  ;;  %v1280_v30 = vld [vmem:[#allocation5 + $0xb30] sm:$0xff] }
 0x31c   :  { %3774 = vmatpush1.bf16.msra.mxu0 %v4212_v37  ;;  %v1233_v37 = vld [vmem:[#allocation5 + $0x9b8] sm:$0xff] }
 0x31d   :  { %3897 = vmatpush1.bf16.msra.mxu1 %v4214_v61  ;;  %3775 = vmatprep.subr.bf16.mxu0 %v4221_v31  ;;  %v4276_v61 = vcombine.low %v1220_v60, %v1224_v16  ;;  %v4278_v31 = vcombine.low %v1221_v34, %v1225_v11  ;;  %v4287_v12 = vcombine.high %v1229_v19, %v1233_v37  ;;  %v1284_v16 = vld [vmem:[#allocation5 + $0xb50] sm:$0xff]  ;;  %v1285_v11 = vld [vmem:[#allocation5 + $0xb58] sm:$0xff] }
 0x31e   :  { %3898 = vmatprep.subr.bf16.mxu1 %v4223_v36  ;;  %v4285_v36 = vcombine.high %v1228_v21, %v1232_v48  ;;  %v1288_v34 = vld [vmem:[#allocation5 + $0xb70] sm:$0xff] }
 0x320   :  { %3776 = vmatpush1.bf16.msra.mxu0 %v4220_v27  ;;  %v1241_v27 = vld [vmem:[#allocation5 + $0x9f8] sm:$0xff] }
 0x321   :  { %3899 = vmatpush1.bf16.msra.mxu1 %v4222_v54  ;;  %3777 = vmatprep.subr.bf16.mxu0 %v4229_v17  ;;  %v4284_v54 = vcombine.low %v1228_v21, %v1232_v48  ;;  %v4286_v17 = vcombine.low %v1229_v19, %v1233_v37  ;;  %v4295_v52 = vcombine.high %v1237_v35, %v1241_v27  ;;  %v1292_v48 = vld [vmem:[#allocation5 + $0xb90] sm:$0xff]  ;;  %v1293_v37 = vld [vmem:[#allocation5 + $0xb98] sm:$0xff] }
 0x322   :  { %3900 = vmatprep.subr.bf16.mxu1 %v4231_v47  ;;  %v4293_v47 = vcombine.high %v1236_v24, %v1240_v18  ;;  %v1296_v19 = vld [vmem:[#allocation5 + $0xbb0] sm:$0xff] }
 0x324   :  { %3778 = vmatpush1.bf16.msra.mxu0 %v4228_v3  ;;  %v1249_v3 = vld [vmem:[#allocation5 + $0xa38] sm:$0xff] }
 0x325   :  { %3901 = vmatpush1.bf16.msra.mxu1 %v4230_v0  ;;  %3788 = vmatprep.subr.bf16.mxu0 %v4237_v38  ;;  %v4292_v0 = vcombine.low %v1236_v24, %v1240_v18  ;;  %v4294_v38 = vcombine.low %v1237_v35, %v1241_v27  ;;  %v4303_v45 = vcombine.high %v1245_v55, %v1249_v3  ;;  %v1300_v18 = vld [vmem:[#allocation5 + $0xbd0] sm:$0xff]  ;;  %v1301_v27 = vld [vmem:[#allocation5 + $0xbd8] sm:$0xff] }
 0x326   :  { %3911 = vmatprep.subr.bf16.mxu1 %v4239_v5  ;;  %v4301_v5 = vcombine.high %v1244_v6, %v1248_v57  ;;  %v1304_v35 = vld [vmem:[#allocation5 + $0xbf0] sm:$0xff] }
 0x327   :  { %3780 = vmatmul.mubr.bf16.vlgmr.msra.gmra.mrb[4].mxu0 %v5608_v15 }
 0x328   :  { %3903 = vmatmul.mubr.bf16.vlgmr.msra.gmra.mrb[4].mxu1 %v5608_v15  ;;  %3789 = vmatpush1.bf16.msra.mxu0 %v4236_v58  ;;  %v4254_v15 = vcombine.low %v1197_v26, %v1201_v39  ;;  %v1256_v58 = vld [vmem:[#allocation5 + $0xa70] sm:$0xff]  ;;  %v1261_v39 = vld [vmem:[#allocation5 + $0xa98] sm:$0xff] }
 0x329   :  { %3820 = vmatprep.mubr.bf16.mxu0 %v5612_v29  ;;  %3912 = vmatpush1.bf16.msra.mxu1 %v4238_v49  ;;  %v4300_v49 = vcombine.low %v1244_v6, %v1248_v57  ;;  %v4309_v20 = vcombine.high %v1252_v8, %v1256_v58  ;;  %v1264_v26 = vld [vmem:[#allocation5 + $0xab0] sm:$0xff]  ;;  %v4356_v57 = vcombine.low %v1300_v18, %v1304_v35 }
 0x32a   :  { %3943 = vmatprep.mubr.bf16.mxu1 %v5612_v29  ;;  %3790 = vmatprep.subr.bf16.mxu0 %v4245_v22  ;;  %v4260_v29 = vcombine.low %v1204_v1, %v1208_v40  ;;  %v4302_v22 = vcombine.low %v1245_v55, %v1249_v3  ;;  %v1268_v40 = vld [vmem:[#allocation5 + $0xad0] sm:$0xff]  ;;  %v1308_v3 = vlaneseq }
 0x32b   :  { %3913 = vmatprep.subr.bf16.mxu1 %v4247_v63  ;;  %v1260_v63 = vld [vmem:[#allocation5 + $0xa90] sm:$0xff] }
 0x32c   :  { %3791 = vmatpush1.bf16.msra.mxu0 %v4244_v56  ;;  %v1265_v56 = vld [vmem:[#allocation5 + $0xab8] sm:$0xff] }
 0x32d   :  { %3914 = vmatpush1.bf16.msra.mxu1 %v4246_v28  ;;  %3792 = vmatprep.subr.bf16.mxu0 %v4253_v51  ;;  %v4308_v28 = vcombine.low %v1252_v8, %v1256_v58  ;;  %v4310_v51 = vcombine.low %v1253_v62, %v1257_v25  ;;  %v4319_v1 = vcombine.high %v1261_v39, %v1265_v56 }
 0x32e   :  { %3915 = vmatprep.subr.bf16.mxu1 %v4255_v43  ;;  %v4317_v43 = vcombine.high %v1260_v63, %v1264_v26 }
 0x330   :  { %3793 = vmatpush1.bf16.msra.mxu0 %v4252_v9  ;;  %v1273_v9 = vld [vmem:[#allocation5 + $0xaf8] sm:$0xff] }
 0x331   :  { %3916 = vmatpush1.bf16.msra.mxu1 %v4254_v15  ;;  %3794 = vmatprep.subr.bf16.mxu0 %v4261_v32  ;;  %v4316_v15 = vcombine.low %v1260_v63, %v1264_v26  ;;  %v4318_v32 = vcombine.low %v1261_v39, %v1265_v56  ;;  %v4327_v50 = vcombine.high %v1269_v10, %v1273_v9 }
 0x332   :  { %3917 = vmatprep.subr.bf16.mxu1 %v4263_v44  ;;  %v4325_v44 = vcombine.high %v1268_v40, %v1272_v4 }
 0x334   :  { %3795 = vmatpush1.bf16.msra.mxu0 %v4260_v29  ;;  %v1281_v29 = vld [vmem:[#allocation5 + $0xb38] sm:$0xff] }
 0x335   :  { %3918 = vmatpush1.bf16.msra.mxu1 %v4262_v53  ;;  %3796 = vmatprep.subr.bf16.mxu0 %v4269_v59  ;;  %v4324_v53 = vcombine.low %v1268_v40, %v1272_v4  ;;  %v4326_v59 = vcombine.low %v1269_v10, %v1273_v9  ;;  %v4335_v60 = vcombine.high %v1277_v23, %v1281_v29 }
 0x336   :  { %3919 = vmatprep.subr.bf16.mxu1 %v4271_v14  ;;  %v4333_v14 = vcombine.high %v1276_v42, %v1280_v30 }
 0x338   :  { %3797 = vmatpush1.bf16.msra.mxu0 %v4268_v2  ;;  %v1289_v2 = vld [vmem:[#allocation5 + $0xb78] sm:$0xff] }
 0x339   :  { %3920 = vmatpush1.bf16.msra.mxu1 %v4270_v13  ;;  %3798 = vmatprep.subr.bf16.mxu0 %v4277_v33  ;;  %v4332_v13 = vcombine.low %v1276_v42, %v1280_v30  ;;  %v4334_v33 = vcombine.low %v1277_v23, %v1281_v29  ;;  %v4343_v21 = vcombine.high %v1285_v11, %v1289_v2 }
 0x33a   :  { %3921 = vmatprep.subr.bf16.mxu1 %v4279_v46  ;;  %v4341_v46 = vcombine.high %v1284_v16, %v1288_v34 }
 0x33c   :  { %3799 = vmatpush1.bf16.msra.mxu0 %v4276_v61  ;;  %v1297_v61 = vld [vmem:[#allocation5 + $0xbb8] sm:$0xff] }
 0x33d   :  { %3922 = vmatpush1.bf16.msra.mxu1 %v4278_v31  ;;  %3800 = vmatprep.subr.bf16.mxu0 %v4285_v36  ;;  %v4340_v31 = vcombine.low %v1284_v16, %v1288_v34  ;;  %v4342_v36 = vcombine.low %v1285_v11, %v1289_v2  ;;  %v4351_v24 = vcombine.high %v1293_v37, %v1297_v61 }
 0x33e   :  { %3923 = vmatprep.subr.bf16.mxu1 %v4287_v12  ;;  %v4349_v12 = vcombine.high %v1292_v48, %v1296_v19 }
 0x340   :  { %3801 = vmatpush1.bf16.msra.mxu0 %v4284_v54  ;;  %v1305_v54 = vld [vmem:[#allocation5 + $0xbf8] sm:$0xff] }
 0x341   :  { %3924 = vmatpush1.bf16.msra.mxu1 %v4286_v17  ;;  %3802 = vmatprep.subr.bf16.mxu0 %v4293_v47  ;;  %v4348_v17 = vcombine.low %v1292_v48, %v1296_v19  ;;  %v4350_v47 = vcombine.low %v1293_v37, %v1297_v61  ;;  %v4359_v6 = vcombine.high %v1301_v27, %v1305_v54 }
 0x342   :  { %3925 = vmatprep.subr.bf16.mxu1 %v4295_v52  ;;  %v4357_v52 = vcombine.high %v1300_v18, %v1304_v35  ;;  %v4358_v55 = vcombine.low %v1301_v27, %v1305_v54 }
 0x344   :  { %3803 = vmatpush1.bf16.msra.mxu0 %v4292_v0  ;;  %v1309_v0 = vshrl.u32 %v1308_v3, 7 }
 0x345   :  { %3926 = vmatpush1.bf16.msra.mxu1 %v4294_v38  ;;  %3804 = vmatprep.subr.bf16.mxu0 %v4301_v5  ;;  %v1306_v5 = vld [vmem:[#allocation7] sm:$0xff] }
 0x346   :  { %3927 = vmatprep.subr.bf16.mxu1 %v4303_v45  ;;  %v1310_v38 = vsub.s32 0, %v1309_v0  ;;  %v1318_v45 = vsub.s32 2, %v1309_v0  ;;  %v1314_v8 = vsub.s32 1, %v1309_v0  ;;  %v1322_v58 = vsub.s32 3, %v1309_v0 }
 0x347   :  { %v1326_v4 = vsub.s32 4, %v1309_v0  ;;  %v1334_v10 = vsub.s32 6, %v1309_v0  ;;  %v1330_v9 = vsub.s32 5, %v1309_v0 }
 0x348   :  { %3805 = vmatpush1.bf16.msra.mxu0 %v4300_v49  ;;  %v1311_v62 = vrot.slane %v1306_v5, %v1310_v38  ;;  %v1319_v25 = vrot.slane %v1306_v5, %v1318_v45  ;;  %v1315_v49 = vrot.slane %v1306_v5, %v1314_v8 }
 0x349   :  { %3928 = vmatpush1.bf16.msra.mxu1 %v4302_v22  ;;  %3806 = vmatprep.subr.bf16.mxu0 %v4309_v20  ;;  %v1323_v22 = vrot.slane %v1306_v5, %v1322_v58 }
 0x34a   :  { %3929 = vmatprep.subr.bf16.mxu1 %v4311_v41 }
 0x34c   :  { %3807 = vmatpush1.bf16.msra.mxu0 %v4308_v28 }
 0x34d   :  { %3930 = vmatpush1.bf16.msra.mxu1 %v4310_v51  ;;  %3808 = vmatprep.subr.bf16.mxu0 %v4317_v43 }
 0x34e   :  { %3931 = vmatprep.subr.bf16.mxu1 %v4319_v1 }
 0x350   :  { %3809 = vmatpush1.bf16.msra.mxu0 %v4316_v15  ;;  %v1338_v15 = vsub.s32 7, %v1309_v0 }
 0x351   :  { %3932 = vmatpush1.bf16.msra.mxu1 %v4318_v32  ;;  %3810 = vmatprep.subr.bf16.mxu0 %v4325_v44  ;;  %v1327_v32 = vrot.slane %v1306_v5, %v1326_v4  ;;  %v1335_v44 = vrot.slane %v1306_v5, %v1334_v10 }
 0x352   :  { %3933 = vmatprep.subr.bf16.mxu1 %v4327_v50  ;;  %v1331_v50 = vrot.slane %v1306_v5, %v1330_v9  ;;  %v1339_v42 = vrot.slane %v1306_v5, %v1338_v15 }
 0x354   :  { %3811 = vmatpush1.bf16.msra.mxu0 %v4324_v53 }
 0x355   :  { %3934 = vmatpush1.bf16.msra.mxu1 %v4326_v59  ;;  %3812 = vmatprep.subr.bf16.mxu0 %v4333_v14 }
 0x356   :  { %3935 = vmatprep.subr.bf16.mxu1 %v4335_v60 }
 0x358   :  { %3813 = vmatpush1.bf16.msra.mxu0 %v4332_v13 }
 0x359   :  { %3936 = vmatpush1.bf16.msra.mxu1 %v4334_v33  ;;  %3814 = vmatprep.subr.bf16.mxu0 %v4341_v46 }
 0x35a   :  { %3937 = vmatprep.subr.bf16.mxu1 %v4343_v21 }
 0x35c   :  { %3815 = vmatpush1.bf16.msra.mxu0 %v4340_v31 }
 0x35d   :  { %3938 = vmatpush1.bf16.msra.mxu1 %v4342_v36  ;;  %3816 = vmatprep.subr.bf16.mxu0 %v4349_v12 }
 0x35e   :  { %3939 = vmatprep.subr.bf16.mxu1 %v4351_v24 }
 0x360   :  { %3817 = vmatpush1.bf16.msra.mxu0 %v4348_v17 }
 0x361   :  { %3940 = vmatpush1.bf16.msra.mxu1 %v4350_v47  ;;  %3818 = vmatprep.subr.bf16.mxu0 %v4357_v52 }
 0x362   :  { %3941 = vmatprep.subr.bf16.mxu1 %v4359_v6 }
 0x364   :  { %3819 = vmatpush1.bf16.msra.mxu0 %v4356_v57 }
 0x365   :  { %3942 = vmatpush1.bf16.msra.mxu1 %v4358_v55 }
 0x367   :  { %3821 = vmatmul.mubr.bf16.vlgmr.msra.gmra.mrb[4].mxu0 %v5620_v7 }
 0x368   :  { %3944 = vmatmul.mubr.bf16.vlgmr.msra.gmra.mrb[4].mxu1 %v5620_v7 }
 0x37a   :  { %v3576_v20 = vpop.f32.mrb[0].mxu0 }
 0x37b   :  { %v4360_v41 = vadd.f32 %v3576_v20, %v1311_v62  ;;  %v3699_v63 = vpop.f32.mrb[0].mxu1  ;;  %v3578_v26 = vpop.f32.mrb[1].mxu0 }
 0x37c   :  { %v4362_v39 = vadd.f32 %v3699_v63, %v1319_v25  ;;  %v4361_v56 = vadd.f32 %v3578_v26, %v1315_v49  ;;  %v3701_v28 = vpop.f32.mrb[1].mxu1  ;;  %v3580_v51 = vpop.f32.mrb[2].mxu0 }
 0x37d   :  { %3952 = vst [vmem:[#allocation8] sm:$0xff] %v4360_v41  ;;  %v4363_v7 = vadd.f32 %v3701_v28, %v1323_v22  ;;  %v3703_v43 = vpop.f32.mrb[2].mxu1  ;;  %v3581_v1 = vpop.f32.mrb[3].mxu0 }
 0x37e   :  { %3954 = vst [vmem:[#allocation8 + $0x10] sm:$0xff] %v4362_v39  ;;  %3953 = vst [vmem:[#allocation8 + $0x8] sm:$0xff] %v4361_v56  ;;  %v3704_v40 = vpop.f32.mrb[3].mxu1 }
 0x37f   :  { %3955 = vst [vmem:[#allocation8 + $0x18] sm:$0xff] %v4363_v7 }
 0x43a   :  { %v3822_v30 = vpop.f32.mrb[4].mxu0 }
 0x43b   :  { %v4364_v23 = vadd.f32 %v3822_v30, %v1327_v32  ;;  %v3945_v29 = vpop.f32.mrb[4].mxu1  ;;  %v3824_v53 = vpop.f32.mrb[5].mxu0 }
 0x43c   :  { %v4366_v59 = vadd.f32 %v3945_v29, %v1335_v44  ;;  %v4365_v14 = vadd.f32 %v3824_v53, %v1331_v50  ;;  %v3947_v60 = vpop.f32.mrb[5].mxu1  ;;  %v3826_v16 = vpop.f32.mrb[6].mxu0 }
 0x43d   :  { %3956 = vst [vmem:[#allocation8 + $0x20] sm:$0xff] %v4364_v23  ;;  %v4367_v34 = vadd.f32 %v3947_v60, %v1339_v42  ;;  %v3949_v11 = vpop.f32.mrb[6].mxu1  ;;  %v3827_v2 = vpop.f32.mrb[7].mxu0 }
 0x43e   :  { %3958 = vst [vmem:[#allocation8 + $0x30] sm:$0xff] %v4366_v59  ;;  %3957 = vst [vmem:[#allocation8 + $0x28] sm:$0xff] %v4365_v14  ;;  %v3950_v13 = vpop.f32.mrb[7].mxu1 }
 0x43f   :  { %3959 = vst [vmem:[#allocation8 + $0x38] sm:$0xff] %v4367_v34 }
 0x440   :  { %4487 = shalt.err (!%p4484_p0)
}
 0x441   :  { %s4488_s27 = scalar_lea.hbm %s5651_s3, 1024 }
 0x442   :  { %p4489_p1 = scmp.ne.s32.totalorder %s5651_s3, %s4488_s27  ;;  %p4492_p2 = scmp.lt.u32.totalorder %s4488_s27, %s5651_s3 }
 0x444   :  { %p4494_p3 = pnand %p4492_p2, %p4489_p1 }
 0x446   :  { %4497 = shalt.err (!%p4494_p3)
}
 0x447   :  { %3969 = dma.vmem_to_hbm [thread:$0]  %s3967_s23, 1024, %s5651_s3, [#allocation4]  }
 0x448   :  { %4502 = dma.done.wait [#allocation4], 1024  }
 0x449   :  { %4503 = vsyncadd [#allocation4], 4294966272 }
 0x44a   :  { %3973 = vsyncpa [#allocation3], 1 }
 0x44b   :  { %3974 = vsyncpa [#allocation6], 1 }
 0x44c   :  { %3975 = vsyncpa [#allocation4], 1 }

</bundles_post_ra>
